<compile_context>
chip_gen: v7x
topology: tpu7x:2x2x1
jax: 0.10.0
libtpu: 0.0.40
codegen_flags: <defaults>
</compile_context>

<pallas_src>
import math
import functools

import jax
import jax.numpy as jnp
from jax.experimental import pallas as pl
from jax.experimental.pallas import tpu as pltpu


def _layernorm(x, g, b, eps=1e-5):
    mu = jnp.mean(x, axis=-1, keepdims=True)
    var = jnp.mean((x - mu) ** 2, axis=-1, keepdims=True)
    return (x - mu) * jax.lax.rsqrt(var + eps) * g + b


def _trans_encoder_kernel(n_head, batch_block, mm_dtype,
                          x_ref, pe_ref,
                          wqkv_ref, bqkv_ref, wo_ref, bo_ref,
                          w1_ref, b1_ref, w2_ref, b2_ref,
                          g1_ref, be1_ref, g2_ref, be2_ref,
                          gf_ref, bef_ref,
                          o_ref):
    H = n_head
    S = x_ref.shape[0]
    D = x_ref.shape[2]
    hd = D // H
    scale = 1.0 / math.sqrt(hd)

    # Load params once per grid step; they stay resident across the batch loop.
    pe = pe_ref[...]                       # (S, D)       f32
    wqkv = wqkv_ref[...]                   # (3H, D, hd)  mm_dtype
    bqkv = bqkv_ref[...]                   # (3H, 1, hd)  f32
    wo = wo_ref[...]                       # (H, hd, D)   mm_dtype
    bo = bo_ref[...]                       # (1, D)       f32
    w1 = w1_ref[...]                       # (D, FF)      mm_dtype
    b1 = b1_ref[...]                       # (1, FF)      f32
    w2 = w2_ref[...]                       # (FF, D)      mm_dtype
    b2 = b2_ref[...]                       # (1, D)       f32
    g1, be1 = g1_ref[...], be1_ref[...]
    g2, be2 = g2_ref[...], be2_ref[...]
    gf, bef = gf_ref[...], bef_ref[...]

    # Static unrolled loop over the batch block: per-grid-step overhead is paid
    # once for the whole batch instead of once per sample.
    for b in range(batch_block):
        # -------- positional encoding --------
        xb = x_ref[:, b, :].astype(jnp.float32) + pe            # (S, D) f32
        xb_m = xb.astype(mm_dtype)

        # -------- fused q/k/v projection (heads + q/k/v on the major axis) ---
        xg = jnp.broadcast_to(xb_m[None], (3 * H, S, D))         # (3H, S, D)
        qkv = jnp.einsum('gsd,gdf->gsf', xg, wqkv,
                         preferred_element_type=jnp.float32) + bqkv  # (3H,S,hd)
        q = qkv[0:H] * scale                                     # (H, S, hd)
        k = qkv[H:2 * H]                                         # (H, S, hd)
        v = qkv[2 * H:3 * H]                                     # (H, S, hd)

        # -------- scaled dot-product attention, batched over heads ----------
        s = jnp.einsum('hqf,hkf->hqk', q.astype(mm_dtype), k.astype(mm_dtype),
                       preferred_element_type=jnp.float32)       # (H, S, S) f32
        s = s - jnp.max(s, axis=-1, keepdims=True)
        p = jnp.exp(s)
        p = p / jnp.sum(p, axis=-1, keepdims=True)
        ctx = jnp.einsum('hqk,hkf->hqf', p.astype(mm_dtype), v.astype(mm_dtype),
                         preferred_element_type=jnp.float32)     # (H, S, hd)

        # -------- output projection: per-head matmul + head-sum (no concat) --
        attn = jnp.einsum('hqf,hfd->hqd', ctx.astype(mm_dtype), wo,
                          preferred_element_type=jnp.float32)    # (H, S, D)
        attn = jnp.sum(attn, axis=0) + bo                        # (S, D)

        # -------- residual + LayerNorm 1 (post-norm) --------
        y = _layernorm(xb + attn, g1, be1)

        # -------- feed forward --------
        h1 = jnp.dot(y.astype(mm_dtype), w1,
                     preferred_element_type=jnp.float32) + b1
        h1 = jnp.maximum(h1, 0.0)                                # relu
        h2 = jnp.dot(h1.astype(mm_dtype), w2,
                     preferred_element_type=jnp.float32) + b2

        # -------- residual + LayerNorm 2, then final encoder LayerNorm -------
        z = _layernorm(y + h2, g2, be2)
        out = _layernorm(z, gf, bef)

        o_ref[:, b, :] = out.astype(o_ref.dtype)


def make_positional_encoding(max_len, d_model):
    position = jnp.arange(max_len, dtype=jnp.float32)[:, None]
    div_term = jnp.exp(
        jnp.arange(0, d_model, 2, dtype=jnp.float32) * (-math.log(10000.0) / d_model))
    pe = jnp.zeros((max_len, d_model), jnp.float32)
    pe = pe.at[:, 0::2].set(jnp.sin(position * div_term))
    pe = pe.at[:, 1::2].set(jnp.cos(position * div_term))
    return pe  # (max_len, d_model)


def init_params(key, d_model, n_head, dim_ff, num_frames):
    """Deterministic synthetic parameters.  Weights are stored pre-transposed
    so the math is  y = x @ W + b  (PyTorch Linear is x @ W.T + b)."""
    ks = jax.random.split(key, 10)
    s = 0.05
    return {
        "pe":   make_positional_encoding(num_frames, d_model),
        # MHA in_proj (q, k, v stacked on the output columns) and out_proj.
        "wqkv": jax.random.normal(ks[0], (d_model, 3 * d_model), jnp.float32) * s,
        "bqkv": jax.random.normal(ks[1], (1, 3 * d_model), jnp.float32) * s,
        "wo":   jax.random.normal(ks[2], (d_model, d_model), jnp.float32) * s,
        "bo":   jax.random.normal(ks[3], (1, d_model), jnp.float32) * s,
        # feed-forward
        "w1":   jax.random.normal(ks[4], (d_model, dim_ff), jnp.float32) * s,
        "b1":   jax.random.normal(ks[5], (1, dim_ff), jnp.float32) * s,
        "w2":   jax.random.normal(ks[6], (dim_ff, d_model), jnp.float32) * s,
        "b2":   jax.random.normal(ks[7], (1, d_model), jnp.float32) * s,
        # LayerNorms (layer norm1 / norm2, final encoder norm)
        "g1":   1.0 + 0.1 * jax.random.normal(ks[8], (1, d_model), jnp.float32),
        "be1":  0.1 * jax.random.normal(ks[9], (1, d_model), jnp.float32),
        "g2":   jnp.ones((1, d_model), jnp.float32),
        "be2":  jnp.zeros((1, d_model), jnp.float32),
        "gf":   jnp.ones((1, d_model), jnp.float32),
        "bef":  jnp.zeros((1, d_model), jnp.float32),
    }


def trans_encoder_forward(src, params, *, n_head, batch_block=None,
                          matmul_dtype=jnp.bfloat16):
    """src: (S, B, D) float32 (sequence-first, PyTorch convention)."""
    S, B, D = src.shape
    H = n_head
    hd = D // H
    if batch_block is None:
        batch_block = B                    # fold the whole batch: one grid step
    assert B % batch_block == 0
    assert batch_block == B or batch_block % 8 == 0, (
        "batch_block must be the full batch or a multiple of 8 (sublane rule)")

    # ---- trace-time parameter plumbing (free: becomes compile-time layout) ----
    # q/k/v weights -> (3H, D, hd): q/k/v and head splits land on the major axis.
    wqkv_r = (params["wqkv"].reshape(D, 3, H, hd)
              .transpose(1, 2, 0, 3)
              .reshape(3 * H, D, hd)).astype(matmul_dtype)
    bqkv_r = params["bqkv"].reshape(3 * H, hd)[:, None, :]          # (3H,1,hd) f32
    wo_r = params["wo"].reshape(H, hd, D).astype(matmul_dtype)       # (H, hd, D)
    w1 = params["w1"].astype(matmul_dtype)
    w2 = params["w2"].astype(matmul_dtype)
    pe = params["pe"][:S]                                            # (S, D) f32

    weights = [
        pe,
        wqkv_r, bqkv_r, wo_r, params["bo"],
        w1, params["b1"], w2, params["b2"],
        params["g1"], params["be1"], params["g2"], params["be2"],
        params["gf"], params["bef"],
    ]

    def full_spec(a):
        return pl.BlockSpec(a.shape, lambda i, n=a.ndim: (0,) * n)

    in_specs = ([pl.BlockSpec((S, batch_block, D), lambda i: (0, i, 0))]
                + [full_spec(w) for w in weights])

    kernel = functools.partial(_trans_encoder_kernel, H, batch_block, matmul_dtype)

    return pl.pallas_call(
        kernel,
        out_shape=jax.ShapeDtypeStruct((S, B, D), src.dtype),
        grid=(B // batch_block,),
        in_specs=in_specs,
        out_specs=pl.BlockSpec((S, batch_block, D), lambda i: (0, i, 0)),
        compiler_params=pltpu.CompilerParams(
            dimension_semantics=("parallel",)),
    )(src, *weights)


def _reference_forward(src, params, *, n_head):
    """Pure-JAX f32 reference with PyTorch TransformerEncoder semantics."""
    S, B, D = src.shape
    H = n_head
    hd = D // H
    scale = 1.0 / math.sqrt(hd)
    x = src + params["pe"][:S][:, None, :]                 # (S, B, D)
    outs = []
    for b in range(B):
        xb = x[:, b, :]                                    # (S, D)
        qkv = xb @ params["wqkv"] + params["bqkv"]
        q, k, v = qkv[:, :D], qkv[:, D:2 * D], qkv[:, 2 * D:]
        heads = []
        for h in range(H):
            qh = q[:, h * hd:(h + 1) * hd] * scale
            kh = k[:, h * hd:(h + 1) * hd]
            vh = v[:, h * hd:(h + 1) * hd]
            s = qh @ kh.T
            s = s - jnp.max(s, axis=-1, keepdims=True)
            p = jnp.exp(s)
            p = p / jnp.sum(p, axis=-1, keepdims=True)
            heads.append(p @ vh)
        attn = jnp.concatenate(heads, axis=-1) @ params["wo"] + params["bo"]
        y = _layernorm(xb + attn, params["g1"], params["be1"])
        h1 = jnp.maximum(y @ params["w1"] + params["b1"], 0.0)
        h2 = h1 @ params["w2"] + params["b2"]
        z = _layernorm(y + h2, params["g2"], params["be2"])
        outs.append(_layernorm(z, params["gf"], params["bef"]))
    return jnp.stack(outs, axis=1)                         # (S, B, D)


if __name__ == "__main__":
    # Small shapes consistent with the module: seq=8, batch=2, d_model=32,
    # n_head=4, dim_ff=64, num_frames(max_len)=64.
    S, B, D, H, FF, NUM_FRAMES = 8, 2, 32, 4, 64, 64

    key = jax.random.PRNGKey(0)
    k_src, k_par = jax.random.split(key)
    src = jax.random.normal(k_src, (S, B, D), jnp.float32)
    params = init_params(k_par, D, H, FF, NUM_FRAMES)

    out = trans_encoder_forward(src, params, n_head=H)
    out = jax.block_until_ready(out)

    assert out.shape == (S, B, D), out.shape
    assert bool(jnp.all(jnp.isfinite(out)))

    # Correctness vs. pure-f32 JAX reference (kernel uses bf16 matmul inputs
    # with f32 accumulation, so allow a loose-but-meaningful tolerance).
    ref = _reference_forward(src, params, n_head=H)
    max_err = float(jnp.max(jnp.abs(out - ref)))
    assert max_err < 1e-1, f"max abs error vs reference: {max_err}"

    print("KERNEL_OK")
</pallas_src>

<mosaic_0001>
module attributes {stable_mosaic.version = 11 : i64} {
  func.func @_trans_encoder_kernel(%arg0: i32, %arg1: memref<8x2x32xf32, #tpu.memory_space<vmem>>, %arg2: memref<8x32xf32, #tpu.memory_space<vmem>>, %arg3: memref<12x32x8xbf16, #tpu.memory_space<vmem>>, %arg4: memref<12x1x8xf32, #tpu.memory_space<vmem>>, %arg5: memref<4x8x32xbf16, #tpu.memory_space<vmem>>, %arg6: memref<1x32xf32, #tpu.memory_space<vmem>>, %arg7: memref<32x64xbf16, #tpu.memory_space<vmem>>, %arg8: memref<1x64xf32, #tpu.memory_space<vmem>>, %arg9: memref<64x32xbf16, #tpu.memory_space<vmem>>, %arg10: memref<1x32xf32, #tpu.memory_space<vmem>>, %arg11: memref<1x32xf32, #tpu.memory_space<vmem>>, %arg12: memref<1x32xf32, #tpu.memory_space<vmem>>, %arg13: memref<1x32xf32, #tpu.memory_space<vmem>>, %arg14: memref<1x32xf32, #tpu.memory_space<vmem>>, %arg15: memref<1x32xf32, #tpu.memory_space<vmem>>, %arg16: memref<1x32xf32, #tpu.memory_space<vmem>>, %arg17: memref<8x2x32xf32, #tpu.memory_space<vmem>>) attributes {dimension_semantics = [#tpu.dimension_semantics<parallel>], iteration_bounds = array<i64: 1>, scalar_prefetch = 0 : i64, scratch_operands = 0 : i64, tpu.core_type = #tpu.core_type<tc>, window_params = [{transform_indices = @transform_0, window_bounds = array<i64: 8, 2, 32>}, {pipeline_mode = #tpu.pipeline_mode<synchronous>, transform_indices = @transform_1, window_bounds = array<i64: 8, 32>}, {pipeline_mode = #tpu.pipeline_mode<synchronous>, transform_indices = @transform_2, window_bounds = array<i64: 12, 32, 8>}, {pipeline_mode = #tpu.pipeline_mode<synchronous>, transform_indices = @transform_3, window_bounds = array<i64: 12, 1, 8>}, {pipeline_mode = #tpu.pipeline_mode<synchronous>, transform_indices = @transform_4, window_bounds = array<i64: 4, 8, 32>}, {pipeline_mode = #tpu.pipeline_mode<synchronous>, transform_indices = @transform_5, window_bounds = array<i64: 1, 32>}, {pipeline_mode = #tpu.pipeline_mode<synchronous>, transform_indices = @transform_6, window_bounds = array<i64: 32, 64>}, {pipeline_mode = #tpu.pipeline_mode<synchronous>, transform_indices = @transform_7, window_bounds = array<i64: 1, 64>}, {pipeline_mode = #tpu.pipeline_mode<synchronous>, transform_indices = @transform_8, window_bounds = array<i64: 64, 32>}, {pipeline_mode = #tpu.pipeline_mode<synchronous>, transform_indices = @transform_9, window_bounds = array<i64: 1, 32>}, {pipeline_mode = #tpu.pipeline_mode<synchronous>, transform_indices = @transform_10, window_bounds = array<i64: 1, 32>}, {pipeline_mode = #tpu.pipeline_mode<synchronous>, transform_indices = @transform_11, window_bounds = array<i64: 1, 32>}, {pipeline_mode = #tpu.pipeline_mode<synchronous>, transform_indices = @transform_12, window_bounds = array<i64: 1, 32>}, {pipeline_mode = #tpu.pipeline_mode<synchronous>, transform_indices = @transform_13, window_bounds = array<i64: 1, 32>}, {pipeline_mode = #tpu.pipeline_mode<synchronous>, transform_indices = @transform_14, window_bounds = array<i64: 1, 32>}, {pipeline_mode = #tpu.pipeline_mode<synchronous>, transform_indices = @transform_15, window_bounds = array<i64: 1, 32>}, {transform_indices = @transform_16, window_bounds = array<i64: 8, 2, 32>}]} {
    %c0 = arith.constant 0 : index
    %c0_0 = arith.constant 0 : index
    %0 = vector.load %arg2[%c0, %c0_0] : memref<8x32xf32, #tpu.memory_space<vmem>>, vector<8x32xf32>
    %c0_1 = arith.constant 0 : index
    %c0_2 = arith.constant 0 : index
    %c0_3 = arith.constant 0 : index
    %1 = vector.load %arg3[%c0_1, %c0_2, %c0_3] : memref<12x32x8xbf16, #tpu.memory_space<vmem>>, vector<12x32x8xbf16>
    %c0_4 = arith.constant 0 : index
    %c0_5 = arith.constant 0 : index
    %c0_6 = arith.constant 0 : index
    %2 = vector.load %arg4[%c0_4, %c0_5, %c0_6] : memref<12x1x8xf32, #tpu.memory_space<vmem>>, vector<12x1x8xf32>
    %c0_7 = arith.constant 0 : index
    %c0_8 = arith.constant 0 : index
    %c0_9 = arith.constant 0 : index
    %3 = vector.load %arg5[%c0_7, %c0_8, %c0_9] : memref<4x8x32xbf16, #tpu.memory_space<vmem>>, vector<4x8x32xbf16>
    %c0_10 = arith.constant 0 : index
    %c0_11 = arith.constant 0 : index
    %4 = vector.load %arg6[%c0_10, %c0_11] : memref<1x32xf32, #tpu.memory_space<vmem>>, vector<1x32xf32>
    %c0_12 = arith.constant 0 : index
    %c0_13 = arith.constant 0 : index
    %5 = vector.load %arg7[%c0_12, %c0_13] : memref<32x64xbf16, #tpu.memory_space<vmem>>, vector<32x64xbf16>
    %c0_14 = arith.constant 0 : index
    %c0_15 = arith.constant 0 : index
    %6 = vector.load %arg8[%c0_14, %c0_15] : memref<1x64xf32, #tpu.memory_space<vmem>>, vector<1x64xf32>
    %c0_16 = arith.constant 0 : index
    %c0_17 = arith.constant 0 : index
    %7 = vector.load %arg9[%c0_16, %c0_17] : memref<64x32xbf16, #tpu.memory_space<vmem>>, vector<64x32xbf16>
    %c0_18 = arith.constant 0 : index
    %c0_19 = arith.constant 0 : index
    %8 = vector.load %arg10[%c0_18, %c0_19] : memref<1x32xf32, #tpu.memory_space<vmem>>, vector<1x32xf32>
    %c0_20 = arith.constant 0 : index
    %c0_21 = arith.constant 0 : index
    %9 = vector.load %arg11[%c0_20, %c0_21] : memref<1x32xf32, #tpu.memory_space<vmem>>, vector<1x32xf32>
    %c0_22 = arith.constant 0 : index
    %c0_23 = arith.constant 0 : index
    %10 = vector.load %arg12[%c0_22, %c0_23] : memref<1x32xf32, #tpu.memory_space<vmem>>, vector<1x32xf32>
    %c0_24 = arith.constant 0 : index
    %c0_25 = arith.constant 0 : index
    %11 = vector.load %arg13[%c0_24, %c0_25] : memref<1x32xf32, #tpu.memory_space<vmem>>, vector<1x32xf32>
    %c0_26 = arith.constant 0 : index
    %c0_27 = arith.constant 0 : index
    %12 = vector.load %arg14[%c0_26, %c0_27] : memref<1x32xf32, #tpu.memory_space<vmem>>, vector<1x32xf32>
    %c0_28 = arith.constant 0 : index
    %c0_29 = arith.constant 0 : index
    %13 = vector.load %arg15[%c0_28, %c0_29] : memref<1x32xf32, #tpu.memory_space<vmem>>, vector<1x32xf32>
    %c0_30 = arith.constant 0 : index
    %c0_31 = arith.constant 0 : index
    %14 = vector.load %arg16[%c0_30, %c0_31] : memref<1x32xf32, #tpu.memory_space<vmem>>, vector<1x32xf32>
    %c0_32 = arith.constant 0 : index
    %c0_33 = arith.constant 0 : index
    %c0_34 = arith.constant 0 : index
    %15 = vector.load %arg1[%c0_32, %c0_33, %c0_34] : memref<8x2x32xf32, #tpu.memory_space<vmem>>, vector<8x1x32xf32>
    %16 = vector.shape_cast %15 : vector<8x1x32xf32> to vector<8x32xf32>
    %17 = arith.addf %16, %0 : vector<8x32xf32>
    %18 = arith.truncf %17 : vector<8x32xf32> to vector<8x32xbf16>
    %19 = vector.shape_cast %18 : vector<8x32xbf16> to vector<1x8x32xbf16>
    %20 = vector.shape_cast %19 : vector<1x8x32xbf16> to vector<1x8x32xbf16>
    %21 = vector.broadcast %20 : vector<1x8x32xbf16> to vector<12x8x32xbf16>
    "tpu.trace_start"() <{level = 10 : i32, message = "gsd,gdf->gsf"}> : () -> ()
    %cst = arith.constant dense<0.000000e+00> : vector<12x8x8xf32>
    %22 = tpu.matmul %21, %1, %cst {dimension_numbers = #tpu.dot_dimension_numbers<[2], [1], [1], [2], [0, 0, 0, 1, 1, 2], [0], [0]>} : vector<12x8x32xbf16>, vector<12x32x8xbf16>, vector<12x8x8xf32> -> vector<12x8x8xf32>
    "tpu.trace_stop"() : () -> ()
    %23 = vector.broadcast %2 : vector<12x1x8xf32> to vector<12x8x8xf32>
    %24 = arith.addf %22, %23 : vector<12x8x8xf32>
    %25 = vector.extract_strided_slice %24 {offsets = [0, 0, 0], sizes = [4, 8, 8], strides = [1, 1, 1]} : vector<12x8x8xf32> to vector<4x8x8xf32>
    %cst_35 = arith.constant 0.353553385 : f32
    %26 = vector.broadcast %cst_35 : f32 to vector<4x8x8xf32>
    %27 = arith.mulf %25, %26 : vector<4x8x8xf32>
    %28 = vector.extract_strided_slice %24 {offsets = [4, 0, 0], sizes = [4, 8, 8], strides = [1, 1, 1]} : vector<12x8x8xf32> to vector<4x8x8xf32>
    %29 = vector.extract_strided_slice %24 {offsets = [8, 0, 0], sizes = [4, 8, 8], strides = [1, 1, 1]} : vector<12x8x8xf32> to vector<4x8x8xf32>
    %30 = arith.truncf %27 : vector<4x8x8xf32> to vector<4x8x8xbf16>
    %31 = arith.truncf %28 : vector<4x8x8xf32> to vector<4x8x8xbf16>
    "tpu.trace_start"() <{level = 10 : i32, message = "hqf,hkf->hqk"}> : () -> ()
    %cst_36 = arith.constant dense<0.000000e+00> : vector<4x8x8xf32>
    %32 = tpu.matmul %30, %31, %cst_36 {dimension_numbers = #tpu.dot_dimension_numbers<[2], [2], [1], [1], [0, 0, 0, 1, 1, 1], [0], [0]>} : vector<4x8x8xbf16>, vector<4x8x8xbf16>, vector<4x8x8xf32> -> vector<4x8x8xf32>
    "tpu.trace_stop"() : () -> ()
    %cst_37 = arith.constant dense<0xFF800000> : vector<4x8xf32>
    %33 = vector.multi_reduction <maximumf>, %32, %cst_37 [2] : vector<4x8x8xf32> to vector<4x8xf32>
    %34 = vector.shape_cast %33 : vector<4x8xf32> to vector<4x8x1xf32>
    %35 = vector.broadcast %34 : vector<4x8x1xf32> to vector<4x8x8xf32>
    %36 = arith.subf %32, %35 : vector<4x8x8xf32>
    %37 = math.exp %36 : vector<4x8x8xf32>
    %cst_38 = arith.constant dense<0.000000e+00> : vector<4x8xf32>
    %38 = vector.multi_reduction <add>, %37, %cst_38 [2] : vector<4x8x8xf32> to vector<4x8xf32>
    %39 = vector.shape_cast %38 : vector<4x8xf32> to vector<4x8x1xf32>
    %40 = vector.broadcast %39 : vector<4x8x1xf32> to vector<4x8x8xf32>
    %41 = arith.divf %37, %40 : vector<4x8x8xf32>
    %42 = arith.truncf %41 : vector<4x8x8xf32> to vector<4x8x8xbf16>
    %43 = arith.truncf %29 : vector<4x8x8xf32> to vector<4x8x8xbf16>
    "tpu.trace_start"() <{level = 10 : i32, message = "hqk,hkf->hqf"}> : () -> ()
    %cst_39 = arith.constant dense<0.000000e+00> : vector<4x8x8xf32>
    %44 = tpu.matmul %42, %43, %cst_39 {dimension_numbers = #tpu.dot_dimension_numbers<[2], [1], [1], [2], [0, 0, 0, 1, 1, 2], [0], [0]>} : vector<4x8x8xbf16>, vector<4x8x8xbf16>, vector<4x8x8xf32> -> vector<4x8x8xf32>
    "tpu.trace_stop"() : () -> ()
    %45 = arith.truncf %44 : vector<4x8x8xf32> to vector<4x8x8xbf16>
    "tpu.trace_start"() <{level = 10 : i32, message = "hqf,hfd->hqd"}> : () -> ()
    %cst_40 = arith.constant dense<0.000000e+00> : vector<4x8x32xf32>
    %46 = tpu.matmul %45, %3, %cst_40 {dimension_numbers = #tpu.dot_dimension_numbers<[2], [1], [1], [2], [0, 0, 0, 1, 1, 2], [0], [0]>} : vector<4x8x8xbf16>, vector<4x8x32xbf16>, vector<4x8x32xf32> -> vector<4x8x32xf32>
    "tpu.trace_stop"() : () -> ()
    %cst_41 = arith.constant dense<0.000000e+00> : vector<8x32xf32>
    %47 = vector.multi_reduction <add>, %46, %cst_41 [0] : vector<4x8x32xf32> to vector<8x32xf32>
    %48 = vector.broadcast %4 : vector<1x32xf32> to vector<8x32xf32>
    %49 = arith.addf %47, %48 : vector<8x32xf32>
    %50 = arith.addf %17, %49 : vector<8x32xf32>
    %cst_42 = arith.constant dense<0.000000e+00> : vector<8xf32>
    %51 = vector.multi_reduction <add>, %50, %cst_42 [1] : vector<8x32xf32> to vector<8xf32>
    %52 = vector.shape_cast %51 : vector<8xf32> to vector<8x1xf32>
    %cst_43 = arith.constant 3.200000e+01 : f32
    %53 = vector.broadcast %cst_43 : f32 to vector<8x1xf32>
    %54 = arith.divf %52, %53 : vector<8x1xf32>
    %55 = vector.broadcast %54 : vector<8x1xf32> to vector<8x32xf32>
    %56 = arith.subf %50, %55 : vector<8x32xf32>
    %57 = arith.mulf %56, %56 : vector<8x32xf32>
    %cst_44 = arith.constant dense<0.000000e+00> : vector<8xf32>
    %58 = vector.multi_reduction <add>, %57, %cst_44 [1] : vector<8x32xf32> to vector<8xf32>
    %59 = vector.shape_cast %58 : vector<8xf32> to vector<8x1xf32>
    %cst_45 = arith.constant 3.200000e+01 : f32
    %60 = vector.broadcast %cst_45 : f32 to vector<8x1xf32>
    %61 = arith.divf %59, %60 : vector<8x1xf32>
    %62 = vector.broadcast %54 : vector<8x1xf32> to vector<8x32xf32>
    %63 = arith.subf %50, %62 : vector<8x32xf32>
    %cst_46 = arith.constant 9.99999974E-6 : f32
    %64 = vector.broadcast %cst_46 : f32 to vector<8x1xf32>
    %65 = arith.addf %61, %64 : vector<8x1xf32>
    %66 = math.rsqrt %65 : vector<8x1xf32>
    %67 = vector.broadcast %66 : vector<8x1xf32> to vector<8x32xf32>
    %68 = arith.mulf %63, %67 : vector<8x32xf32>
    %69 = vector.broadcast %9 : vector<1x32xf32> to vector<8x32xf32>
    %70 = arith.mulf %68, %69 : vector<8x32xf32>
    %71 = vector.broadcast %10 : vector<1x32xf32> to vector<8x32xf32>
    %72 = arith.addf %70, %71 : vector<8x32xf32>
    %73 = arith.truncf %72 : vector<8x32xf32> to vector<8x32xbf16>
    %cst_47 = arith.constant dense<0.000000e+00> : vector<8x64xf32>
    %74 = tpu.matmul %73, %5, %cst_47 {dimension_numbers = #tpu.dot_dimension_numbers<[1], [0], [0], [1], [0, 0, 1, 1], [], []>} : vector<8x32xbf16>, vector<32x64xbf16>, vector<8x64xf32> -> vector<8x64xf32>
    %75 = vector.broadcast %6 : vector<1x64xf32> to vector<8x64xf32>
    %76 = arith.addf %74, %75 : vector<8x64xf32>
    %cst_48 = arith.constant 0.000000e+00 : f32
    %77 = vector.broadcast %cst_48 : f32 to vector<8x64xf32>
    %78 = arith.maximumf %76, %77 : vector<8x64xf32>
    %79 = arith.truncf %78 : vector<8x64xf32> to vector<8x64xbf16>
    %cst_49 = arith.constant dense<0.000000e+00> : vector<8x32xf32>
    %80 = tpu.matmul %79, %7, %cst_49 {dimension_numbers = #tpu.dot_dimension_numbers<[1], [0], [0], [1], [0, 0, 1, 1], [], []>} : vector<8x64xbf16>, vector<64x32xbf16>, vector<8x32xf32> -> vector<8x32xf32>
    %81 = vector.broadcast %8 : vector<1x32xf32> to vector<8x32xf32>
    %82 = arith.addf %80, %81 : vector<8x32xf32>
    %83 = arith.addf %72, %82 : vector<8x32xf32>
    %cst_50 = arith.constant dense<0.000000e+00> : vector<8xf32>
    %84 = vector.multi_reduction <add>, %83, %cst_50 [1] : vector<8x32xf32> to vector<8xf32>
    %85 = vector.shape_cast %84 : vector<8xf32> to vector<8x1xf32>
    %cst_51 = arith.constant 3.200000e+01 : f32
    %86 = vector.broadcast %cst_51 : f32 to vector<8x1xf32>
    %87 = arith.divf %85, %86 : vector<8x1xf32>
    %88 = vector.broadcast %87 : vector<8x1xf32> to vector<8x32xf32>
    %89 = arith.subf %83, %88 : vector<8x32xf32>
    %90 = arith.mulf %89, %89 : vector<8x32xf32>
    %cst_52 = arith.constant dense<0.000000e+00> : vector<8xf32>
    %91 = vector.multi_reduction <add>, %90, %cst_52 [1] : vector<8x32xf32> to vector<8xf32>
    %92 = vector.shape_cast %91 : vector<8xf32> to vector<8x1xf32>
    %cst_53 = arith.constant 3.200000e+01 : f32
    %93 = vector.broadcast %cst_53 : f32 to vector<8x1xf32>
    %94 = arith.divf %92, %93 : vector<8x1xf32>
    %95 = vector.broadcast %87 : vector<8x1xf32> to vector<8x32xf32>
    %96 = arith.subf %83, %95 : vector<8x32xf32>
    %cst_54 = arith.constant 9.99999974E-6 : f32
    %97 = vector.broadcast %cst_54 : f32 to vector<8x1xf32>
    %98 = arith.addf %94, %97 : vector<8x1xf32>
    %99 = math.rsqrt %98 : vector<8x1xf32>
    %100 = vector.broadcast %99 : vector<8x1xf32> to vector<8x32xf32>
    %101 = arith.mulf %96, %100 : vector<8x32xf32>
    %102 = vector.broadcast %11 : vector<1x32xf32> to vector<8x32xf32>
    %103 = arith.mulf %101, %102 : vector<8x32xf32>
    %104 = vector.broadcast %12 : vector<1x32xf32> to vector<8x32xf32>
    %105 = arith.addf %103, %104 : vector<8x32xf32>
    %cst_55 = arith.constant dense<0.000000e+00> : vector<8xf32>
    %106 = vector.multi_reduction <add>, %105, %cst_55 [1] : vector<8x32xf32> to vector<8xf32>
    %107 = vector.shape_cast %106 : vector<8xf32> to vector<8x1xf32>
    %cst_56 = arith.constant 3.200000e+01 : f32
    %108 = vector.broadcast %cst_56 : f32 to vector<8x1xf32>
    %109 = arith.divf %107, %108 : vector<8x1xf32>
    %110 = vector.broadcast %109 : vector<8x1xf32> to vector<8x32xf32>
    %111 = arith.subf %105, %110 : vector<8x32xf32>
    %112 = arith.mulf %111, %111 : vector<8x32xf32>
    %cst_57 = arith.constant dense<0.000000e+00> : vector<8xf32>
    %113 = vector.multi_reduction <add>, %112, %cst_57 [1] : vector<8x32xf32> to vector<8xf32>
    %114 = vector.shape_cast %113 : vector<8xf32> to vector<8x1xf32>
    %cst_58 = arith.constant 3.200000e+01 : f32
    %115 = vector.broadcast %cst_58 : f32 to vector<8x1xf32>
    %116 = arith.divf %114, %115 : vector<8x1xf32>
    %117 = vector.broadcast %109 : vector<8x1xf32> to vector<8x32xf32>
    %118 = arith.subf %105, %117 : vector<8x32xf32>
    %cst_59 = arith.constant 9.99999974E-6 : f32
    %119 = vector.broadcast %cst_59 : f32 to vector<8x1xf32>
    %120 = arith.addf %116, %119 : vector<8x1xf32>
    %121 = math.rsqrt %120 : vector<8x1xf32>
    %122 = vector.broadcast %121 : vector<8x1xf32> to vector<8x32xf32>
    %123 = arith.mulf %118, %122 : vector<8x32xf32>
    %124 = vector.broadcast %13 : vector<1x32xf32> to vector<8x32xf32>
    %125 = arith.mulf %123, %124 : vector<8x32xf32>
    %126 = vector.broadcast %14 : vector<1x32xf32> to vector<8x32xf32>
    %127 = arith.addf %125, %126 : vector<8x32xf32>
    %c0_60 = arith.constant 0 : index
    %c0_61 = arith.constant 0 : index
    %c0_62 = arith.constant 0 : index
    %128 = vector.load %arg17[%c0_60, %c0_61, %c0_62] : memref<8x2x32xf32, #tpu.memory_space<vmem>>, vector<8x1x32xf32>
    %129 = vector.shape_cast %128 : vector<8x1x32xf32> to vector<8x32xf32>
    %130 = vector.shape_cast %127 : vector<8x32xf32> to vector<8x1x32xf32>
    tpu.vector_store %arg17[%c0_60, %c0_61, %c0_62], %130 {strides = array<i32>} : memref<8x2x32xf32, #tpu.memory_space<vmem>>, vector<8x1x32xf32>,
    %c0_63 = arith.constant 0 : index
    %c1 = arith.constant 1 : index
    %c0_64 = arith.constant 0 : index
    %131 = vector.load %arg1[%c0_63, %c1, %c0_64] : memref<8x2x32xf32, #tpu.memory_space<vmem>>, vector<8x1x32xf32>
    %132 = vector.shape_cast %131 : vector<8x1x32xf32> to vector<8x32xf32>
    %133 = arith.addf %132, %0 : vector<8x32xf32>
    %134 = arith.truncf %133 : vector<8x32xf32> to vector<8x32xbf16>
    %135 = vector.shape_cast %134 : vector<8x32xbf16> to vector<1x8x32xbf16>
    %136 = vector.shape_cast %135 : vector<1x8x32xbf16> to vector<1x8x32xbf16>
    %137 = vector.broadcast %136 : vector<1x8x32xbf16> to vector<12x8x32xbf16>
    "tpu.trace_start"() <{level = 10 : i32, message = "gsd,gdf->gsf"}> : () -> ()
    %cst_65 = arith.constant dense<0.000000e+00> : vector<12x8x8xf32>
    %138 = tpu.matmul %137, %1, %cst_65 {dimension_numbers = #tpu.dot_dimension_numbers<[2], [1], [1], [2], [0, 0, 0, 1, 1, 2], [0], [0]>} : vector<12x8x32xbf16>, vector<12x32x8xbf16>, vector<12x8x8xf32> -> vector<12x8x8xf32>
    "tpu.trace_stop"() : () -> ()
    %139 = vector.broadcast %2 : vector<12x1x8xf32> to vector<12x8x8xf32>
    %140 = arith.addf %138, %139 : vector<12x8x8xf32>
    %141 = vector.extract_strided_slice %140 {offsets = [0, 0, 0], sizes = [4, 8, 8], strides = [1, 1, 1]} : vector<12x8x8xf32> to vector<4x8x8xf32>
    %cst_66 = arith.constant 0.353553385 : f32
    %142 = vector.broadcast %cst_66 : f32 to vector<4x8x8xf32>
    %143 = arith.mulf %141, %142 : vector<4x8x8xf32>
    %144 = vector.extract_strided_slice %140 {offsets = [4, 0, 0], sizes = [4, 8, 8], strides = [1, 1, 1]} : vector<12x8x8xf32> to vector<4x8x8xf32>
    %145 = vector.extract_strided_slice %140 {offsets = [8, 0, 0], sizes = [4, 8, 8], strides = [1, 1, 1]} : vector<12x8x8xf32> to vector<4x8x8xf32>
    %146 = arith.truncf %143 : vector<4x8x8xf32> to vector<4x8x8xbf16>
    %147 = arith.truncf %144 : vector<4x8x8xf32> to vector<4x8x8xbf16>
    "tpu.trace_start"() <{level = 10 : i32, message = "hqf,hkf->hqk"}> : () -> ()
    %cst_67 = arith.constant dense<0.000000e+00> : vector<4x8x8xf32>
    %148 = tpu.matmul %146, %147, %cst_67 {dimension_numbers = #tpu.dot_dimension_numbers<[2], [2], [1], [1], [0, 0, 0, 1, 1, 1], [0], [0]>} : vector<4x8x8xbf16>, vector<4x8x8xbf16>, vector<4x8x8xf32> -> vector<4x8x8xf32>
    "tpu.trace_stop"() : () -> ()
    %cst_68 = arith.constant dense<0xFF800000> : vector<4x8xf32>
    %149 = vector.multi_reduction <maximumf>, %148, %cst_68 [2] : vector<4x8x8xf32> to vector<4x8xf32>
    %150 = vector.shape_cast %149 : vector<4x8xf32> to vector<4x8x1xf32>
    %151 = vector.broadcast %150 : vector<4x8x1xf32> to vector<4x8x8xf32>
    %152 = arith.subf %148, %151 : vector<4x8x8xf32>
    %153 = math.exp %152 : vector<4x8x8xf32>
    %cst_69 = arith.constant dense<0.000000e+00> : vector<4x8xf32>
    %154 = vector.multi_reduction <add>, %153, %cst_69 [2] : vector<4x8x8xf32> to vector<4x8xf32>
    %155 = vector.shape_cast %154 : vector<4x8xf32> to vector<4x8x1xf32>
    %156 = vector.broadcast %155 : vector<4x8x1xf32> to vector<4x8x8xf32>
    %157 = arith.divf %153, %156 : vector<4x8x8xf32>
    %158 = arith.truncf %157 : vector<4x8x8xf32> to vector<4x8x8xbf16>
    %159 = arith.truncf %145 : vector<4x8x8xf32> to vector<4x8x8xbf16>
    "tpu.trace_start"() <{level = 10 : i32, message = "hqk,hkf->hqf"}> : () -> ()
    %cst_70 = arith.constant dense<0.000000e+00> : vector<4x8x8xf32>
    %160 = tpu.matmul %158, %159, %cst_70 {dimension_numbers = #tpu.dot_dimension_numbers<[2], [1], [1], [2], [0, 0, 0, 1, 1, 2], [0], [0]>} : vector<4x8x8xbf16>, vector<4x8x8xbf16>, vector<4x8x8xf32> -> vector<4x8x8xf32>
    "tpu.trace_stop"() : () -> ()
    %161 = arith.truncf %160 : vector<4x8x8xf32> to vector<4x8x8xbf16>
    "tpu.trace_start"() <{level = 10 : i32, message = "hqf,hfd->hqd"}> : () -> ()
    %cst_71 = arith.constant dense<0.000000e+00> : vector<4x8x32xf32>
    %162 = tpu.matmul %161, %3, %cst_71 {dimension_numbers = #tpu.dot_dimension_numbers<[2], [1], [1], [2], [0, 0, 0, 1, 1, 2], [0], [0]>} : vector<4x8x8xbf16>, vector<4x8x32xbf16>, vector<4x8x32xf32> -> vector<4x8x32xf32>
    "tpu.trace_stop"() : () -> ()
    %cst_72 = arith.constant dense<0.000000e+00> : vector<8x32xf32>
    %163 = vector.multi_reduction <add>, %162, %cst_72 [0] : vector<4x8x32xf32> to vector<8x32xf32>
    %164 = vector.broadcast %4 : vector<1x32xf32> to vector<8x32xf32>
    %165 = arith.addf %163, %164 : vector<8x32xf32>
    %166 = arith.addf %133, %165 : vector<8x32xf32>
    %cst_73 = arith.constant dense<0.000000e+00> : vector<8xf32>
    %167 = vector.multi_reduction <add>, %166, %cst_73 [1] : vector<8x32xf32> to vector<8xf32>
    %168 = vector.shape_cast %167 : vector<8xf32> to vector<8x1xf32>
    %cst_74 = arith.constant 3.200000e+01 : f32
    %169 = vector.broadcast %cst_74 : f32 to vector<8x1xf32>
    %170 = arith.divf %168, %169 : vector<8x1xf32>
    %171 = vector.broadcast %170 : vector<8x1xf32> to vector<8x32xf32>
    %172 = arith.subf %166, %171 : vector<8x32xf32>
    %173 = arith.mulf %172, %172 : vector<8x32xf32>
    %cst_75 = arith.constant dense<0.000000e+00> : vector<8xf32>
    %174 = vector.multi_reduction <add>, %173, %cst_75 [1] : vector<8x32xf32> to vector<8xf32>
    %175 = vector.shape_cast %174 : vector<8xf32> to vector<8x1xf32>
    %cst_76 = arith.constant 3.200000e+01 : f32
    %176 = vector.broadcast %cst_76 : f32 to vector<8x1xf32>
    %177 = arith.divf %175, %176 : vector<8x1xf32>
    %178 = vector.broadcast %170 : vector<8x1xf32> to vector<8x32xf32>
    %179 = arith.subf %166, %178 : vector<8x32xf32>
    %cst_77 = arith.constant 9.99999974E-6 : f32
    %180 = vector.broadcast %cst_77 : f32 to vector<8x1xf32>
    %181 = arith.addf %177, %180 : vector<8x1xf32>
    %182 = math.rsqrt %181 : vector<8x1xf32>
    %183 = vector.broadcast %182 : vector<8x1xf32> to vector<8x32xf32>
    %184 = arith.mulf %179, %183 : vector<8x32xf32>
    %185 = vector.broadcast %9 : vector<1x32xf32> to vector<8x32xf32>
    %186 = arith.mulf %184, %185 : vector<8x32xf32>
    %187 = vector.broadcast %10 : vector<1x32xf32> to vector<8x32xf32>
    %188 = arith.addf %186, %187 : vector<8x32xf32>
    %189 = arith.truncf %188 : vector<8x32xf32> to vector<8x32xbf16>
    %cst_78 = arith.constant dense<0.000000e+00> : vector<8x64xf32>
    %190 = tpu.matmul %189, %5, %cst_78 {dimension_numbers = #tpu.dot_dimension_numbers<[1], [0], [0], [1], [0, 0, 1, 1], [], []>} : vector<8x32xbf16>, vector<32x64xbf16>, vector<8x64xf32> -> vector<8x64xf32>
    %191 = vector.broadcast %6 : vector<1x64xf32> to vector<8x64xf32>
    %192 = arith.addf %190, %191 : vector<8x64xf32>
    %cst_79 = arith.constant 0.000000e+00 : f32
    %193 = vector.broadcast %cst_79 : f32 to vector<8x64xf32>
    %194 = arith.maximumf %192, %193 : vector<8x64xf32>
    %195 = arith.truncf %194 : vector<8x64xf32> to vector<8x64xbf16>
    %cst_80 = arith.constant dense<0.000000e+00> : vector<8x32xf32>
    %196 = tpu.matmul %195, %7, %cst_80 {dimension_numbers = #tpu.dot_dimension_numbers<[1], [0], [0], [1], [0, 0, 1, 1], [], []>} : vector<8x64xbf16>, vector<64x32xbf16>, vector<8x32xf32> -> vector<8x32xf32>
    %197 = vector.broadcast %8 : vector<1x32xf32> to vector<8x32xf32>
    %198 = arith.addf %196, %197 : vector<8x32xf32>
    %199 = arith.addf %188, %198 : vector<8x32xf32>
    %cst_81 = arith.constant dense<0.000000e+00> : vector<8xf32>
    %200 = vector.multi_reduction <add>, %199, %cst_81 [1] : vector<8x32xf32> to vector<8xf32>
    %201 = vector.shape_cast %200 : vector<8xf32> to vector<8x1xf32>
    %cst_82 = arith.constant 3.200000e+01 : f32
    %202 = vector.broadcast %cst_82 : f32 to vector<8x1xf32>
    %203 = arith.divf %201, %202 : vector<8x1xf32>
    %204 = vector.broadcast %203 : vector<8x1xf32> to vector<8x32xf32>
    %205 = arith.subf %199, %204 : vector<8x32xf32>
    %206 = arith.mulf %205, %205 : vector<8x32xf32>
    %cst_83 = arith.constant dense<0.000000e+00> : vector<8xf32>
    %207 = vector.multi_reduction <add>, %206, %cst_83 [1] : vector<8x32xf32> to vector<8xf32>
    %208 = vector.shape_cast %207 : vector<8xf32> to vector<8x1xf32>
    %cst_84 = arith.constant 3.200000e+01 : f32
    %209 = vector.broadcast %cst_84 : f32 to vector<8x1xf32>
    %210 = arith.divf %208, %209 : vector<8x1xf32>
    %211 = vector.broadcast %203 : vector<8x1xf32> to vector<8x32xf32>
    %212 = arith.subf %199, %211 : vector<8x32xf32>
    %cst_85 = arith.constant 9.99999974E-6 : f32
    %213 = vector.broadcast %cst_85 : f32 to vector<8x1xf32>
    %214 = arith.addf %210, %213 : vector<8x1xf32>
    %215 = math.rsqrt %214 : vector<8x1xf32>
    %216 = vector.broadcast %215 : vector<8x1xf32> to vector<8x32xf32>
    %217 = arith.mulf %212, %216 : vector<8x32xf32>
    %218 = vector.broadcast %11 : vector<1x32xf32> to vector<8x32xf32>
    %219 = arith.mulf %217, %218 : vector<8x32xf32>
    %220 = vector.broadcast %12 : vector<1x32xf32> to vector<8x32xf32>
    %221 = arith.addf %219, %220 : vector<8x32xf32>
    %cst_86 = arith.constant dense<0.000000e+00> : vector<8xf32>
    %222 = vector.multi_reduction <add>, %221, %cst_86 [1] : vector<8x32xf32> to vector<8xf32>
    %223 = vector.shape_cast %222 : vector<8xf32> to vector<8x1xf32>
    %cst_87 = arith.constant 3.200000e+01 : f32
    %224 = vector.broadcast %cst_87 : f32 to vector<8x1xf32>
    %225 = arith.divf %223, %224 : vector<8x1xf32>
    %226 = vector.broadcast %225 : vector<8x1xf32> to vector<8x32xf32>
    %227 = arith.subf %221, %226 : vector<8x32xf32>
    %228 = arith.mulf %227, %227 : vector<8x32xf32>
    %cst_88 = arith.constant dense<0.000000e+00> : vector<8xf32>
    %229 = vector.multi_reduction <add>, %228, %cst_88 [1] : vector<8x32xf32> to vector<8xf32>
    %230 = vector.shape_cast %229 : vector<8xf32> to vector<8x1xf32>
    %cst_89 = arith.constant 3.200000e+01 : f32
    %231 = vector.broadcast %cst_89 : f32 to vector<8x1xf32>
    %232 = arith.divf %230, %231 : vector<8x1xf32>
    %233 = vector.broadcast %225 : vector<8x1xf32> to vector<8x32xf32>
    %234 = arith.subf %221, %233 : vector<8x32xf32>
    %cst_90 = arith.constant 9.99999974E-6 : f32
    %235 = vector.broadcast %cst_90 : f32 to vector<8x1xf32>
    %236 = arith.addf %232, %235 : vector<8x1xf32>
    %237 = math.rsqrt %236 : vector<8x1xf32>
    %238 = vector.broadcast %237 : vector<8x1xf32> to vector<8x32xf32>
    %239 = arith.mulf %234, %238 : vector<8x32xf32>
    %240 = vector.broadcast %13 : vector<1x32xf32> to vector<8x32xf32>
    %241 = arith.mulf %239, %240 : vector<8x32xf32>
    %242 = vector.broadcast %14 : vector<1x32xf32> to vector<8x32xf32>
    %243 = arith.addf %241, %242 : vector<8x32xf32>
    %c0_91 = arith.constant 0 : index
    %c1_92 = arith.constant 1 : index
    %c0_93 = arith.constant 0 : index
    %244 = vector.load %arg17[%c0_91, %c1_92, %c0_93] : memref<8x2x32xf32, #tpu.memory_space<vmem>>, vector<8x1x32xf32>
    %245 = vector.shape_cast %244 : vector<8x1x32xf32> to vector<8x32xf32>
    %246 = vector.shape_cast %243 : vector<8x32xf32> to vector<8x1x32xf32>
    tpu.vector_store %arg17[%c0_91, %c1_92, %c0_93], %246 {strides = array<i32>} : memref<8x2x32xf32, #tpu.memory_space<vmem>>, vector<8x1x32xf32>,
    return
  }
  func.func @transform_0(%arg0: i32) -> (i32, i32, i32) {
    %c0_i32 = arith.constant 0 : i32
    %c0_i32_0 = arith.constant 0 : i32
    %c0_i32_1 = arith.constant 0 : i32
    return %c0_i32, %arg0, %c0_i32_0 : i32, i32, i32
  }
  func.func @transform_1(%arg0: i32) -> (i32, i32) {
    %c0_i32 = arith.constant 0 : i32
    %c0_i32_0 = arith.constant 0 : i32
    %c0_i32_1 = arith.constant 0 : i32
    return %c0_i32, %c0_i32_0 : i32, i32
  }
  func.func @transform_2(%arg0: i32) -> (i32, i32, i32) {
    %c0_i32 = arith.constant 0 : i32
    %c0_i32_0 = arith.constant 0 : i32
    %c0_i32_1 = arith.constant 0 : i32
    %c0_i32_2 = arith.constant 0 : i32
    return %c0_i32, %c0_i32_0, %c0_i32_1 : i32, i32, i32
  }
  func.func @transform_3(%arg0: i32) -> (i32, i32, i32) {
    %c0_i32 = arith.constant 0 : i32
    %c0_i32_0 = arith.constant 0 : i32
    %c0_i32_1 = arith.constant 0 : i32
    %c0_i32_2 = arith.constant 0 : i32
    return %c0_i32, %c0_i32_0, %c0_i32_1 : i32, i32, i32
  }
  func.func @transform_4(%arg0: i32) -> (i32, i32, i32) {
    %c0_i32 = arith.constant 0 : i32
    %c0_i32_0 = arith.constant 0 : i32
    %c0_i32_1 = arith.constant 0 : i32
    %c0_i32_2 = arith.constant 0 : i32
    return %c0_i32, %c0_i32_0, %c0_i32_1 : i32, i32, i32
  }
  func.func @transform_5(%arg0: i32) -> (i32, i32) {
    %c0_i32 = arith.constant 0 : i32
    %c0_i32_0 = arith.constant 0 : i32
    %c0_i32_1 = arith.constant 0 : i32
    return %c0_i32, %c0_i32_0 : i32, i32
  }
  func.func @transform_6(%arg0: i32) -> (i32, i32) {
    %c0_i32 = arith.constant 0 : i32
    %c0_i32_0 = arith.constant 0 : i32
    %c0_i32_1 = arith.constant 0 : i32
    return %c0_i32, %c0_i32_0 : i32, i32
  }
  func.func @transform_7(%arg0: i32) -> (i32, i32) {
    %c0_i32 = arith.constant 0 : i32
    %c0_i32_0 = arith.constant 0 : i32
    %c0_i32_1 = arith.constant 0 : i32
    return %c0_i32, %c0_i32_0 : i32, i32
  }
  func.func @transform_8(%arg0: i32) -> (i32, i32) {
    %c0_i32 = arith.constant 0 : i32
    %c0_i32_0 = arith.constant 0 : i32
    %c0_i32_1 = arith.constant 0 : i32
    return %c0_i32, %c0_i32_0 : i32, i32
  }
  func.func @transform_9(%arg0: i32) -> (i32, i32) {
    %c0_i32 = arith.constant 0 : i32
    %c0_i32_0 = arith.constant 0 : i32
    %c0_i32_1 = arith.constant 0 : i32
    return %c0_i32, %c0_i32_0 : i32, i32
  }
  func.func @transform_10(%arg0: i32) -> (i32, i32) {
    %c0_i32 = arith.constant 0 : i32
    %c0_i32_0 = arith.constant 0 : i32
    %c0_i32_1 = arith.constant 0 : i32
    return %c0_i32, %c0_i32_0 : i32, i32
  }
  func.func @transform_11(%arg0: i32) -> (i32, i32) {
    %c0_i32 = arith.constant 0 : i32
    %c0_i32_0 = arith.constant 0 : i32
    %c0_i32_1 = arith.constant 0 : i32
    return %c0_i32, %c0_i32_0 : i32, i32
  }
  func.func @transform_12(%arg0: i32) -> (i32, i32) {
    %c0_i32 = arith.constant 0 : i32
    %c0_i32_0 = arith.constant 0 : i32
    %c0_i32_1 = arith.constant 0 : i32
    return %c0_i32, %c0_i32_0 : i32, i32
  }
  func.func @transform_13(%arg0: i32) -> (i32, i32) {
    %c0_i32 = arith.constant 0 : i32
    %c0_i32_0 = arith.constant 0 : i32
    %c0_i32_1 = arith.constant 0 : i32
    return %c0_i32, %c0_i32_0 : i32, i32
  }
  func.func @transform_14(%arg0: i32) -> (i32, i32) {
    %c0_i32 = arith.constant 0 : i32
    %c0_i32_0 = arith.constant 0 : i32
    %c0_i32_1 = arith.constant 0 : i32
    return %c0_i32, %c0_i32_0 : i32, i32
  }
  func.func @transform_15(%arg0: i32) -> (i32, i32) {
    %c0_i32 = arith.constant 0 : i32
    %c0_i32_0 = arith.constant 0 : i32
    %c0_i32_1 = arith.constant 0 : i32
    return %c0_i32, %c0_i32_0 : i32, i32
  }
  func.func @transform_16(%arg0: i32) -> (i32, i32, i32) {
    %c0_i32 = arith.constant 0 : i32
    %c0_i32_0 = arith.constant 0 : i32
    %c0_i32_1 = arith.constant 0 : i32
    return %c0_i32, %arg0, %c0_i32_0 : i32, i32, i32
  }
}

</mosaic_0001>

<bundles_post_ra>
// kernel: tpu_custom_call.1
= control target key start
LH: loop header
LB: loop body
LE: loop exit
PB: predicated region body
PF: predicated region fallthrough
CT: control target
= control target key end

     0   :  { %s6115_s0 = inlined_call_operand.vmem [shape: f32[8,2,32], index: 0, kind: input, shape index: {}]   ;;  %s6116_s1 = inlined_call_operand.vmem [shape: f32[8,32], index: 1, kind: input, shape index: {}]   ;;  %s6117_s2 = inlined_call_operand.vmem [shape: bf16[12,32,8], index: 2, kind: input, shape index: {}]   ;;  %s6118_s3 = inlined_call_operand.vmem [shape: f32[12,1,8], index: 3, kind: input, shape index: {}]   ;;  %s6119_s4 = inlined_call_operand.vmem [shape: bf16[4,8,32], index: 4, kind: input, shape index: {}]   ;;  %s6120_s5 = inlined_call_operand.vmem [shape: f32[1,32], index: 5, kind: input, shape index: {}]   ;;  %s6121_s6 = inlined_call_operand.vmem [shape: bf16[32,64], index: 6, kind: input, shape index: {}]   ;;  %s6122_s7 = inlined_call_operand.vmem [shape: f32[1,64], index: 7, kind: input, shape index: {}]   ;;  %s6123_s8 = inlined_call_operand.vmem [shape: bf16[64,32], index: 8, kind: input, shape index: {}]   ;;  %s6124_s9 = inlined_call_operand.vmem [shape: f32[1,32], index: 9, kind: input, shape index: {}]   ;;  %s6125_s10 = inlined_call_operand.vmem [shape: f32[1,32], index: 10, kind: input, shape index: {}]   ;;  %s6126_s11 = inlined_call_operand.vmem [shape: f32[1,32], index: 11, kind: input, shape index: {}]   ;;  %s6127_s12 = inlined_call_operand.vmem [shape: f32[1,32], index: 12, kind: input, shape index: {}]   ;;  %s6128_s13 = inlined_call_operand.vmem [shape: f32[1,32], index: 13, kind: input, shape index: {}]   ;;  %s6129_s14 = inlined_call_operand.vmem [shape: f32[1,32], index: 14, kind: input, shape index: {}]   ;;  %s6130_s15 = inlined_call_operand.vmem [shape: f32[1,32], index: 15, kind: input, shape index: {}]   ;;  %s6131_s16 = inlined_call_operand.hbm [shape: f32[8,2,32], index: 16, kind: output, shape index: {}]  }
   0x1   :  { %6133 = sst [smem:[#allocation5_spill]] %s6115_s0 }
   0x2   :  { %v4566_v0 = vld [vmem:[%s6117_s2] sm:$0xff]   ;;  %v4703_v1 = vmov 0.0   ;;  %v4568_v3 = vld [vmem:[%s6117_s2 + $0x8] sm:$0xff]   ;;  %vm4704_vm0 = vmmov 0   ;;  %s6134_s18 = sld [smem:[#allocation5_spill]]  ;;  %vm270_vm1 = vcmask 1041409  }
   0x3   :  { %4185 = vmatprep.subr.bf16.mxu1 %v4703_v1  ;;  %4201 = vmatprep.subr.bf16.mxu0 %v4703_v1  ;;  %v4567_v2 = vld [vmem:[%s6117_s2 + $0x20] sm:$0xff]   ;;  %v4569_v4 = vld [vmem:[%s6117_s2 + $0x28] sm:$0xff]   ;;  %vm273_vm2 = vcmask 1042434   ;;  %vm276_vm3 = vcmask 1043459   ;;  %vm279_vm4 = vcmask 1044484   ;;  %vm282_vm5 = vcmask 1045509  }
   0x4   :  { %4186 = vmatpush3.bf16.msra.mxu1 %v4566_v0  ;;  %4189 = vmatprep.mubr.msk.bf16.mxu1 %vm4704_vm0, %v4703_v1  ;;  %v4816_v5 = vld [vmem:[%s6116_s1] sm:$0xff]  ;;  %vm285_vm6 = vcmask 1046534   ;;  %vm288_vm7 = vcmask 1047559   ;;  %vm303_vm8 = vcmask 261120   ;;  %v4570_v59 = vld [vmem:[%s6117_s2 + $0x10] sm:$0xff]   ;;  %v4572_v62 = vld [vmem:[%s6117_s2 + $0x18] sm:$0xff]  }
   0x5   :  { %4202 = vmatpush3.bf16.msra.mxu0 %v4567_v2  ;;  %4187 = vmatprep.subr.bf16.mxu1 %v4703_v1  ;;  %v150_v15 = vrot.slane %v4816_v5, 1  ;;  %v151_v16 = vrot.slane %v4816_v5, 2  ;;  %v152_v17 = vrot.slane %v4816_v5, 3  ;;  %v153_v18 = vrot.slane %v4816_v5, 4  ;;  %v4571_v60 = vld [vmem:[%s6117_s2 + $0x40] sm:$0xff]   ;;  %v4573_v63 = vld [vmem:[%s6117_s2 + $0x48] sm:$0xff]  }
   0x6   :  { %4203 = vmatprep.subr.bf16.mxu0 %v4703_v1  ;;  %4205 = vmatprep.mubr.msk.bf16.mxu0 %vm4704_vm0, %v4703_v1  ;;  %v154_v19 = vrot.slane %v4816_v5, 5  ;;  %v155_v20 = vrot.slane %v4816_v5, 6  ;;  %v156_v21 = vrot.slane %v4816_v5, 7  ;;  %v4574_v0 = vld [vmem:[%s6117_s2 + $0x30] sm:$0xff]   ;;  %v4575_v2 = vld [vmem:[%s6117_s2 + $0x60] sm:$0xff]  }
   0x8   :  { %v141_v6 = vld [vmem:[%s6134_s18] sm:$0x1]  ;;  %v142_v7 = vld [vmem:[%s6134_s18 + $0x2] sm:$0x1]  ;;  %v143_v8 = vld [vmem:[%s6134_s18 + $0x4] sm:$0x1]  ;;  %4188 = vmatpush3.bf16.msra.mxu1 %v4568_v3 }
   0x9   :  { %v144_v9 = vld [vmem:[%s6134_s18 + $0x6] sm:$0x1]  ;;  %v145_v10 = vld [vmem:[%s6134_s18 + $0x8] sm:$0x1]  ;;  %v4834_v11 = vadd.f32 %v141_v6, %v4816_v5  ;;  %v146_v12 = vld [vmem:[%s6134_s18 + $0xa] sm:$0x1]  ;;  %4204 = vmatpush3.bf16.msra.mxu0 %v4569_v4  ;;  %4193 = vmatprep.subr.bf16.mxu1 %v4703_v1  ;;  %v4858_v23 = vadd.f32 %v150_v15, %v142_v7  ;;  %v4862_v24 = vadd.f32 %v151_v16, %v143_v8 }
   0xa   :  { %v147_v13 = vld [vmem:[%s6134_s18 + $0xc] sm:$0x1]  ;;  %v148_v14 = vld [vmem:[%s6134_s18 + $0xe] sm:$0x1]  ;;  %4217 = vmatprep.subr.bf16.mxu0 %v4703_v1  ;;  %v4866_v25 = vadd.f32 %v152_v17, %v144_v9  ;;  %v4870_v26 = vadd.f32 %v153_v18, %v145_v10  ;;  %v4874_v27 = vadd.f32 %v154_v19, %v146_v12 }
   0xb   :  { %v173_v22 = vpack.c.bf16 %v4834_v11, %v4834_v11  ;;  %v4878_v28 = vadd.f32 %v155_v20, %v147_v13  ;;  %v4882_v29 = vadd.f32 %v156_v21, %v148_v14  ;;  %v174_v30 = vpack.c.bf16 %v4858_v23, %v4858_v23 }
   0xc   :  { %v175_v31 = vpack.c.bf16 %v4862_v24, %v4862_v24  ;;  %v176_v32 = vpack.c.bf16 %v4866_v25, %v4866_v25  ;;  %v177_v33 = vpack.c.bf16 %v4870_v26, %v4870_v26  ;;  %v178_v34 = vpack.c.bf16 %v4874_v27, %v4874_v27 }
   0xd   :  { %v179_v35 = vpack.c.bf16 %v4878_v28, %v4878_v28  ;;  %v180_v36 = vpack.c.bf16 %v4882_v29, %v4882_v29  ;;  %v261_v37 = vunpack.c.l.b16 %v173_v22  ;;  %v262_v38 = vunpack.c.l.b16 %v174_v30 }
   0xe   :  { %v263_v39 = vunpack.c.l.b16 %v175_v31  ;;  %v264_v40 = vunpack.c.l.b16 %v176_v32  ;;  %v265_v41 = vunpack.c.l.b16 %v177_v33  ;;  %v266_v42 = vunpack.c.l.b16 %v178_v34 }
   0xf   :  { %v267_v43 = vunpack.c.l.b16 %v179_v35  ;;  %v268_v44 = vunpack.c.l.b16 %v180_v36  ;;  %v269_v45 = vrot.slane %v262_v38, 7 }
  0x10   :  { %v272_v46 = vrot.slane %v263_v39, 6  ;;  %v275_v47 = vrot.slane %v264_v40, 5  ;;  %v278_v48 = vrot.slane %v265_v41, 4  ;;  %v281_v50 = vrot.slane %v266_v42, 3 }
  0x11   :  { %v271_v49 = vsel %vm270_vm1, %v269_v45, %v261_v37  ;;  %v284_v51 = vrot.slane %v267_v43, 2  ;;  %v287_v54 = vrot.slane %v268_v44, 1 }
  0x12   :  { %v274_v52 = vsel %vm273_vm2, %v272_v46, %v271_v49 }
  0x13   :  { %v277_v53 = vsel %vm276_vm3, %v275_v47, %v274_v52 }
  0x14   :  { %v280_v55 = vsel %vm279_vm4, %v278_v48, %v277_v53 }
  0x15   :  { %v283_v56 = vsel %vm282_vm5, %v281_v50, %v280_v55 }
  0x16   :  { %v286_v57 = vsel %vm285_vm6, %v284_v51, %v283_v56 }
  0x17   :  { %v289_v58 = vsel %vm288_vm7, %v287_v54, %v286_v57 }
  0x18   :  { %v4911_v61 = vpack.c.b16 %v289_v58, %v289_v58 }
  0x1a   :  { %4190 = vmatmul.mubr.msk.bf16.vlgmr.msra.gmra.mrb[0].mxu1 %vm303_vm8, %v4911_v61  ;;  %4206 = vmatmul.mubr.msk.bf16.vlgmr.msra.gmra.mrb[0].mxu0 %vm303_vm8, %v4911_v61 }
  0x1b   :  { %4194 = vmatpush3.bf16.msra.mxu1 %v4570_v59  ;;  %4218 = vmatpush3.bf16.msra.mxu0 %v4571_v60 }
  0x1c   :  { %4195 = vmatprep.subr.bf16.mxu1 %v4703_v1  ;;  %4219 = vmatprep.subr.bf16.mxu0 %v4703_v1 }
  0x1d   :  { %4197 = vmatprep.mubr.msk.bf16.mxu1 %vm4704_vm0, %v4703_v1  ;;  %4221 = vmatprep.mubr.msk.bf16.mxu0 %vm4704_vm0, %v4703_v1 }
  0x1f   :  { %4196 = vmatpush3.bf16.msra.mxu1 %v4572_v62  ;;  %4220 = vmatpush3.bf16.msra.mxu0 %v4573_v63 }
  0x20   :  { %21 = vsyncpa [#allocation3], 0  ;;  %4209 = vmatprep.subr.bf16.mxu1 %v4703_v1  ;;  %4233 = vmatprep.subr.bf16.mxu0 %v4703_v1  ;;  %v4576_v3 = vld [vmem:[%s6117_s2 + $0x38] sm:$0xff]   ;;  %v4577_v4 = vld [vmem:[%s6117_s2 + $0x68] sm:$0xff]   ;;  %vm931_vm9 = vcmask 64512   ;;  %vm1171_vm10 = vcmask 1043456  }
  0x21   :  { %v4578_v6 = vld [vmem:[%s6117_s2 + $0x50] sm:$0xff]   ;;  %v4582_v7 = vld [vmem:[%s6117_s2 + $0x80] sm:$0xff]   ;;  %v4579_v8 = vld [vmem:[%s6117_s2 + $0x58] sm:$0xff]   ;;  %vm1852_vm11 = vcmask 523264   ;;  %vm2200_vm12 = vcmask 253952  }
  0x22   :  { %4198 = vmatmul.mubr.msk.bf16.vlgmr.msra.gmra.mrb[4].mxu1 %vm303_vm8, %v4911_v61  ;;  %4222 = vmatmul.mubr.msk.bf16.vlgmr.msra.gmra.mrb[4].mxu0 %vm303_vm8, %v4911_v61  ;;  %v4583_v9 = vld [vmem:[%s6117_s2 + $0x88] sm:$0xff]   ;;  %v4580_v10 = vld [vmem:[%s6117_s2 + $0x70] sm:$0xff]   ;;  %v4581_v12 = vld [vmem:[%s6117_s2 + $0x78] sm:$0xff]  }
  0x23   :  { %4210 = vmatpush3.bf16.msra.mxu1 %v4574_v0  ;;  %4234 = vmatpush3.bf16.msra.mxu0 %v4575_v2  ;;  %v4584_v13 = vld [vmem:[%s6117_s2 + $0xa0] sm:$0xff]   ;;  %v4585_v14 = vld [vmem:[%s6117_s2 + $0xa8] sm:$0xff]   ;;  %v4586_v22 = vld [vmem:[%s6117_s2 + $0x90] sm:$0xff]  }
  0x24   :  { %4211 = vmatprep.subr.bf16.mxu1 %v4703_v1  ;;  %4235 = vmatprep.subr.bf16.mxu0 %v4703_v1  ;;  %v4587_v30 = vld [vmem:[%s6117_s2 + $0x98] sm:$0xff]   ;;  %v4588_v31 = vld [vmem:[%s6117_s2 + $0xb0] sm:$0xff]   ;;  %v3950_v41 = vld [vmem:[%s6118_s3 + $0x4] ss:$0 sm:$0xff] }
  0x25   :  { %4213 = vmatprep.mubr.msk.bf16.mxu1 %vm4704_vm0, %v4703_v1  ;;  %4237 = vmatprep.mubr.msk.bf16.mxu0 %vm4704_vm0, %v4703_v1  ;;  %v4589_v32 = vld [vmem:[%s6117_s2 + $0xb8] sm:$0xff]   ;;  %v3946_v42 = vld [vmem:[%s6118_s3] ss:$0 sm:$0xff]  ;;  %v3952_v55 = vld [vmem:[%s6118_s3 + $0x6] ss:$0 sm:$0xff] }
  0x26   :  { %v3948_v57 = vld [vmem:[%s6118_s3 + $0x2] ss:$0 sm:$0xff] }
  0x27   :  { %4212 = vmatpush3.bf16.msra.mxu1 %v4576_v3  ;;  %4236 = vmatpush3.bf16.msra.mxu0 %v4577_v4 }
  0x28   :  { %4225 = vmatprep.subr.bf16.mxu1 %v4703_v1  ;;  %4249 = vmatprep.subr.bf16.mxu0 %v4703_v1 }
  0x2a   :  { %4214 = vmatmul.mubr.msk.bf16.vlgmr.msra.gmra.mrb[8].mxu1 %vm303_vm8, %v4911_v61  ;;  %4238 = vmatmul.mubr.msk.bf16.vlgmr.msra.gmra.mrb[8].mxu0 %vm303_vm8, %v4911_v61 }
  0x2b   :  { %4226 = vmatpush3.bf16.msra.mxu1 %v4578_v6  ;;  %4229 = vmatprep.mubr.msk.bf16.mxu1 %vm4704_vm0, %v4703_v1 }
  0x2c   :  { %4227 = vmatprep.subr.bf16.mxu1 %v4703_v1  ;;  %4250 = vmatpush3.bf16.msra.mxu0 %v4582_v7 }
  0x2d   :  { %4251 = vmatprep.subr.bf16.mxu0 %v4703_v1  ;;  %4253 = vmatprep.mubr.msk.bf16.mxu0 %vm4704_vm0, %v4703_v1 }
  0x2f   :  { %4228 = vmatpush3.bf16.msra.mxu1 %v4579_v8 }
  0x30   :  { %4241 = vmatprep.subr.bf16.mxu1 %v4703_v1  ;;  %4252 = vmatpush3.bf16.msra.mxu0 %v4583_v9  ;;  %v3951_v9 = vld [vmem:[%s6118_s3 + $0x5] ss:$0 sm:$0xff] }
  0x31   :  { %4265 = vmatprep.subr.bf16.mxu0 %v4703_v1 }
  0x32   :  { %4230 = vmatmul.mubr.msk.bf16.vlgmr.msra.gmra.mrb[12].mxu1 %vm303_vm8, %v4911_v61 }
  0x33   :  { %4242 = vmatpush3.bf16.msra.mxu1 %v4580_v10  ;;  %4245 = vmatprep.mubr.msk.bf16.mxu1 %vm4704_vm0, %v4703_v1 }
  0x34   :  { %4243 = vmatprep.subr.bf16.mxu1 %v4703_v1  ;;  %4254 = vmatmul.mubr.msk.bf16.vlgmr.msra.gmra.mrb[12].mxu0 %vm303_vm8, %v4911_v61 }
  0x35   :  { %4269 = vmatprep.mubr.msk.bf16.mxu0 %vm4704_vm0, %v4703_v1  ;;  %4266 = vmatpush3.bf16.msra.mxu0 %v4584_v13 }
  0x36   :  { %4267 = vmatprep.subr.bf16.mxu0 %v4703_v1 }
  0x37   :  { %4244 = vmatpush3.bf16.msra.mxu1 %v4581_v12  ;;  %v3947_v12 = vld [vmem:[%s6118_s3 + $0x1] ss:$0 sm:$0xff] }
  0x38   :  { %4257 = vmatprep.subr.bf16.mxu1 %v4703_v1 }
  0x39   :  { %4268 = vmatpush3.bf16.msra.mxu0 %v4585_v14  ;;  %v3954_v14 = vld [vmem:[%s6118_s3 + $0x8] ss:$0 sm:$0xff] }
  0x3a   :  { %4246 = vmatmul.mubr.msk.bf16.vlgmr.msra.gmra.mrb[16].mxu1 %vm303_vm8, %v4911_v61  ;;  %4281 = vmatprep.subr.bf16.mxu0 %v4703_v1 }
  0x3b   :  { %4261 = vmatprep.mubr.msk.bf16.mxu1 %vm4704_vm0, %v4703_v1  ;;  %4258 = vmatpush3.bf16.msra.mxu1 %v4586_v22 }
  0x3c   :  { %4259 = vmatprep.subr.bf16.mxu1 %v4703_v1  ;;  %4270 = vmatmul.mubr.msk.bf16.vlgmr.msra.gmra.mrb[16].mxu0 %vm303_vm8, %v4911_v61 }
  0x3d   :  { %4283 = vmatprep.mubr.msk.bf16.mxu0 %vm4704_vm0, %v4703_v1 }
  0x3f   :  { %4260 = vmatpush3.bf16.msra.mxu1 %v4587_v30 }
  0x40   :  { %4273 = vmatprep.subr.bf16.mxu1 %v4703_v1 }
  0x42   :  { %4262 = vmatmul.mubr.msk.bf16.vlgmr.msra.gmra.mrb[20].mxu1 %vm303_vm8, %v4911_v61 }
  0x43   :  { %4277 = vmatprep.mubr.msk.bf16.mxu1 %vm4704_vm0, %v4703_v1  ;;  %4274 = vmatpush3.bf16.msra.mxu1 %v4588_v31 }
  0x44   :  { %4275 = vmatprep.subr.bf16.mxu1 %v4703_v1 }
  0x47   :  { %4276 = vmatpush3.bf16.msra.mxu1 %v4589_v32 }
  0x48   :  { %4287 = vmatprep.subr.bf16.mxu1 %v4703_v1 }
  0x4a   :  { %4278 = vmatmul.mubr.msk.bf16.vlgmr.msra.gmra.mrb[24].mxu1 %vm303_vm8, %v4911_v61 }
  0x4b   :  { %4289 = vmatprep.mubr.msk.bf16.mxu1 %vm4704_vm0, %v4703_v1 }
  0xed   :  { %v341_v33 = vpop.f32.mrb[0].mxu1  ;;  %v445_v34 = vpop.f32.mrb[0].mxu0 }
  0xee   :  { %v4191_v35 = vpop.f32.mrb[1].mxu1  ;;  %v4207_v36 = vpop.f32.mrb[1].mxu0  ;;  %v342_v50 = vadd.f32 %v3946_v42, %v341_v33  ;;  %v446_v3 = vadd.f32 %v3948_v57, %v445_v34 }
  0xef   :  { %v344_v37 = vpop.f32.mrb[2].mxu1  ;;  %v448_v38 = vpop.f32.mrb[2].mxu0 }
  0xf0   :  { %v4192_v39 = vpop.f32.mrb[3].mxu1  ;;  %v4208_v40 = vpop.f32.mrb[3].mxu0  ;;  %v919_v56 = vmul.f32 0.35355338, %v342_v50  ;;  %v921_v10 = vmul.f32 0.35355338, %v446_v3 }
  0xf2   :  { %v923_v2 = vpack.c.bf16 %v919_v56, %v919_v56  ;;  %v925_v33 = vpack.c.bf16 %v921_v10, %v921_v10 }
  0xf5   :  { %v393_v43 = vpop.f32.mrb[4].mxu1  ;;  %v549_v44 = vpop.f32.mrb[4].mxu0 }
  0xf6   :  { %v550_v45 = vadd.f32 %v3950_v41, %v549_v44  ;;  %v4199_v46 = vpop.f32.mrb[5].mxu1  ;;  %v4223_v47 = vpop.f32.mrb[5].mxu0  ;;  %v394_v34 = vadd.f32 %v3947_v12, %v393_v43  ;;  %v3953_v44 = vld [vmem:[%s6118_s3 + $0x7] ss:$0 sm:$0xff] }
  0xf7   :  { %v396_v48 = vpop.f32.mrb[6].mxu1  ;;  %v552_v49 = vpop.f32.mrb[6].mxu0  ;;  %v5075_v46 = vld [vmem:[%s6118_s3 + $0x3] ss:$0 sm:$0xff] }
  0xf8   :  { %v927_v51 = vpack.c.bf16 %v550_v45, %v550_v45  ;;  %v4200_v52 = vpop.f32.mrb[7].mxu1  ;;  %v4224_v53 = vpop.f32.mrb[7].mxu0  ;;  %v920_v43 = vmul.f32 0.35355338, %v394_v34 }
  0xfa   :  { %v936_v54 = vsel %vm931_vm9, %v927_v51, 0  ;;  %v924_v51 = vpack.c.bf16 %v920_v43, %v920_v43 }
  0xfb   :  { %4282 = vmatpush3.bf16.xpose.msra.mxu0 %v936_v54 }
  0xfc   :  { %4293 = vmatprep.subr.bf16.mxu0 %v4703_v1 }
  0xfd   :  { %v497_v58 = vpop.f32.mrb[8].mxu1  ;;  %v653_v59 = vpop.f32.mrb[8].mxu0 }
  0xfe   :  { %v654_v60 = vadd.f32 %v3952_v55, %v653_v59  ;;  %v4215_v61 = vpop.f32.mrb[9].mxu1  ;;  %v4239_v62 = vpop.f32.mrb[9].mxu0  ;;  %v498_v52 = vadd.f32 %v5075_v46, %v497_v58 }
  0xff   :  { %v500_v63 = vpop.f32.mrb[10].mxu1  ;;  %v656_v0 = vpop.f32.mrb[10].mxu0  ;;  %v5092_v62 = vld [vmem:[%s6118_s3 + $0x9] ss:$0 sm:$0xff] }
 0x100   :  { %v929_v4 = vpack.c.bf16 %v654_v60, %v654_v60  ;;  %v4216_v6 = vpop.f32.mrb[11].mxu1  ;;  %v4240_v7 = vpop.f32.mrb[11].mxu0  ;;  %v922_v56 = vmul.f32 0.35355338, %v498_v52 }
 0x102   :  { %v1028_v8 = vsel %vm931_vm9, %v929_v4, 0  ;;  %4284 = vmatmul.mubr.msk.bf16.vlgmr.msra.gmra.mrb[20].mxu0 %vm931_vm9, %v923_v2  ;;  %v926_v57 = vpack.c.bf16 %v922_v56, %v922_v56 }
 0x103   :  { %4294 = vmatpush3.bf16.xpose.msra.mxu0 %v1028_v8  ;;  %4295 = vmatprep.mubr.msk.bf16.mxu0 %vm4704_vm0, %v4703_v1 }
 0x104   :  { %4305 = vmatprep.subr.bf16.mxu0 %v4703_v1 }
 0x105   :  { %v601_v13 = vpop.f32.mrb[12].mxu1 }
 0x106   :  { %v602_v22 = vadd.f32 %v3951_v9, %v601_v13  ;;  %v4231_v30 = vpop.f32.mrb[13].mxu1 }
 0x107   :  { %v604_v31 = vpop.f32.mrb[14].mxu1  ;;  %v757_v32 = vpop.f32.mrb[12].mxu0 }
 0x108   :  { %v928_v35 = vpack.c.bf16 %v602_v22, %v602_v22  ;;  %v4232_v36 = vpop.f32.mrb[15].mxu1  ;;  %v758_v37 = vadd.f32 %v3954_v14, %v757_v32  ;;  %v4255_v38 = vpop.f32.mrb[13].mxu0 }
 0x109   :  { %v760_v39 = vpop.f32.mrb[14].mxu0 }
 0x10a   :  { %v982_v40 = vsel %vm931_vm9, %v928_v35, 0  ;;  %4296 = vmatmul.mubr.msk.bf16.vlgmr.msra.gmra.mrb[24].mxu0 %vm931_vm9, %v925_v33  ;;  %v1164_v41 = vpack.c.bf16 %v758_v37, %v758_v37  ;;  %v4256_v42 = vpop.f32.mrb[15].mxu0 }
 0x10b   :  { %4288 = vmatpush3.bf16.xpose.msra.mxu1 %v982_v40  ;;  %4307 = vmatprep.mubr.msk.bf16.mxu0 %vm4704_vm0, %v4703_v1 }
 0x10c   :  { %4299 = vmatprep.subr.bf16.mxu1 %v4703_v1  ;;  %v1173_v45 = vsel %vm1171_vm10, %v1164_v41, 0 }
 0x10d   :  { %v705_v47 = vpop.f32.mrb[16].mxu1  ;;  %4306 = vmatpush3.bf16.msra.mxu0 %v1173_v45 }
 0x10e   :  { %v706_v48 = vadd.f32 %v3953_v44, %v705_v47  ;;  %v4247_v49 = vpop.f32.mrb[17].mxu1  ;;  %4317 = vmatprep.subr.bf16.mxu0 %v4703_v1 }
 0x10f   :  { %v708_v50 = vpop.f32.mrb[18].mxu1  ;;  %v5087_v58 = vpop.f32.mrb[16].mxu0 }
 0x110   :  { %v930_v53 = vpack.c.bf16 %v706_v48, %v706_v48  ;;  %v4248_v54 = vpop.f32.mrb[19].mxu1  ;;  %v4271_v59 = vpop.f32.mrb[17].mxu0 }
 0x111   :  { %v864_v60 = vpop.f32.mrb[18].mxu0 }
 0x112   :  { %v1074_v55 = vsel %vm931_vm9, %v930_v53, 0  ;;  %4290 = vmatmul.mubr.msk.bf16.vlgmr.msra.gmra.mrb[28].mxu1 %vm931_vm9, %v924_v51  ;;  %v4272_v61 = vpop.f32.mrb[19].mxu0 }
 0x113   :  { %4300 = vmatpush3.bf16.xpose.msra.mxu1 %v1074_v55  ;;  %4301 = vmatprep.mubr.msk.bf16.mxu1 %vm4704_vm0, %v4703_v1 }
 0x114   :  { %4311 = vmatprep.subr.bf16.mxu1 %v4703_v1 }
 0x115   :  { %v809_v63 = vpop.f32.mrb[20].mxu1 }
 0x116   :  { %v810_v0 = vadd.f32 %v5092_v62, %v809_v63  ;;  %v4263_v2 = vpop.f32.mrb[21].mxu1 }
 0x117   :  { %v812_v3 = vpop.f32.mrb[22].mxu1 }
 0x118   :  { %v1165_v4 = vpack.c.bf16 %v810_v0, %v810_v0  ;;  %v4264_v6 = vpop.f32.mrb[23].mxu1 }
 0x11a   :  { %4302 = vmatmul.mubr.msk.bf16.vlgmr.msra.gmra.mrb[32].mxu1 %vm931_vm9, %v926_v57  ;;  %v1219_v7 = vsel %vm1171_vm10, %v1165_v4, 0 }
 0x11b   :  { %4313 = vmatprep.mubr.msk.bf16.mxu1 %vm4704_vm0, %v4703_v1  ;;  %4312 = vmatpush3.bf16.msra.mxu1 %v1219_v7 }
 0x11c   :  { %4323 = vmatprep.subr.bf16.mxu1 %v4703_v1 }
 0x11d   :  { %v5097_v8 = vpop.f32.mrb[24].mxu1 }
 0x11e   :  { %v4279_v9 = vpop.f32.mrb[25].mxu1 }
 0x11f   :  { %v916_v10 = vpop.f32.mrb[26].mxu1 }
 0x120   :  { %v4280_v12 = vpop.f32.mrb[27].mxu1  ;;  %v3956_v10 = vld [vmem:[%s6118_s3 + $0xa] ss:$0 sm:$0xff] }
 0x121   :  { %v862_v12 = vadd.f32 %v3956_v10, %v5087_v58 }
 0x1d5   :  { %v972_v13 = vpop.f32.mrb[20].mxu0 }
 0x1d6   :  { %v4285_v14 = vpop.f32.mrb[21].mxu0  ;;  %v1116_v22 = vsel %vm931_vm9, %v972_v13, -inf }
 0x1d7   :  { %1117 = vmax.xlane.f32.xlu0 %v1116_v22  ;;  %v975_v30 = vpop.f32.mrb[22].mxu0  ;;  %v1166_v22 = vpack.c.bf16 %v862_v12, %v862_v12 }
 0x1d8   :  { %v4286_v31 = vpop.f32.mrb[23].mxu0 }
 0x1dd   :  { %v1064_v32 = vpop.f32.mrb[24].mxu0 }
 0x1de   :  { %v4297_v33 = vpop.f32.mrb[25].mxu0  ;;  %v1122_v34 = vsel %vm931_vm9, %v1064_v32, -inf }
 0x1df   :  { %1123 = vmax.xlane.f32.xlu1 %v1122_v34  ;;  %v1067_v35 = vpop.f32.mrb[26].mxu0 }
 0x1e0   :  { %v4298_v36 = vpop.f32.mrb[27].mxu0  ;;  %v3957_v35 = vld [vmem:[%s6118_s3 + $0xb] ss:$0 sm:$0xff] }
 0x1e5   :  { %v1018_v37 = vpop.f32.mrb[28].mxu1 }
 0x1e6   :  { %v4291_v38 = vpop.f32.mrb[29].mxu1  ;;  %v1119_v39 = vsel %vm931_vm9, %v1018_v37, -inf }
 0x1e7   :  { %1120 = vmax.xlane.f32.xlu0 %v1119_v39  ;;  %v1021_v40 = vpop.f32.mrb[30].mxu1 }
 0x1e8   :  { %v4292_v41 = vpop.f32.mrb[31].mxu1 }
 0x1ed   :  { %v1110_v42 = vpop.f32.mrb[32].mxu1 }
 0x1ee   :  { %v4303_v44 = vpop.f32.mrb[33].mxu1  ;;  %v1125_v43 = vsel %vm931_vm9, %v1110_v42, -inf }
 0x1ef   :  { %1126 = vmax.xlane.f32.xlu1 %v1125_v43  ;;  %v1113_v45 = vpop.f32.mrb[34].mxu1 }
 0x1f0   :  { %v4304_v47 = vpop.f32.mrb[35].mxu1 }
 0x1f1   :  { %v116_v47 = vld [vmem:[%s6119_s4] sm:$0xf] }
 0x264   :  { %v1118_v48 = vpop.xlane.xlu0 %1117 }
 0x265   :  { %v1128_v49 = vsub.f32 %v972_v13, %v1118_v48  ;;  %v5135_v48 = vsel %vm1171_vm10, %v116_v47, 0 }
 0x267   :  { %v1132_v50 = vmul.f32 1.442695, %v1128_v49  ;;  %v117_v49 = vld [vmem:[%s6119_s4 + $0x4] sm:$0xf] }
 0x269   :  { %4596 = vpow2.f32 %v1132_v50  ;;  %v5143_v50 = vsel %vm1171_vm10, %v117_v49, 0  ;;  %v4006_v49 = vld [vmem:[%s6120_s5] ss:$0 sm:$0xff] }
 0x26c   :  { %v1124_v51 = vpop.xlane.xlu1 %1123 }
 0x26d   :  { %v1130_v52 = vsub.f32 %v1064_v32, %v1124_v51  ;;  %v1265_v32 = vsel %vm1171_vm10, %v1166_v22, 0  ;;  %v118_v51 = vld [vmem:[%s6119_s4 + $0x8] sm:$0xf] }
 0x26f   :  { %v1136_v53 = vmul.f32 1.442695, %v1130_v52 }
 0x271   :  { %4598 = vpow2.f32 %v1136_v53 }
 0x273   :  { %v4597_v54 = vpop.eup %4596 }
 0x274   :  { %v1121_v55 = vpop.xlane.xlu0 %1120  ;;  %v1140_v56 = vsel %vm931_vm9, %v4597_v54, 0.0 }
 0x275   :  { %v1129_v57 = vsub.f32 %v1018_v37, %v1121_v55  ;;  %1141 = vadd.xlane.f32.xlu0 %v1140_v56  ;;  %v914_v37 = vadd.f32 %v3957_v35, %v5097_v8  ;;  %v5151_v55 = vsel %vm1171_vm10, %v118_v51, 0 }
 0x277   :  { %v1134_v59 = vmul.f32 1.442695, %v1129_v57  ;;  %v1167_v40 = vpack.c.bf16 %v914_v37, %v914_v37 }
 0x279   :  { %4600 = vpow2.f32 %v1134_v59  ;;  %v1311_v44 = vsel %vm1171_vm10, %v1167_v40, 0 }
 0x27b   :  { %v4599_v60 = vpop.eup %4598 }
 0x27c   :  { %v1127_v61 = vpop.xlane.xlu1 %1126  ;;  %v1146_v63 = vsel %vm931_vm9, %v4599_v60, 0.0 }
 0x27d   :  { %v1131_v0 = vsub.f32 %v1110_v42, %v1127_v61  ;;  %1147 = vadd.xlane.f32.xlu0 %v1146_v63 }
 0x27f   :  { %v1138_v2 = vmul.f32 1.442695, %v1131_v0 }
 0x281   :  { %4602 = vpow2.f32 %v1138_v2  ;;  %v119_v2 = vld [vmem:[%s6119_s4 + $0xc] sm:$0xf] }
 0x283   :  { %v4601_v3 = vpop.eup %4600 }
 0x284   :  { %v1143_v4 = vsel %vm931_vm9, %v4601_v3, 0.0 }
 0x285   :  { %1144 = vadd.xlane.f32.xlu1 %v1143_v4 }
 0x28b   :  { %v4603_v6 = vpop.eup %4602 }
 0x28c   :  { %v1149_v7 = vsel %vm931_vm9, %v4603_v6, 0.0 }
 0x28d   :  { %1150 = vadd.xlane.f32.xlu1 %v1149_v7  ;;  %v5165_v7 = vsel %vm1171_vm10, %v119_v2, 0 }
 0x302   :  { %v1142_v9 = vpop.xlane.xlu0 %1141 }
 0x303   :  { %4604 = vrcp.f32 %v1142_v9 }
 0x30a   :  { %v1148_v13 = vpop.xlane.xlu0 %1147 }
 0x30b   :  { %4606 = vrcp.f32 %v1148_v13 }
 0x30d   :  { %v4605_v14 = vpop.eup %4604 }
 0x30e   :  { %v1153_v30 = vmul.f32 %v4605_v14, %v4597_v54 }
 0x310   :  { %v1160_v31 = vpack.c.bf16 %v1153_v30, %v1153_v30 }
 0x312   :  { %4308 = vmatmul.mubr.msk.bf16.vlgmr.msra.gmra.mrb[28].mxu0 %vm931_vm9, %v1160_v31  ;;  %v1145_v33 = vpop.xlane.xlu1 %1144 }
 0x313   :  { %4318 = vmatpush3.bf16.msra.mxu0 %v1265_v32  ;;  %4608 = vrcp.f32 %v1145_v33  ;;  %4319 = vmatprep.mubr.msk.bf16.mxu0 %vm4704_vm0, %v4703_v1 }
 0x314   :  { %4329 = vmatprep.subr.bf16.mxu0 %v4703_v1 }
 0x315   :  { %v4607_v34 = vpop.eup %4606 }
 0x316   :  { %v1157_v58 = vmul.f32 %v4607_v34, %v4599_v60 }
 0x318   :  { %v1162_v36 = vpack.c.bf16 %v1157_v58, %v1157_v58 }
 0x31a   :  { %4320 = vmatmul.mubr.msk.bf16.vlgmr.msra.gmra.mrb[32].mxu0 %vm931_vm9, %v1162_v36  ;;  %v1151_v38 = vpop.xlane.xlu1 %1150 }
 0x31b   :  { %4610 = vrcp.f32 %v1151_v38  ;;  %4331 = vmatprep.mubr.msk.bf16.mxu0 %vm4704_vm0, %v4703_v1  ;;  %4330 = vmatpush3.bf16.msra.mxu0 %v5135_v48 }
 0x31c   :  { %4341 = vmatprep.subr.bf16.mxu0 %v4703_v1 }
 0x31d   :  { %v4609_v39 = vpop.eup %4608 }
 0x31e   :  { %v1155_v41 = vmul.f32 %v4609_v39, %v4601_v3 }
 0x320   :  { %v1161_v42 = vpack.c.bf16 %v1155_v41, %v1155_v41 }
 0x322   :  { %4314 = vmatmul.mubr.msk.bf16.vlgmr.msra.gmra.mrb[36].mxu1 %vm931_vm9, %v1161_v42 }
 0x323   :  { %4324 = vmatpush3.bf16.msra.mxu1 %v1311_v44  ;;  %4325 = vmatprep.mubr.msk.bf16.mxu1 %vm4704_vm0, %v4703_v1 }
 0x324   :  { %4335 = vmatprep.subr.bf16.mxu1 %v4703_v1 }
 0x325   :  { %v4611_v8 = vpop.eup %4610 }
 0x326   :  { %v1159_v43 = vmul.f32 %v4611_v8, %v4603_v6 }
 0x328   :  { %v1163_v45 = vpack.c.bf16 %v1159_v43, %v1159_v43 }
 0x32a   :  { %4326 = vmatmul.mubr.msk.bf16.vlgmr.msra.gmra.mrb[40].mxu1 %vm931_vm9, %v1163_v45 }
 0x32b   :  { %4337 = vmatprep.mubr.msk.bf16.mxu1 %vm4704_vm0, %v4703_v1  ;;  %4336 = vmatpush3.bf16.msra.mxu1 %v5143_v50 }
 0x32c   :  { %4347 = vmatprep.subr.bf16.mxu1 %v4703_v1 }
 0x3e5   :  { %v1209_v52 = vpop.f32.mrb[28].mxu0 }
 0x3e6   :  { %v1353_v53 = vpack.c.bf16 %v1209_v52, %v1209_v52  ;;  %v4309_v54 = vpop.f32.mrb[29].mxu0 }
 0x3e7   :  { %v1212_v56 = vpop.f32.mrb[30].mxu0 }
 0x3e8   :  { %v4310_v57 = vpop.f32.mrb[31].mxu0  ;;  %4332 = vmatmul.mubr.msk.bf16.vlgmr.msra.gmra.mrb[36].mxu0 %vm931_vm9, %v1353_v53 }
 0x3e9   :  { %4342 = vmatpush3.bf16.msra.mxu0 %v5151_v55  ;;  %4343 = vmatprep.mubr.msk.bf16.mxu0 %vm4704_vm0, %v4703_v1 }
 0x3ea   :  { %4353 = vmatprep.subr.bf16.mxu0 %v4703_v1 }
 0x3ed   :  { %v1301_v59 = vpop.f32.mrb[32].mxu0 }
 0x3ee   :  { %v1355_v60 = vpack.c.bf16 %v1301_v59, %v1301_v59  ;;  %v4321_v61 = vpop.f32.mrb[33].mxu0 }
 0x3ef   :  { %v1304_v63 = vpop.f32.mrb[34].mxu0 }
 0x3f0   :  { %v4322_v0 = vpop.f32.mrb[35].mxu0  ;;  %4344 = vmatmul.mubr.msk.bf16.vlgmr.msra.gmra.mrb[40].mxu0 %vm931_vm9, %v1355_v60 }
 0x3f1   :  { %4357 = vmatprep.mubr.msk.bf16.mxu0 %vm4704_vm0, %v4703_v1 }
 0x3f5   :  { %v1255_v3 = vpop.f32.mrb[36].mxu1 }
 0x3f6   :  { %v1354_v4 = vpack.c.bf16 %v1255_v3, %v1255_v3  ;;  %v4315_v6 = vpop.f32.mrb[37].mxu1 }
 0x3f7   :  { %v1258_v9 = vpop.f32.mrb[38].mxu1 }
 0x3f8   :  { %v4316_v10 = vpop.f32.mrb[39].mxu1  ;;  %4338 = vmatmul.mubr.msk.bf16.vlgmr.msra.gmra.mrb[44].mxu1 %vm931_vm9, %v1354_v4 }
 0x3f9   :  { %4348 = vmatpush3.bf16.msra.mxu1 %v5165_v7  ;;  %4349 = vmatprep.mubr.msk.bf16.mxu1 %vm4704_vm0, %v4703_v1 }
 0x3fa   :  { %4361 = vmatprep.subr.bf16.mxu1 %v4703_v1 }
 0x3fd   :  { %v1347_v12 = vpop.f32.mrb[40].mxu1 }
 0x3fe   :  { %v1356_v13 = vpack.c.bf16 %v1347_v12, %v1347_v12  ;;  %v4327_v14 = vpop.f32.mrb[41].mxu1 }
 0x3ff   :  { %v1350_v22 = vpop.f32.mrb[42].mxu1 }
 0x400   :  { %v4328_v30 = vpop.f32.mrb[43].mxu1  ;;  %4350 = vmatmul.mubr.msk.bf16.vlgmr.msra.gmra.mrb[48].mxu1 %vm931_vm9, %v1356_v13 }
 0x401   :  { %4369 = vmatprep.mubr.msk.bf16.mxu1 %vm4704_vm0, %v4703_v1 }
 0x4bb   :  { %v1397_v31 = vpop.f32.mrb[36].mxu0 }
 0x4bc   :  { %v4333_v32 = vpop.f32.mrb[37].mxu0  ;;  %v1541_v39 = vsel %vm303_vm8, %v1397_v31, 0.0 }
 0x4bd   :  { %v1400_v33 = vpop.f32.mrb[38].mxu0 }
 0x4be   :  { %v4334_v34 = vpop.f32.mrb[39].mxu0 }
 0x4c3   :  { %v1489_v58 = vpop.f32.mrb[40].mxu0 }
 0x4c4   :  { %v4345_v35 = vpop.f32.mrb[41].mxu0  ;;  %v1544_v8 = vsel %vm303_vm8, %v1489_v58, 0.0 }
 0x4c5   :  { %v1492_v36 = vpop.f32.mrb[42].mxu0 }
 0x4c6   :  { %v4346_v37 = vpop.f32.mrb[43].mxu0 }
 0x4cb   :  { %v1443_v38 = vpop.f32.mrb[44].mxu1 }
 0x4cc   :  { %v1542_v40 = vsel %vm303_vm8, %v1443_v38, 0.0  ;;  %v4339_v41 = vpop.f32.mrb[45].mxu1 }
 0x4cd   :  { %v1543_v42 = vadd.f32 %v1542_v40, %v1541_v39  ;;  %v1446_v44 = vpop.f32.mrb[46].mxu1 }
 0x4ce   :  { %v4340_v43 = vpop.f32.mrb[47].mxu1 }
 0x4cf   :  { %v1545_v45 = vadd.f32 %v1544_v8, %v1543_v42 }
 0x4d3   :  { %v1535_v47 = vpop.f32.mrb[48].mxu1 }
 0x4d4   :  { %v1546_v51 = vsel %vm303_vm8, %v1535_v47, 0.0  ;;  %v4351_v52 = vpop.f32.mrb[49].mxu1 }
 0x4d5   :  { %v1547_v53 = vadd.f32 %v1546_v51, %v1545_v45  ;;  %v1538_v54 = vpop.f32.mrb[50].mxu1 }
 0x4d6   :  { %v4352_v56 = vpop.f32.mrb[51].mxu1 }
 0x4d7   :  { %v1554_v57 = vadd.f32 %v4006_v49, %v1547_v53 }
 0x4d9   :  { %v1556_v59 = vrot.slane %v1554_v57, 1  ;;  %v1557_v60 = vrot.slane %v1554_v57, 2  ;;  %v1558_v61 = vrot.slane %v1554_v57, 3  ;;  %v1559_v63 = vrot.slane %v1554_v57, 4 }
 0x4da   :  { %v1560_v0 = vrot.slane %v1554_v57, 5  ;;  %v1561_v2 = vrot.slane %v1554_v57, 6  ;;  %v1562_v3 = vrot.slane %v1554_v57, 7  ;;  %v1571_v12 = vadd.f32 %v1554_v57, %v4834_v11 }
 0x4db   :  { %v1572_v4 = vadd.f32 %v1556_v59, %v4858_v23  ;;  %v1573_v6 = vadd.f32 %v1557_v60, %v4862_v24  ;;  %v1574_v9 = vadd.f32 %v1558_v61, %v4866_v25  ;;  %v1575_v10 = vadd.f32 %v1559_v63, %v4870_v26 }
 0x4dc   :  { %v1576_v13 = vadd.f32 %v1560_v0, %v4874_v27  ;;  %v1577_v30 = vadd.f32 %v1561_v2, %v4878_v28  ;;  %v1578_v31 = vadd.f32 %v1562_v3, %v4882_v29 }
 0x4dd   :  { %v1587_v14 = vrot.slane %v1572_v4, 7  ;;  %v1589_v22 = vrot.slane %v1573_v6, 6  ;;  %v1591_v33 = vrot.slane %v1574_v9, 5  ;;  %v1593_v24 = vrot.slane %v1575_v10, 4 }
 0x4de   :  { %v1595_v34 = vrot.slane %v1576_v13, 3  ;;  %v1597_v11 = vrot.slane %v1577_v30, 2  ;;  %v1599_v58 = vrot.slane %v1578_v31, 1 }
 0x4df   :  { %v1588_v32 = vsel %vm270_vm1, %v1587_v14, %v1571_v12 }
 0x4e0   :  { %v1590_v23 = vsel %vm273_vm2, %v1589_v22, %v1588_v32 }
 0x4e1   :  { %v1592_v25 = vsel %vm276_vm3, %v1591_v33, %v1590_v23 }
 0x4e2   :  { %v1594_v26 = vsel %vm279_vm4, %v1593_v24, %v1592_v25  ;;  %v5241_v25 = vld [vmem:[%s6121_s6] sm:$0xff]  }
 0x4e3   :  { %v1596_v27 = vsel %vm282_vm5, %v1595_v34, %v1594_v26  ;;  %4354 = vmatpush3.bf16.msra.mxu0 %v5241_v25  ;;  %v5247_v34 = vld [vmem:[%s6121_s6 + $0x8] sm:$0xff]   ;;  %v5255_v26 = vld [vmem:[%s6123_s8] sm:$0xff]  }
 0x4e4   :  { %v1598_v35 = vsel %vm285_vm6, %v1597_v11, %v1596_v27  ;;  %4355 = vmatprep.subr.bf16.mxu0 %v4703_v1  ;;  %4362 = vmatpush3.bf16.msra.mxu1 %v5255_v26  ;;  %v5261_v11 = vld [vmem:[%s6123_s8 + $0x8] sm:$0xff]   ;;  %v2210_v27 = vld [vmem:[%s6134_s18 + $0x3] sm:$0x1] }
 0x4e5   :  { %v1600_v28 = vsel %vm288_vm7, %v1599_v58, %v1598_v35  ;;  %4363 = vmatprep.subr.bf16.mxu1 %v4703_v1  ;;  %v2211_v58 = vld [vmem:[%s6134_s18 + $0x5] sm:$0x1]  ;;  %v5274_v35 = vadd.f32 %v2210_v27, %v150_v15 }
 0x4e6   :  { %v1602_v29 = vsel %vm303_vm8, %v1600_v28, 0.0  ;;  %v2209_v28 = vld [vmem:[%s6134_s18 + $0x1] sm:$0x1] }
 0x4e7   :  { %1603 = vadd.xlane.f32.xlu0 %v1602_v29  ;;  %4356 = vmatpush3.bf16.msra.mxu0 %v5247_v34  ;;  %v5281_v29 = vadd.f32 %v2211_v58, %v151_v16  ;;  %v2226_v15 = vpack.c.bf16 %v5274_v35, %v5274_v35  ;;  %v4008_v58 = vld [vmem:[%s6126_s11] ss:$0 sm:$0xff] }
 0x4e8   :  { %4373 = vmatprep.subr.bf16.mxu0 %v4703_v1  ;;  %4364 = vmatpush3.bf16.msra.mxu1 %v5261_v11 }
 0x4e9   :  { %4365 = vmatprep.subr.bf16.mxu1 %v4703_v1 }
 0x574   :  { %v1604_v36 = vpop.xlane.xlu0 %1603 }
 0x575   :  { %v1606_v37 = vmul.f32 0.03125, %v1604_v36 }
 0x577   :  { %v1608_v38 = vrot.slane %v1606_v37, 1  ;;  %v1609_v39 = vrot.slane %v1606_v37, 2  ;;  %v1610_v40 = vrot.slane %v1606_v37, 3  ;;  %v1611_v41 = vrot.slane %v1606_v37, 4 }
 0x578   :  { %v1612_v42 = vrot.slane %v1606_v37, 5  ;;  %v1613_v44 = vrot.slane %v1606_v37, 6  ;;  %v1614_v8 = vrot.slane %v1606_v37, 7  ;;  %v5198_v43 = vsub.f32 %v1571_v12, %v1606_v37  ;;  %v2212_v37 = vld [vmem:[%s6134_s18 + $0x7] sm:$0x1] }
 0x579   :  { %v5200_v45 = vsub.f32 %v1572_v4, %v1608_v38  ;;  %v5202_v47 = vsub.f32 %v1573_v6, %v1609_v39  ;;  %v5204_v49 = vsub.f32 %v1574_v9, %v1610_v40  ;;  %v5206_v51 = vsub.f32 %v1575_v10, %v1611_v41  ;;  %v4640_v38 = vld [vmem:[%s6116_s1] sm:$0xff] }
 0x57a   :  { %v5208_v52 = vsub.f32 %v1576_v13, %v1612_v42  ;;  %v5210_v53 = vsub.f32 %v1577_v30, %v1613_v44  ;;  %v5212_v54 = vsub.f32 %v1578_v31, %v1614_v8  ;;  %v1631_v61 = vmul.f32 %v5198_v43, %v5198_v43  ;;  %v2213_v44 = vld [vmem:[%s6134_s18 + $0x9] sm:$0x1] }
 0x57b   :  { %v1632_v56 = vmul.f32 %v5200_v45, %v5200_v45  ;;  %v1633_v57 = vmul.f32 %v5202_v47, %v5202_v47  ;;  %v1634_v59 = vmul.f32 %v5204_v49, %v5204_v49  ;;  %v1635_v60 = vmul.f32 %v5206_v51, %v5206_v51 }
 0x57c   :  { %v1636_v63 = vmul.f32 %v5208_v52, %v5208_v52  ;;  %v1637_v3 = vmul.f32 %v5210_v53, %v5210_v53  ;;  %v1638_v4 = vmul.f32 %v5212_v54, %v5212_v54  ;;  %v5289_v39 = vadd.f32 %v4640_v38, %v2209_v28 }
 0x57d   :  { %v1647_v0 = vrot.slane %v1632_v56, 7  ;;  %v1649_v2 = vrot.slane %v1633_v57, 6  ;;  %v1651_v9 = vrot.slane %v1634_v59, 5  ;;  %v1653_v12 = vrot.slane %v1635_v60, 4  ;;  %v2214_v60 = vld [vmem:[%s6134_s18 + $0xb] sm:$0x1] }
 0x57e   :  { %v1655_v14 = vrot.slane %v1636_v63, 3  ;;  %v1657_v30 = vrot.slane %v1637_v3, 2  ;;  %v1659_v32 = vrot.slane %v1638_v4, 1  ;;  %v5295_v16 = vadd.f32 %v2212_v37, %v152_v17 }
 0x57f   :  { %v1648_v6 = vsel %vm270_vm1, %v1647_v0, %v1631_v61  ;;  %v2227_v42 = vpack.c.bf16 %v5281_v29, %v5281_v29  ;;  %v2225_v8 = vpack.c.bf16 %v5289_v39, %v5289_v39  ;;  %v2242_v56 = vunpack.c.l.b16 %v2226_v15  ;;  %v2215_v0 = vld [vmem:[%s6134_s18 + $0xd] sm:$0x1] }
 0x580   :  { %v1650_v10 = vsel %vm273_vm2, %v1649_v2, %v1648_v6  ;;  %v5306_v57 = vadd.f32 %v2213_v44, %v153_v18  ;;  %v2228_v17 = vpack.c.bf16 %v5295_v16, %v5295_v16  ;;  %v2216_v2 = vld [vmem:[%s6134_s18 + $0xf] sm:$0x1]  ;;  %v5321_v18 = vadd.f32 %v2214_v60, %v154_v19 }
 0x581   :  { %v1652_v13 = vsel %vm276_vm3, %v1651_v9, %v1650_v10  ;;  %v2243_v59 = vunpack.c.l.b16 %v2227_v42  ;;  %v2241_v61 = vunpack.c.l.b16 %v2225_v8  ;;  %v2249_v63 = vrot.slane %v2242_v56, 7 }
 0x582   :  { %v1654_v22 = vsel %vm279_vm4, %v1653_v12, %v1652_v13  ;;  %v2229_v3 = vpack.c.bf16 %v5306_v57, %v5306_v57  ;;  %v2244_v4 = vunpack.c.l.b16 %v2228_v17  ;;  %v5328_v10 = vadd.f32 %v2215_v0, %v155_v20 }
 0x583   :  { %v1656_v31 = vsel %vm282_vm5, %v1655_v14, %v1654_v22  ;;  %v2251_v6 = vrot.slane %v2243_v59, 6  ;;  %v2250_v9 = vsel %vm270_vm1, %v2249_v63, %v2241_v61  ;;  %v5332_v12 = vadd.f32 %v2216_v2, %v156_v21 }
 0x584   :  { %v1658_v33 = vsel %vm285_vm6, %v1657_v30, %v1656_v31  ;;  %v2230_v19 = vpack.c.bf16 %v5321_v18, %v5321_v18  ;;  %v5336_v14 = vunpack.c.l.b16 %v2229_v3  ;;  %v2253_v30 = vrot.slane %v2244_v4, 5  ;;  %v4007_v31 = vld [vmem:[%s6125_s10] ss:$0 sm:$0xff] }
 0x585   :  { %v1660_v23 = vsel %vm288_vm7, %v1659_v32, %v1658_v33  ;;  %v2252_v22 = vsel %vm273_vm2, %v2251_v6, %v2250_v9 }
 0x586   :  { %v1662_v24 = vsel %vm303_vm8, %v1660_v23, 0.0 }
 0x587   :  { %1663 = vadd.xlane.f32.xlu1 %v1662_v24 }
 0x614   :  { %v1664_v36 = vpop.xlane.xlu1 %1663 }
 0x615   :  { %v1665_v40 = vmul.f32 0.03125, %v1664_v36 }
 0x617   :  { %v1666_v41 = vadd.f32 1e-05, %v1665_v40 }
 0x619   :  { %4612 = vrsqrt.f32 %v1666_v41 }
 0x623   :  { %v4613_v13 = vpop.eup %4612 }
 0x624   :  { %v1669_v32 = vrot.slane %v4613_v13, 1  ;;  %v1670_v20 = vrot.slane %v4613_v13, 2  ;;  %v1671_v33 = vrot.slane %v4613_v13, 3  ;;  %v1672_v23 = vrot.slane %v4613_v13, 4 }
 0x625   :  { %v1673_v5 = vrot.slane %v4613_v13, 5  ;;  %v1674_v21 = vrot.slane %v4613_v13, 6  ;;  %v1675_v24 = vrot.slane %v4613_v13, 7  ;;  %v1684_v27 = vmul.f32 %v4613_v13, %v5198_v43 }
 0x626   :  { %v1685_v28 = vmul.f32 %v1669_v32, %v5200_v45  ;;  %v1686_v36 = vmul.f32 %v1670_v20, %v5202_v47  ;;  %v1687_v37 = vmul.f32 %v1671_v33, %v5204_v49  ;;  %v1688_v38 = vmul.f32 %v1672_v23, %v5206_v51 }
 0x627   :  { %v1689_v15 = vmul.f32 %v1673_v5, %v5208_v52  ;;  %v1690_v40 = vmul.f32 %v1674_v21, %v5210_v53  ;;  %v1691_v41 = vmul.f32 %v1675_v24, %v5212_v54  ;;  %v1698_v42 = vmul.f32 %v4007_v31, %v1684_v27 }
 0x628   :  { %v1699_v43 = vmul.f32 %v4007_v31, %v1685_v28  ;;  %v1700_v44 = vmul.f32 %v4007_v31, %v1686_v36  ;;  %v1701_v8 = vmul.f32 %v4007_v31, %v1687_v37  ;;  %v1702_v56 = vmul.f32 %v4007_v31, %v1688_v38 }
 0x629   :  { %v1703_v17 = vmul.f32 %v4007_v31, %v1689_v15  ;;  %v1704_v59 = vmul.f32 %v4007_v31, %v1690_v40  ;;  %v1705_v45 = vmul.f32 %v4007_v31, %v1691_v41  ;;  %v5353_v60 = vadd.f32 %v4008_v58, %v1698_v42 }
 0x62a   :  { %v5355_v47 = vadd.f32 %v4008_v58, %v1699_v43  ;;  %v5357_v49 = vadd.f32 %v4008_v58, %v1700_v44  ;;  %v5359_v51 = vadd.f32 %v4008_v58, %v1701_v8  ;;  %v5361_v52 = vadd.f32 %v4008_v58, %v1702_v56 }
 0x62b   :  { %v5363_v53 = vadd.f32 %v4008_v58, %v1703_v17  ;;  %v5365_v54 = vadd.f32 %v4008_v58, %v1704_v59  ;;  %v5367_v61 = vadd.f32 %v4008_v58, %v1705_v45  ;;  %v1720_v63 = vpack.c.bf16 %v5353_v60, %v5353_v60 }
 0x62c   :  { %v1721_v0 = vpack.c.bf16 %v5355_v47, %v5355_v47  ;;  %v1722_v2 = vpack.c.bf16 %v5357_v49, %v5357_v49  ;;  %v1723_v3 = vpack.c.bf16 %v5359_v51, %v5359_v51  ;;  %v1724_v4 = vpack.c.bf16 %v5361_v52, %v5361_v52 }
 0x62d   :  { %v1725_v6 = vpack.c.bf16 %v5363_v53, %v5363_v53  ;;  %v1726_v9 = vpack.c.bf16 %v5365_v54, %v5365_v54  ;;  %v2231_v13 = vpack.c.bf16 %v5328_v10, %v5328_v10  ;;  %v2246_v31 = vunpack.c.l.b16 %v2230_v19 }
 0x62e   :  { %v1727_v32 = vpack.c.bf16 %v5367_v61, %v5367_v61  ;;  %v1743_v20 = vunpack.c.l.b16 %v1721_v0  ;;  %v1744_v33 = vunpack.c.l.b16 %v1722_v2  ;;  %v1745_v23 = vunpack.c.l.b16 %v1723_v3 }
 0x62f   :  { %v1746_v5 = vunpack.c.l.b16 %v1724_v4  ;;  %v2232_v21 = vpack.c.bf16 %v5332_v12, %v5332_v12  ;;  %v2254_v24 = vsel %vm276_vm3, %v2253_v30, %v2252_v22  ;;  %v2255_v27 = vrot.slane %v5336_v14, 4 }
 0x630   :  { %v1742_v58 = vunpack.c.l.b16 %v1720_v63  ;;  %v1747_v28 = vunpack.c.l.b16 %v1725_v6  ;;  %v1750_v36 = vrot.slane %v1743_v20, 7  ;;  %v1752_v37 = vrot.slane %v1744_v33, 6  ;;  %v4642_v20 = vld [vmem:[%s6117_s2 + $0x8] sm:$0xff]   ;;  %v4643_v33 = vld [vmem:[%s6117_s2 + $0x10] sm:$0xff]  }
 0x631   :  { %v1748_v38 = vunpack.c.l.b16 %v1726_v9  ;;  %v2247_v19 = vunpack.c.l.b16 %v2231_v13  ;;  %v1749_v15 = vunpack.c.l.b16 %v1727_v32  ;;  %v1754_v41 = vrot.slane %v1745_v23, 5  ;;  %v4641_v13 = vld [vmem:[%s6117_s2] sm:$0xff]   ;;  %v4644_v23 = vld [vmem:[%s6117_s2 + $0x18] sm:$0xff]  }
 0x632   :  { %v1751_v40 = vsel %vm270_vm1, %v1750_v36, %v1742_v58  ;;  %v2257_v42 = vrot.slane %v2246_v31, 3  ;;  %v1756_v44 = vrot.slane %v1746_v5, 4  ;;  %v2256_v8 = vsel %vm279_vm4, %v2255_v27, %v2254_v24  ;;  %v4645_v5 = vld [vmem:[%s6117_s2 + $0x30] sm:$0xff]   ;;  %v4648_v27 = vld [vmem:[%s6117_s2 + $0x58] sm:$0xff]  }
 0x633   :  { %v1753_v43 = vsel %vm273_vm2, %v1752_v37, %v1751_v40  ;;  %v1758_v30 = vrot.slane %v1747_v28, 3  ;;  %v2248_v14 = vunpack.c.l.b16 %v2232_v21  ;;  %v1760_v17 = vrot.slane %v1748_v38, 2  ;;  %v4646_v21 = vld [vmem:[%s6117_s2 + $0x38] sm:$0xff]   ;;  %v4647_v24 = vld [vmem:[%s6117_s2 + $0x50] sm:$0xff]  }
 0x634   :  { %v1755_v22 = vsel %vm276_vm3, %v1754_v41, %v1753_v43  ;;  %v2259_v59 = vrot.slane %v2247_v19, 2  ;;  %v1762_v63 = vrot.slane %v1749_v15, 1  ;;  %v2258_v0 = vsel %vm282_vm5, %v2257_v42, %v2256_v8  ;;  %v4649_v58 = vld [vmem:[%s6117_s2 + $0x70] sm:$0xff]   ;;  %v4650_v28 = vld [vmem:[%s6117_s2 + $0x78] sm:$0xff]   ;;  %v4009_v41 = vld [vmem:[%s6122_s7] ss:$0 sm:$0xff] }
 0x635   :  { %v1757_v56 = vsel %vm279_vm4, %v1756_v44, %v1755_v22  ;;  %v2261_v4 = vrot.slane %v2248_v14, 1  ;;  %v4651_v36 = vld [vmem:[%s6117_s2 + $0x90] sm:$0xff]   ;;  %v4652_v37 = vld [vmem:[%s6117_s2 + $0x98] sm:$0xff]  }
 0x636   :  { %v1759_v45 = vsel %vm282_vm5, %v1758_v30, %v1757_v56  ;;  %v2260_v9 = vsel %vm285_vm6, %v2259_v59, %v2258_v0  ;;  %v4653_v38 = vld [vmem:[%s6117_s2 + $0xb0] sm:$0xff]   ;;  %v4654_v19 = vld [vmem:[%s6117_s2 + $0xb8] sm:$0xff]   ;;  %v4655_v56 = vld [vmem:[%s6117_s2 + $0x20] sm:$0xff]  }
 0x637   :  { %v1761_v2 = vsel %vm285_vm6, %v1760_v17, %v1759_v45  ;;  %v2262_v31 = vsel %vm288_vm7, %v2261_v4, %v2260_v9  ;;  %v5494_v15 = vld [vmem:[%s6123_s8 + $0x10] sm:$0xff]   ;;  %v5501_v40 = vld [vmem:[%s6123_s8 + $0x18] sm:$0xff]   ;;  %v4656_v0 = vld [vmem:[%s6117_s2 + $0x28] sm:$0xff]  }
 0x638   :  { %v1763_v3 = vsel %vm288_vm7, %v1762_v63, %v1761_v2  ;;  %v5409_v32 = vpack.c.b16 %v2262_v31, %v2262_v31  ;;  %4366 = vmatpush3.bf16.msra.mxu1 %v5494_v15  ;;  %v4657_v2 = vld [vmem:[%s6117_s2 + $0x40] sm:$0xff]  }
 0x639   :  { %v1764_v6 = vpack.c.b16 %v1763_v3, %v1763_v3  ;;  %4367 = vmatprep.subr.bf16.mxu1 %v4703_v1  ;;  %v4659_v31 = vld [vmem:[%s6117_s2 + $0x60] sm:$0xff]  }
 0x63b   :  { %4358 = vmatmul.mubr.msk.bf16.vlgmr.msra.gmra.mrb[44].mxu0 %vm303_vm8, %v1764_v6 }
 0x63c   :  { %4374 = vmatpush3.bf16.msra.mxu0 %v4641_v13  ;;  %4377 = vmatprep.mubr.msk.bf16.mxu0 %vm4704_vm0, %v4703_v1  ;;  %v4658_v13 = vld [vmem:[%s6117_s2 + $0x48] sm:$0xff]  }
 0x63d   :  { %4375 = vmatprep.subr.bf16.mxu0 %v4703_v1  ;;  %4368 = vmatpush3.bf16.msra.mxu1 %v5501_v40 }
 0x63e   :  { %4389 = vmatprep.subr.bf16.mxu1 %v4703_v1 }
 0x640   :  { %4376 = vmatpush3.bf16.msra.mxu0 %v4642_v20 }
 0x641   :  { %4381 = vmatprep.subr.bf16.mxu0 %v4703_v1 }
 0x643   :  { %4378 = vmatmul.mubr.msk.bf16.vlgmr.msra.gmra.mrb[48].mxu0 %vm303_vm8, %v5409_v32 }
 0x644   :  { %4382 = vmatpush3.bf16.msra.mxu0 %v4643_v33  ;;  %4385 = vmatprep.mubr.msk.bf16.mxu0 %vm4704_vm0, %v4703_v1 }
 0x645   :  { %4383 = vmatprep.subr.bf16.mxu0 %v4703_v1 }
 0x648   :  { %4384 = vmatpush3.bf16.msra.mxu0 %v4644_v23 }
 0x649   :  { %4397 = vmatprep.subr.bf16.mxu0 %v4703_v1 }
 0x64b   :  { %4386 = vmatmul.mubr.msk.bf16.vlgmr.msra.gmra.mrb[52].mxu0 %vm303_vm8, %v5409_v32 }
 0x64c   :  { %4398 = vmatpush3.bf16.msra.mxu0 %v4645_v5  ;;  %4401 = vmatprep.mubr.msk.bf16.mxu0 %vm4704_vm0, %v4703_v1 }
 0x64d   :  { %4399 = vmatprep.subr.bf16.mxu0 %v4703_v1 }
 0x650   :  { %4400 = vmatpush3.bf16.msra.mxu0 %v4646_v21  ;;  %v4660_v21 = vld [vmem:[%s6117_s2 + $0x68] sm:$0xff]  }
 0x651   :  { %4413 = vmatprep.subr.bf16.mxu0 %v4703_v1 }
 0x653   :  { %4402 = vmatmul.mubr.msk.bf16.vlgmr.msra.gmra.mrb[56].mxu0 %vm303_vm8, %v5409_v32 }
 0x654   :  { %4414 = vmatpush3.bf16.msra.mxu0 %v4647_v24  ;;  %4417 = vmatprep.mubr.msk.bf16.mxu0 %vm4704_vm0, %v4703_v1 }
 0x655   :  { %4415 = vmatprep.subr.bf16.mxu0 %v4703_v1 }
 0x658   :  { %4416 = vmatpush3.bf16.msra.mxu0 %v4648_v27  ;;  %v4661_v27 = vld [vmem:[%s6117_s2 + $0x80] sm:$0xff]  }
 0x659   :  { %4429 = vmatprep.subr.bf16.mxu0 %v4703_v1 }
 0x65b   :  { %4418 = vmatmul.mubr.msk.bf16.vlgmr.msra.gmra.mrb[60].mxu0 %vm303_vm8, %v5409_v32 }
 0x65c   :  { %4430 = vmatpush3.bf16.msra.mxu0 %v4649_v58  ;;  %4433 = vmatprep.mubr.msk.bf16.mxu0 %vm4704_vm0, %v4703_v1  ;;  %v4662_v58 = vld [vmem:[%s6118_s3 + $0x1] ss:$0 sm:$0xff] }
 0x65d   :  { %4431 = vmatprep.subr.bf16.mxu0 %v4703_v1 }
 0x660   :  { %4432 = vmatpush3.bf16.msra.mxu0 %v4650_v28 }
 0x661   :  { %4445 = vmatprep.subr.bf16.mxu0 %v4703_v1 }
 0x663   :  { %4434 = vmatmul.mubr.msk.bf16.vlgmr.msra.gmra.mrb[64].mxu0 %vm303_vm8, %v5409_v32 }
 0x664   :  { %4446 = vmatpush3.bf16.msra.mxu0 %v4651_v36  ;;  %4449 = vmatprep.mubr.msk.bf16.mxu0 %vm4704_vm0, %v4703_v1  ;;  %v4663_v36 = vld [vmem:[%s6118_s3 + $0x5] ss:$0 sm:$0xff] }
 0x665   :  { %4447 = vmatprep.subr.bf16.mxu0 %v4703_v1 }
 0x668   :  { %4448 = vmatpush3.bf16.msra.mxu0 %v4652_v37 }
 0x669   :  { %4461 = vmatprep.subr.bf16.mxu0 %v4703_v1 }
 0x66b   :  { %4450 = vmatmul.mubr.msk.bf16.vlgmr.msra.gmra.mrb[68].mxu0 %vm303_vm8, %v5409_v32 }
 0x66c   :  { %4462 = vmatpush3.bf16.msra.mxu0 %v4653_v38  ;;  %4465 = vmatprep.mubr.msk.bf16.mxu0 %vm4704_vm0, %v4703_v1 }
 0x66d   :  { %4463 = vmatprep.subr.bf16.mxu0 %v4703_v1 }
 0x670   :  { %4464 = vmatpush3.bf16.msra.mxu0 %v4654_v19 }
 0x671   :  { %4475 = vmatprep.subr.bf16.mxu0 %v4703_v1 }
 0x673   :  { %4466 = vmatmul.mubr.msk.bf16.vlgmr.msra.gmra.mrb[72].mxu0 %vm303_vm8, %v5409_v32 }
 0x674   :  { %4477 = vmatprep.mubr.msk.bf16.mxu0 %vm4704_vm0, %v4703_v1 }
 0x70e   :  { %v1814_v42 = vpop.f32.mrb[44].mxu0 }
 0x70f   :  { %v1815_v43 = vadd.f32 %v4009_v41, %v1814_v42  ;;  %v4359_v44 = vpop.f32.mrb[45].mxu0 }
 0x710   :  { %v1817_v8 = vpop.f32.mrb[46].mxu0 }
 0x711   :  { %v1820_v22 = vmax.f32 %v1815_v43, 0.0  ;;  %v4360_v30 = vpop.f32.mrb[47].mxu0  ;;  %v4664_v43 = vld [vmem:[%s6117_s2 + $0x88] sm:$0xff]  }
 0x712   :  { %v4665_v30 = vld [vmem:[%s6117_s2 + $0xa0] sm:$0xff]  }
 0x713   :  { %v1821_v14 = vpack.c.bf16 %v1820_v22, %v1820_v22 }
 0x715   :  { %4370 = vmatmul.mubr.msk.bf16.vlgmr.msra.gmra.mrb[52].mxu1 %vm1852_vm11, %v1821_v14 }
 0x716   :  { %4390 = vmatpush3.bf16.msra.mxu1 %v4655_v56  ;;  %4393 = vmatprep.mubr.msk.bf16.mxu1 %vm4704_vm0, %v4703_v1  ;;  %v5514_v17 = vpop.f32.mrb[48].mxu0 }
 0x717   :  { %4391 = vmatprep.subr.bf16.mxu1 %v4703_v1  ;;  %v4379_v59 = vpop.f32.mrb[49].mxu0 }
 0x718   :  { %v2304_v45 = vpop.f32.mrb[50].mxu0  ;;  %v4666_v59 = vld [vmem:[%s6118_s3 + $0x7] ss:$0 sm:$0xff] }
 0x719   :  { %v4380_v63 = vpop.f32.mrb[51].mxu0 }
 0x71a   :  { %4392 = vmatpush3.bf16.msra.mxu1 %v4656_v0 }
 0x71b   :  { %4405 = vmatprep.subr.bf16.mxu1 %v4703_v1 }
 0x71d   :  { %4394 = vmatmul.mubr.msk.bf16.vlgmr.msra.gmra.mrb[56].mxu1 %vm303_vm8, %v5409_v32 }
 0x71e   :  { %4406 = vmatpush3.bf16.msra.mxu1 %v4657_v2  ;;  %4409 = vmatprep.mubr.msk.bf16.mxu1 %vm4704_vm0, %v4703_v1  ;;  %v2341_v3 = vpop.f32.mrb[52].mxu0 }
 0x71f   :  { %4407 = vmatprep.subr.bf16.mxu1 %v4703_v1  ;;  %v4387_v4 = vpop.f32.mrb[53].mxu0  ;;  %v2342_v28 = vadd.f32 %v4662_v58, %v2341_v3 }
 0x720   :  { %v2344_v6 = vpop.f32.mrb[54].mxu0  ;;  %v4667_v4 = vld [vmem:[%s6117_s2 + $0xa8] sm:$0xff]  }
 0x721   :  { %v4388_v9 = vpop.f32.mrb[55].mxu0  ;;  %v2748_v44 = vmul.f32 0.35355338, %v2342_v28 }
 0x722   :  { %4408 = vmatpush3.bf16.msra.mxu1 %v4658_v13 }
 0x723   :  { %4421 = vmatprep.subr.bf16.mxu1 %v4703_v1  ;;  %v2752_v14 = vpack.c.bf16 %v2748_v44, %v2748_v44  ;;  %v4668_v44 = vld [vmem:[%s6118_s3 + $0x4] ss:$0 sm:$0xff] }
 0x725   :  { %4410 = vmatmul.mubr.msk.bf16.vlgmr.msra.gmra.mrb[60].mxu1 %vm303_vm8, %v5409_v32 }
 0x726   :  { %4422 = vmatpush3.bf16.msra.mxu1 %v4659_v31  ;;  %v2421_v20 = vpop.f32.mrb[56].mxu0  ;;  %4425 = vmatprep.mubr.msk.bf16.mxu1 %vm4704_vm0, %v4703_v1 }
 0x727   :  { %4423 = vmatprep.subr.bf16.mxu1 %v4703_v1  ;;  %v4403_v33 = vpop.f32.mrb[57].mxu0  ;;  %v2422_v56 = vadd.f32 %v5075_v46, %v2421_v20 }
 0x728   :  { %v2424_v23 = vpop.f32.mrb[58].mxu0 }
 0x729   :  { %v4404_v5 = vpop.f32.mrb[59].mxu0  ;;  %v2750_v6 = vmul.f32 0.35355338, %v2422_v56 }
 0x72a   :  { %4424 = vmatpush3.bf16.msra.mxu1 %v4660_v21 }
 0x72b   :  { %4437 = vmatprep.subr.bf16.mxu1 %v4703_v1  ;;  %v2754_v46 = vpack.c.bf16 %v2750_v6, %v2750_v6 }
 0x72d   :  { %4426 = vmatmul.mubr.msk.bf16.vlgmr.msra.gmra.mrb[64].mxu1 %vm303_vm8, %v5409_v32 }
 0x72e   :  { %v2501_v24 = vpop.f32.mrb[60].mxu0  ;;  %4438 = vmatpush3.bf16.msra.mxu1 %v4661_v27  ;;  %4441 = vmatprep.mubr.msk.bf16.mxu1 %vm4704_vm0, %v4703_v1 }
 0x72f   :  { %v2502_v37 = vadd.f32 %v4663_v36, %v2501_v24  ;;  %v4419_v38 = vpop.f32.mrb[61].mxu0  ;;  %4439 = vmatprep.subr.bf16.mxu1 %v4703_v1 }
 0x730   :  { %v2504_v19 = vpop.f32.mrb[62].mxu0 }
 0x731   :  { %v2756_v41 = vpack.c.bf16 %v2502_v37, %v2502_v37  ;;  %v4420_v42 = vpop.f32.mrb[63].mxu0 }
 0x732   :  { %4440 = vmatpush3.bf16.msra.mxu1 %v4664_v43 }
 0x733   :  { %v2809_v8 = vsel %vm931_vm9, %v2756_v41, 0  ;;  %4453 = vmatprep.subr.bf16.mxu1 %v4703_v1 }
 0x734   :  { %4476 = vmatpush3.bf16.xpose.msra.mxu0 %v2809_v8 }
 0x735   :  { %4487 = vmatprep.subr.bf16.mxu0 %v4703_v1  ;;  %4442 = vmatmul.mubr.msk.bf16.vlgmr.msra.gmra.mrb[68].mxu1 %vm303_vm8, %v5409_v32 }
 0x736   :  { %v2581_v22 = vpop.f32.mrb[64].mxu0  ;;  %4454 = vmatpush3.bf16.msra.mxu1 %v4665_v30  ;;  %4457 = vmatprep.mubr.msk.bf16.mxu1 %vm4704_vm0, %v4703_v1 }
 0x737   :  { %v2582_v45 = vadd.f32 %v4666_v59, %v2581_v22  ;;  %4455 = vmatprep.subr.bf16.mxu1 %v4703_v1  ;;  %v4435_v63 = vpop.f32.mrb[65].mxu0 }
 0x738   :  { %v2584_v0 = vpop.f32.mrb[66].mxu0 }
 0x739   :  { %v2758_v2 = vpack.c.bf16 %v2582_v45, %v2582_v45  ;;  %v4436_v3 = vpop.f32.mrb[67].mxu0 }
 0x73a   :  { %4456 = vmatpush3.bf16.msra.mxu1 %v4667_v4  ;;  %v4670_v3 = vld [vmem:[%s6118_s3 + $0x6] ss:$0 sm:$0xff] }
 0x73b   :  { %v2901_v9 = vsel %vm931_vm9, %v2758_v2, 0  ;;  %4478 = vmatmul.mubr.msk.bf16.vlgmr.msra.gmra.mrb[76].mxu0 %vm931_vm9, %v2752_v14  ;;  %4469 = vmatprep.subr.bf16.mxu1 %v4703_v1  ;;  %v4669_v14 = vld [vmem:[%s6118_s3] ss:$0 sm:$0xff] }
 0x73c   :  { %4488 = vmatpush3.bf16.xpose.msra.mxu0 %v2901_v9  ;;  %4489 = vmatprep.mubr.msk.bf16.mxu0 %vm4704_vm0, %v4703_v1  ;;  %v2302_v56 = vadd.f32 %v4669_v14, %v5514_v17  ;;  %v4671_v17 = vld [vmem:[%s6118_s3 + $0x2] ss:$0 sm:$0xff] }
 0x73d   :  { %4458 = vmatmul.mubr.msk.bf16.vlgmr.msra.gmra.mrb[72].mxu1 %vm303_vm8, %v5409_v32  ;;  %4499 = vmatprep.subr.bf16.mxu0 %v4703_v1 }
 0x73e   :  { %4471 = vmatprep.mubr.msk.bf16.mxu1 %vm4704_vm0, %v4703_v1  ;;  %v2661_v13 = vpop.f32.mrb[68].mxu0  ;;  %v2747_v0 = vmul.f32 0.35355338, %v2302_v56 }
 0x73f   :  { %v2662_v31 = vadd.f32 %v5092_v62, %v2661_v13  ;;  %v4451_v20 = vpop.f32.mrb[69].mxu0 }
 0x740   :  { %v2664_v33 = vpop.f32.mrb[70].mxu0 }
 0x741   :  { %v2992_v23 = vpack.c.bf16 %v2662_v31, %v2662_v31  ;;  %v4452_v5 = vpop.f32.mrb[71].mxu0 }
 0x743   :  { %4490 = vmatmul.mubr.msk.bf16.vlgmr.msra.gmra.mrb[80].mxu0 %vm931_vm9, %v2754_v46  ;;  %v3045_v32 = vsel %vm1171_vm10, %v2992_v23, 0  ;;  %v2751_v46 = vpack.c.bf16 %v2747_v0, %v2747_v0 }
 0x744   :  { %4501 = vmatprep.mubr.msk.bf16.mxu0 %vm4704_vm0, %v4703_v1  ;;  %4500 = vmatpush3.bf16.msra.mxu0 %v3045_v32 }
 0x745   :  { %4511 = vmatprep.subr.bf16.mxu0 %v4703_v1 }
 0x746   :  { %v5594_v21 = vpop.f32.mrb[72].mxu0 }
 0x747   :  { %v4467_v24 = vpop.f32.mrb[73].mxu0 }
 0x748   :  { %v2744_v27 = vpop.f32.mrb[74].mxu0 }
 0x749   :  { %v4468_v58 = vpop.f32.mrb[75].mxu0 }
 0x7e8   :  { %v5598_v28 = vpop.f32.mrb[52].mxu1 }
 0x7e9   :  { %v4371_v36 = vpop.f32.mrb[53].mxu1 }
 0x7ea   :  { %v1893_v37 = vpop.f32.mrb[54].mxu1 }
 0x7eb   :  { %v4372_v38 = vpop.f32.mrb[55].mxu1 }
 0x7f0   :  { %v2381_v62 = vpop.f32.mrb[56].mxu1 }
 0x7f1   :  { %v4395_v19 = vpop.f32.mrb[57].mxu1  ;;  %v2382_v13 = vadd.f32 %v4671_v17, %v2381_v62 }
 0x7f2   :  { %v2384_v41 = vpop.f32.mrb[58].mxu1 }
 0x7f3   :  { %v4396_v42 = vpop.f32.mrb[59].mxu1  ;;  %v2749_v23 = vmul.f32 0.35355338, %v2382_v13 }
 0x7f5   :  { %v2753_v5 = vpack.c.bf16 %v2749_v23, %v2749_v23 }
 0x7f8   :  { %v2461_v43 = vpop.f32.mrb[60].mxu1 }
 0x7f9   :  { %v2462_v8 = vadd.f32 %v4668_v44, %v2461_v43  ;;  %v4411_v22 = vpop.f32.mrb[61].mxu1  ;;  %v4672_v43 = vld [vmem:[%s6118_s3 + $0x8] ss:$0 sm:$0xff] }
 0x7fa   :  { %v2464_v30 = vpop.f32.mrb[62].mxu1 }
 0x7fb   :  { %v2755_v59 = vpack.c.bf16 %v2462_v8, %v2462_v8  ;;  %v4412_v45 = vpop.f32.mrb[63].mxu1 }
 0x7fd   :  { %v2763_v63 = vsel %vm931_vm9, %v2755_v59, 0 }
 0x7fe   :  { %4470 = vmatpush3.bf16.xpose.msra.mxu1 %v2763_v63 }
 0x7ff   :  { %4481 = vmatprep.subr.bf16.mxu1 %v4703_v1 }
 0x800   :  { %v2541_v2 = vpop.f32.mrb[64].mxu1 }
 0x801   :  { %v2542_v4 = vadd.f32 %v4670_v3, %v2541_v2  ;;  %v4427_v6 = vpop.f32.mrb[65].mxu1 }
 0x802   :  { %v2544_v9 = vpop.f32.mrb[66].mxu1 }
 0x803   :  { %v2757_v31 = vpack.c.bf16 %v2542_v4, %v2542_v4  ;;  %v4428_v20 = vpop.f32.mrb[67].mxu1 }
 0x805   :  { %v2855_v33 = vsel %vm931_vm9, %v2757_v31, 0  ;;  %4472 = vmatmul.mubr.msk.bf16.vlgmr.msra.gmra.mrb[76].mxu1 %vm931_vm9, %v2751_v46 }
 0x806   :  { %4482 = vmatpush3.bf16.xpose.msra.mxu1 %v2855_v33  ;;  %4483 = vmatprep.mubr.msk.bf16.mxu1 %vm4704_vm0, %v4703_v1 }
 0x807   :  { %4493 = vmatprep.subr.bf16.mxu1 %v4703_v1 }
 0x808   :  { %v2621_v42 = vpop.f32.mrb[68].mxu1 }
 0x809   :  { %v2622_v44 = vadd.f32 %v4672_v43, %v2621_v42  ;;  %v4443_v8 = vpop.f32.mrb[69].mxu1 }
 0x80a   :  { %v2624_v22 = vpop.f32.mrb[70].mxu1 }
 0x80b   :  { %v2991_v30 = vpack.c.bf16 %v2622_v44, %v2622_v44  ;;  %v4444_v14 = vpop.f32.mrb[71].mxu1 }
 0x80d   :  { %4484 = vmatmul.mubr.msk.bf16.vlgmr.msra.gmra.mrb[80].mxu1 %vm931_vm9, %v2753_v5  ;;  %v2999_v59 = vsel %vm1171_vm10, %v2991_v30, 0 }
 0x80e   :  { %v2845_v32 = vpop.f32.mrb[76].mxu0  ;;  %4495 = vmatprep.mubr.msk.bf16.mxu1 %vm4704_vm0, %v4703_v1  ;;  %4494 = vmatpush3.bf16.msra.mxu1 %v2999_v59 }
 0x80f   :  { %v2946_v24 = vsel %vm931_vm9, %v2845_v32, -inf  ;;  %v4479_v27 = vpop.f32.mrb[77].mxu0  ;;  %4505 = vmatprep.subr.bf16.mxu1 %v4703_v1 }
 0x810   :  { %2947 = vmax.xlane.f32.xlu1 %v2946_v24  ;;  %v2848_v58 = vpop.f32.mrb[78].mxu0  ;;  %v5628_v56 = vpop.f32.mrb[72].mxu1 }
 0x811   :  { %v4480_v36 = vpop.f32.mrb[79].mxu0  ;;  %v4459_v45 = vpop.f32.mrb[73].mxu1 }
 0x812   :  { %v2704_v63 = vpop.f32.mrb[74].mxu1 }
 0x813   :  { %v4460_v0 = vpop.f32.mrb[75].mxu1 }
 0x816   :  { %v2937_v37 = vpop.f32.mrb[80].mxu0 }
 0x817   :  { %v2952_v38 = vsel %vm931_vm9, %v2937_v37, -inf  ;;  %v4491_v62 = vpop.f32.mrb[81].mxu0 }
 0x818   :  { %2953 = vmax.xlane.f32.xlu1 %v2952_v38  ;;  %v2940_v19 = vpop.f32.mrb[82].mxu0 }
 0x819   :  { %v4492_v41 = vpop.f32.mrb[83].mxu0  ;;  %v4673_v19 = vld [vmem:[%s6118_s3 + $0xb] ss:$0 sm:$0xff] }
 0x81a   :  { %v2742_v41 = vadd.f32 %v4673_v19, %v5594_v21 }
 0x81c   :  { %v2994_v44 = vpack.c.bf16 %v2742_v41, %v2742_v41 }
 0x81e   :  { %v3137_v30 = vsel %vm1171_vm10, %v2994_v44, 0 }
 0x89d   :  { %v2948_v2 = vpop.xlane.xlu1 %2947 }
 0x89e   :  { %v2956_v3 = vsub.f32 %v2845_v32, %v2948_v2 }
 0x8a0   :  { %v2961_v4 = vmul.f32 1.442695, %v2956_v3 }
 0x8a2   :  { %4614 = vpow2.f32 %v2961_v4 }
 0x8a5   :  { %v2954_v6 = vpop.xlane.xlu1 %2953 }
 0x8a6   :  { %v2958_v9 = vsub.f32 %v2937_v37, %v2954_v6 }
 0x8a8   :  { %v2965_v46 = vmul.f32 1.442695, %v2958_v9 }
 0x8aa   :  { %4616 = vpow2.f32 %v2965_v46 }
 0x8ac   :  { %v4615_v17 = vpop.eup %4614 }
 0x8ad   :  { %v2970_v13 = vsel %vm931_vm9, %v4615_v17, 0.0 }
 0x8ae   :  { %2971 = vadd.xlane.f32.xlu1 %v2970_v13  ;;  %v4674_v13 = vld [vmem:[%s6118_s3 + $0xa] ss:$0 sm:$0xff] }
 0x8b4   :  { %v4617_v31 = vpop.eup %4616 }
 0x8b5   :  { %v2976_v20 = vsel %vm931_vm9, %v4617_v31, 0.0 }
 0x8b6   :  { %2977 = vadd.xlane.f32.xlu1 %v2976_v20 }
 0x8d8   :  { %v2799_v33 = vpop.f32.mrb[76].mxu1 }
 0x8d9   :  { %v4473_v23 = vpop.f32.mrb[77].mxu1  ;;  %v2943_v5 = vsel %vm931_vm9, %v2799_v33, -inf }
 0x8da   :  { %2944 = vmax.xlane.f32.xlu0 %v2943_v5  ;;  %v2802_v32 = vpop.f32.mrb[78].mxu1 }
 0x8db   :  { %v4474_v24 = vpop.f32.mrb[79].mxu1 }
 0x8e0   :  { %v2891_v27 = vpop.f32.mrb[80].mxu1 }
 0x8e1   :  { %v4485_v58 = vpop.f32.mrb[81].mxu1  ;;  %v2949_v36 = vsel %vm931_vm9, %v2891_v27, -inf }
 0x8e2   :  { %2950 = vmax.xlane.f32.xlu0 %v2949_v36  ;;  %v2894_v37 = vpop.f32.mrb[82].mxu1 }
 0x8e3   :  { %v4486_v38 = vpop.f32.mrb[83].mxu1 }
 0x93b   :  { %v2972_v62 = vpop.xlane.xlu1 %2971 }
 0x93c   :  { %4618 = vrcp.f32 %v2972_v62 }
 0x943   :  { %v2978_v42 = vpop.xlane.xlu1 %2977 }
 0x944   :  { %4620 = vrcp.f32 %v2978_v42 }
 0x946   :  { %v4619_v43 = vpop.eup %4618 }
 0x947   :  { %v2982_v8 = vmul.f32 %v4619_v43, %v4615_v17 }
 0x949   :  { %v2988_v22 = vpack.c.bf16 %v2982_v8, %v2982_v8 }
 0x94b   :  { %4502 = vmatmul.mubr.msk.bf16.vlgmr.msra.gmra.mrb[84].mxu0 %vm931_vm9, %v2988_v22 }
 0x94c   :  { %4512 = vmatpush3.bf16.msra.mxu0 %v3137_v30  ;;  %4513 = vmatprep.mubr.msk.bf16.mxu0 %vm4704_vm0, %v4703_v1 }
 0x94d   :  { %4523 = vmatprep.subr.bf16.mxu0 %v4703_v1 }
 0x94e   :  { %v4621_v14 = vpop.eup %4620 }
 0x94f   :  { %v2986_v59 = vmul.f32 %v4621_v14, %v4617_v31  ;;  %v2702_v31 = vadd.f32 %v4674_v13, %v5628_v56 }
 0x951   :  { %v2990_v45 = vpack.c.bf16 %v2986_v59, %v2986_v59  ;;  %v2993_v23 = vpack.c.bf16 %v2702_v31, %v2702_v31 }
 0x953   :  { %4514 = vmatmul.mubr.msk.bf16.vlgmr.msra.gmra.mrb[88].mxu0 %vm931_vm9, %v2990_v45  ;;  %v3091_v24 = vsel %vm1171_vm10, %v2993_v23, 0 }
 0x954   :  { %4524 = vmatpush3.bf16.msra.mxu0 %v5143_v50  ;;  %4525 = vmatprep.mubr.msk.bf16.mxu0 %vm4704_vm0, %v4703_v1 }
 0x955   :  { %4535 = vmatprep.subr.bf16.mxu0 %v4703_v1 }
 0x967   :  { %v2945_v21 = vpop.xlane.xlu0 %2944 }
 0x968   :  { %v2955_v63 = vsub.f32 %v2799_v33, %v2945_v21 }
 0x96a   :  { %v2959_v0 = vmul.f32 1.442695, %v2955_v63 }
 0x96c   :  { %4622 = vpow2.f32 %v2959_v0 }
 0x96f   :  { %v2951_v2 = vpop.xlane.xlu0 %2950 }
 0x970   :  { %v2957_v3 = vsub.f32 %v2891_v27, %v2951_v2 }
 0x972   :  { %v2963_v4 = vmul.f32 1.442695, %v2957_v3 }
 0x974   :  { %4624 = vpow2.f32 %v2963_v4 }
 0x976   :  { %v4623_v6 = vpop.eup %4622 }
 0x977   :  { %v2967_v9 = vsel %vm931_vm9, %v4623_v6, 0.0 }
 0x978   :  { %2968 = vadd.xlane.f32.xlu0 %v2967_v9 }
 0x97e   :  { %v4625_v46 = vpop.eup %4624 }
 0x97f   :  { %v2973_v50 = vsel %vm931_vm9, %v4625_v46, 0.0 }
 0x980   :  { %2974 = vadd.xlane.f32.xlu0 %v2973_v50 }
 0xa05   :  { %v2969_v17 = vpop.xlane.xlu0 %2968 }
 0xa06   :  { %4626 = vrcp.f32 %v2969_v17 }
 0xa0d   :  { %v2975_v20 = vpop.xlane.xlu0 %2974 }
 0xa0e   :  { %4628 = vrcp.f32 %v2975_v20 }
 0xa10   :  { %v4627_v33 = vpop.eup %4626 }
 0xa11   :  { %v2980_v5 = vmul.f32 %v4627_v33, %v4623_v6  ;;  %v5695_v6 = vld [vmem:[%s6124_s9] ss:$0 sm:$0xff] }
 0xa13   :  { %v2987_v32 = vpack.c.bf16 %v2980_v5, %v2980_v5 }
 0xa15   :  { %4496 = vmatmul.mubr.msk.bf16.vlgmr.msra.gmra.mrb[84].mxu1 %vm931_vm9, %v2987_v32 }
 0xa16   :  { %4506 = vmatpush3.bf16.msra.mxu1 %v3091_v24  ;;  %4507 = vmatprep.mubr.msk.bf16.mxu1 %vm4704_vm0, %v4703_v1 }
 0xa17   :  { %4517 = vmatprep.subr.bf16.mxu1 %v4703_v1 }
 0xa18   :  { %v4629_v27 = vpop.eup %4628 }
 0xa19   :  { %v2984_v58 = vmul.f32 %v4629_v27, %v4625_v46 }
 0xa1b   :  { %v2989_v36 = vpack.c.bf16 %v2984_v58, %v2984_v58 }
 0xa1d   :  { %4508 = vmatmul.mubr.msk.bf16.vlgmr.msra.gmra.mrb[88].mxu1 %vm931_vm9, %v2989_v36 }
 0xa1e   :  { %v3081_v56 = vpop.f32.mrb[84].mxu0  ;;  %4518 = vmatpush3.bf16.msra.mxu1 %v5135_v48  ;;  %4519 = vmatprep.mubr.msk.bf16.mxu1 %vm4704_vm0, %v4703_v1 }
 0xa1f   :  { %v3180_v37 = vpack.c.bf16 %v3081_v56, %v3081_v56  ;;  %v4503_v38 = vpop.f32.mrb[85].mxu0  ;;  %4529 = vmatprep.subr.bf16.mxu1 %v4703_v1 }
 0xa20   :  { %v3084_v62 = vpop.f32.mrb[86].mxu0 }
 0xa21   :  { %v4504_v19 = vpop.f32.mrb[87].mxu0  ;;  %4526 = vmatmul.mubr.msk.bf16.vlgmr.msra.gmra.mrb[92].mxu0 %vm931_vm9, %v3180_v37 }
 0xa22   :  { %4536 = vmatpush3.bf16.msra.mxu0 %v5165_v7  ;;  %4537 = vmatprep.mubr.msk.bf16.mxu0 %vm4704_vm0, %v4703_v1 }
 0xa23   :  { %4549 = vmatprep.subr.bf16.mxu0 %v4703_v1 }
 0xa26   :  { %v3173_v41 = vpop.f32.mrb[88].mxu0 }
 0xa27   :  { %v3182_v48 = vpack.c.bf16 %v3173_v41, %v3173_v41  ;;  %v4515_v42 = vpop.f32.mrb[89].mxu0 }
 0xa28   :  { %v3176_v43 = vpop.f32.mrb[90].mxu0 }
 0xa29   :  { %v4516_v44 = vpop.f32.mrb[91].mxu0  ;;  %4538 = vmatmul.mubr.msk.bf16.vlgmr.msra.gmra.mrb[96].mxu0 %vm931_vm9, %v3182_v48 }
 0xa2a   :  { %4550 = vmatpush3.bf16.msra.mxu0 %v5255_v26  ;;  %4557 = vmatprep.mubr.msk.bf16.mxu0 %vm4704_vm0, %v4703_v1 }
 0xa2b   :  { %4551 = vmatprep.subr.bf16.mxu0 %v4703_v1 }
 0xa2e   :  { %4552 = vmatpush3.bf16.msra.mxu0 %v5261_v11 }
 0xa2f   :  { %4553 = vmatprep.subr.bf16.mxu0 %v4703_v1 }
 0xa32   :  { %4554 = vmatpush3.bf16.msra.mxu0 %v5494_v15 }
 0xa33   :  { %4555 = vmatprep.subr.bf16.mxu0 %v4703_v1 }
 0xa36   :  { %4556 = vmatpush3.bf16.msra.mxu0 %v5501_v40 }
 0xae8   :  { %v3035_v7 = vpop.f32.mrb[84].mxu1 }
 0xae9   :  { %v3179_v8 = vpack.c.bf16 %v3035_v7, %v3035_v7  ;;  %v4497_v22 = vpop.f32.mrb[85].mxu1 }
 0xaea   :  { %v3038_v30 = vpop.f32.mrb[86].mxu1 }
 0xaeb   :  { %v4498_v26 = vpop.f32.mrb[87].mxu1  ;;  %4520 = vmatmul.mubr.msk.bf16.vlgmr.msra.gmra.mrb[92].mxu1 %vm931_vm9, %v3179_v8 }
 0xaec   :  { %4530 = vmatpush3.bf16.msra.mxu1 %v5151_v55  ;;  %4531 = vmatprep.mubr.msk.bf16.mxu1 %vm4704_vm0, %v4703_v1 }
 0xaed   :  { %4541 = vmatprep.subr.bf16.mxu1 %v4703_v1 }
 0xaf0   :  { %v3127_v11 = vpop.f32.mrb[88].mxu1 }
 0xaf1   :  { %v3181_v15 = vpack.c.bf16 %v3127_v11, %v3127_v11  ;;  %v4509_v14 = vpop.f32.mrb[89].mxu1 }
 0xaf2   :  { %v3130_v59 = vpop.f32.mrb[90].mxu1 }
 0xaf3   :  { %v4510_v45 = vpop.f32.mrb[91].mxu1  ;;  %4532 = vmatmul.mubr.msk.bf16.vlgmr.msra.gmra.mrb[96].mxu1 %vm931_vm9, %v3181_v15 }
 0xaf4   :  { %v3263_v40 = vpop.f32.mrb[92].mxu0  ;;  %4542 = vmatpush3.bf16.msra.mxu1 %v5241_v25  ;;  %4545 = vmatprep.mubr.msk.bf16.mxu1 %vm4704_vm0, %v4703_v1  ;;  %v5699_v25 = vadd.f32 %v5695_v6, %v5598_v28 }
 0xaf5   :  { %v4527_v21 = vpop.f32.mrb[93].mxu0  ;;  %4543 = vmatprep.subr.bf16.mxu1 %v4703_v1  ;;  %v3356_v46 = vsel %vm303_vm8, %v3263_v40, 0.0 }
 0xaf6   :  { %v3266_v55 = vpop.f32.mrb[94].mxu0  ;;  %v1897_v9 = vrot.slane %v5699_v25, 1  ;;  %v1898_v31 = vrot.slane %v5699_v25, 2  ;;  %v1899_v28 = vrot.slane %v5699_v25, 3  ;;  %v5716_v58 = vadd.f32 %v5699_v25, %v5353_v60  ;;  %v4675_v60 = vld [vmem:[%s6120_s5] ss:$0 sm:$0xff] }
 0xaf7   :  { %v4528_v63 = vpop.f32.mrb[95].mxu0  ;;  %v1900_v38 = vrot.slane %v5699_v25, 4  ;;  %v1901_v48 = vrot.slane %v5699_v25, 5  ;;  %v1902_v44 = vrot.slane %v5699_v25, 6 }
 0xaf8   :  { %4544 = vmatpush3.bf16.msra.mxu1 %v5247_v34  ;;  %v5706_v33 = vadd.f32 %v1897_v9, %v5355_v47  ;;  %v5709_v23 = vadd.f32 %v1898_v31, %v5357_v49  ;;  %v5722_v62 = vadd.f32 %v1899_v28, %v5359_v51  ;;  %v1903_v63 = vrot.slane %v5699_v25, 7 }
 0xaf9   :  { %v5733_v7 = vadd.f32 %v1900_v38, %v5361_v52  ;;  %v5737_v14 = vadd.f32 %v1901_v48, %v5363_v53 }
 0xafa   :  { %v1928_v5 = vrot.slane %v5706_v33, 7  ;;  %v1930_v47 = vrot.slane %v5709_v23, 6  ;;  %v1932_v51 = vrot.slane %v5722_v62, 5 }
 0xafc   :  { %v3349_v0 = vpop.f32.mrb[96].mxu0  ;;  %v1929_v19 = vsel %vm270_vm1, %v1928_v5, %v5716_v58 }
 0xafd   :  { %v4539_v2 = vpop.f32.mrb[97].mxu0  ;;  %v3360_v37 = vsel %vm303_vm8, %v3349_v0, 0.0  ;;  %v1931_v43 = vsel %vm273_vm2, %v1930_v47, %v1929_v19  ;;  %v1934_v0 = vrot.slane %v5733_v7, 4 }
 0xafe   :  { %v3352_v3 = vpop.f32.mrb[98].mxu0  ;;  %v1933_v59 = vsel %vm276_vm3, %v1932_v51, %v1931_v43 }
 0xaff   :  { %v4540_v4 = vpop.f32.mrb[99].mxu0 }
 0xbbe   :  { %v3220_v1 = vpop.f32.mrb[92].mxu1 }
 0xbbf   :  { %v3355_v34 = vsel %vm303_vm8, %v3220_v1, 0.0  ;;  %v4521_v50 = vpop.f32.mrb[93].mxu1  ;;  %v1936_v1 = vrot.slane %v5737_v14, 3 }
 0xbc0   :  { %v3357_v17 = vadd.f32 %v3356_v46, %v3355_v34  ;;  %v3223_v13 = vpop.f32.mrb[94].mxu1 }
 0xbc1   :  { %v4522_v20 = vpop.f32.mrb[95].mxu1 }
 0xbc6   :  { %v3306_v32 = vpop.f32.mrb[96].mxu1 }
 0xbc7   :  { %v3358_v24 = vsel %vm303_vm8, %v3306_v32, 0.0  ;;  %v4533_v27 = vpop.f32.mrb[97].mxu1 }
 0xbc8   :  { %v3359_v36 = vadd.f32 %v3358_v24, %v3357_v17  ;;  %v3309_v56 = vpop.f32.mrb[98].mxu1 }
 0xbc9   :  { %v4534_v49 = vpop.f32.mrb[99].mxu1 }
 0xbca   :  { %v3361_v41 = vadd.f32 %v3360_v37, %v3359_v36 }
 0xbcc   :  { %v3362_v42 = vadd.f32 %v4675_v60, %v3361_v41 }
 0xbce   :  { %v3364_v8 = vrot.slane %v3362_v42, 1  ;;  %v3365_v22 = vrot.slane %v3362_v42, 2  ;;  %v3366_v30 = vrot.slane %v3362_v42, 3  ;;  %v3367_v26 = vrot.slane %v3362_v42, 4 }
 0xbcf   :  { %v3368_v11 = vrot.slane %v3362_v42, 5  ;;  %v3369_v15 = vrot.slane %v3362_v42, 6  ;;  %v3370_v45 = vrot.slane %v3362_v42, 7  ;;  %v3379_v2 = vadd.f32 %v3362_v42, %v5289_v39 }
 0xbd0   :  { %v3380_v40 = vadd.f32 %v3364_v8, %v5274_v35  ;;  %v3381_v21 = vadd.f32 %v3365_v22, %v5281_v29  ;;  %v3382_v52 = vadd.f32 %v3366_v30, %v5295_v16  ;;  %v3383_v55 = vadd.f32 %v3367_v26, %v5306_v57 }
 0xbd1   :  { %v3384_v53 = vadd.f32 %v3368_v11, %v5321_v18  ;;  %v3385_v9 = vadd.f32 %v3369_v15, %v5328_v10  ;;  %v5750_v35 = vadd.f32 %v1902_v44, %v5365_v54  ;;  %v1935_v29 = vsel %vm279_vm4, %v1934_v0, %v1933_v59 }
 0xbd2   :  { %v3395_v3 = vrot.slane %v3380_v40, 7  ;;  %v3397_v4 = vrot.slane %v3381_v21, 6  ;;  %v3386_v16 = vadd.f32 %v3370_v45, %v5332_v12  ;;  %v3399_v25 = vrot.slane %v3382_v52, 5 }
 0xbd3   :  { %v3401_v46 = vrot.slane %v3383_v55, 4  ;;  %v3403_v34 = vrot.slane %v3384_v53, 3  ;;  %v5759_v10 = vadd.f32 %v1903_v63, %v5367_v61  ;;  %v1937_v54 = vsel %vm282_vm5, %v1936_v1, %v1935_v29 }
 0xbd4   :  { %v3396_v57 = vsel %vm270_vm1, %v3395_v3, %v3379_v2  ;;  %v3405_v17 = vrot.slane %v3385_v9, 2  ;;  %v1938_v12 = vrot.slane %v5750_v35, 2  ;;  %v3407_v31 = vrot.slane %v3386_v16, 1 }
 0xbd5   :  { %v3398_v39 = vsel %vm273_vm2, %v3397_v4, %v3396_v57  ;;  %v1940_v32 = vrot.slane %v5759_v10, 1 }
 0xbd6   :  { %v3400_v18 = vsel %vm276_vm3, %v3399_v25, %v3398_v39  ;;  %v1939_v28 = vsel %vm285_vm6, %v1938_v12, %v1937_v54 }
 0xbd7   :  { %v3402_v50 = vsel %vm279_vm4, %v3401_v46, %v3400_v18  ;;  %v1941_v24 = vsel %vm288_vm7, %v1940_v32, %v1939_v28 }
 0xbd8   :  { %v3404_v13 = vsel %vm282_vm5, %v3403_v34, %v3402_v50  ;;  %v1943_v27 = vsel %vm303_vm8, %v1941_v24, 0.0 }
 0xbd9   :  { %v3406_v20 = vsel %vm285_vm6, %v3405_v17, %v3404_v13 }
 0xbda   :  { %v3408_v5 = vsel %vm288_vm7, %v3407_v31, %v3406_v20 }
 0xbdb   :  { %v3410_v61 = vsel %vm303_vm8, %v3408_v5, 0.0 }
 0xbdc   :  { %3411 = vadd.xlane.f32.xlu0 %v3410_v61 }
 0xbe0   :  { %1944 = vadd.xlane.f32.xlu0 %v1943_v27 }
 0xc69   :  { %v3412_v36 = vpop.xlane.xlu0 %3411 }
 0xc6a   :  { %v3413_v56 = vmul.f32 0.03125, %v3412_v36 }
 0xc6c   :  { %v3415_v47 = vrot.slane %v3413_v56, 1  ;;  %v3416_v37 = vrot.slane %v3413_v56, 2  ;;  %v3417_v49 = vrot.slane %v3413_v56, 3  ;;  %v3418_v38 = vrot.slane %v3413_v56, 4 }
 0xc6d   :  { %v1945_v19 = vpop.xlane.xlu0 %1944  ;;  %v3419_v41 = vrot.slane %v3413_v56, 5  ;;  %v3420_v48 = vrot.slane %v3413_v56, 6  ;;  %v3421_v60 = vrot.slane %v3413_v56, 7  ;;  %v5772_v42 = vsub.f32 %v3379_v2, %v3413_v56 }
 0xc6e   :  { %v1946_v43 = vmul.f32 0.03125, %v1945_v19  ;;  %v5774_v44 = vsub.f32 %v3380_v40, %v3415_v47  ;;  %v5776_v51 = vsub.f32 %v3381_v21, %v3416_v37  ;;  %v5778_v8 = vsub.f32 %v3382_v52, %v3417_v49 }
 0xc6f   :  { %v5780_v22 = vsub.f32 %v3383_v55, %v3418_v38  ;;  %v5782_v30 = vsub.f32 %v3384_v53, %v3419_v41  ;;  %v5784_v26 = vsub.f32 %v3385_v9, %v3420_v48  ;;  %v5786_v11 = vsub.f32 %v3386_v16, %v3421_v60 }
 0xc70   :  { %v3439_v15 = vmul.f32 %v5774_v44, %v5774_v44  ;;  %v3440_v59 = vmul.f32 %v5776_v51, %v5776_v51  ;;  %v3441_v45 = vmul.f32 %v5778_v8, %v5778_v8  ;;  %v3438_v40 = vmul.f32 %v5772_v42, %v5772_v42 }
 0xc71   :  { %v3442_v21 = vmul.f32 %v5780_v22, %v5780_v22  ;;  %v3443_v52 = vmul.f32 %v5782_v30, %v5782_v30  ;;  %v3444_v55 = vmul.f32 %v5784_v26, %v5784_v26  ;;  %v3445_v63 = vmul.f32 %v5786_v11, %v5786_v11 }
 0xc72   :  { %v3454_v0 = vrot.slane %v3439_v15, 7  ;;  %v3456_v2 = vrot.slane %v3440_v59, 6  ;;  %v1948_v53 = vrot.slane %v1946_v43, 1  ;;  %v3458_v3 = vrot.slane %v3441_v45, 5 }
 0xc73   :  { %v3460_v4 = vrot.slane %v3442_v21, 4  ;;  %v3462_v9 = vrot.slane %v3443_v52, 3  ;;  %v3464_v29 = vrot.slane %v3444_v55, 2  ;;  %v1949_v57 = vrot.slane %v1946_v43, 2 }
 0xc74   :  { %v3455_v16 = vsel %vm270_vm1, %v3454_v0, %v3438_v40  ;;  %v1950_v25 = vrot.slane %v1946_v43, 3  ;;  %v1951_v1 = vrot.slane %v1946_v43, 4  ;;  %v1952_v46 = vrot.slane %v1946_v43, 5 }
 0xc75   :  { %v3457_v39 = vsel %vm273_vm2, %v3456_v2, %v3455_v16  ;;  %v1953_v18 = vrot.slane %v1946_v43, 6  ;;  %v1954_v34 = vrot.slane %v1946_v43, 7  ;;  %v5808_v50 = vsub.f32 %v5716_v58, %v1946_v43 }
 0xc76   :  { %v3459_v54 = vsel %vm276_vm3, %v3458_v3, %v3457_v39  ;;  %v5811_v17 = vsub.f32 %v5706_v33, %v1948_v53  ;;  %v5814_v12 = vsub.f32 %v5709_v23, %v1949_v57  ;;  %v5818_v31 = vsub.f32 %v5722_v62, %v1950_v25 }
 0xc77   :  { %v3461_v13 = vsel %vm279_vm4, %v3460_v4, %v3459_v54  ;;  %v5821_v20 = vsub.f32 %v5733_v7, %v1951_v1  ;;  %v5824_v28 = vsub.f32 %v5737_v14, %v1952_v46  ;;  %v3466_v5 = vrot.slane %v3445_v63, 1 }
 0xc78   :  { %v3463_v58 = vsel %vm282_vm5, %v3462_v9, %v3461_v13  ;;  %v5828_v33 = vsub.f32 %v5750_v35, %v1953_v18  ;;  %v5831_v23 = vsub.f32 %v5759_v10, %v1954_v34  ;;  %v1972_v62 = vmul.f32 %v5811_v17, %v5811_v17 }
 0xc79   :  { %v3465_v32 = vsel %vm285_vm6, %v3464_v29, %v3463_v58  ;;  %v1973_v7 = vmul.f32 %v5814_v12, %v5814_v12  ;;  %v1974_v14 = vmul.f32 %v5818_v31, %v5818_v31  ;;  %v1971_v35 = vmul.f32 %v5808_v50, %v5808_v50 }
 0xc7a   :  { %v3467_v61 = vsel %vm288_vm7, %v3466_v5, %v3465_v32  ;;  %v1975_v10 = vmul.f32 %v5821_v20, %v5821_v20  ;;  %v1976_v27 = vmul.f32 %v5824_v28, %v5824_v28  ;;  %v1987_v36 = vrot.slane %v1972_v62, 7  ;;  %v4676_v62 = vld [vmem:[%s6125_s10] ss:$0 sm:$0xff] }
 0xc7b   :  { %v3469_v24 = vsel %vm303_vm8, %v3467_v61, 0.0  ;;  %v1989_v56 = vrot.slane %v1973_v7, 6  ;;  %v1977_v47 = vmul.f32 %v5828_v33, %v5828_v33  ;;  %v1978_v37 = vmul.f32 %v5831_v23, %v5831_v23 }
 0xc7c   :  { %3470 = vadd.xlane.f32.xlu1 %v3469_v24  ;;  %v1988_v49 = vsel %vm270_vm1, %v1987_v36, %v1971_v35  ;;  %v1991_v38 = vrot.slane %v1974_v14, 5  ;;  %v1993_v41 = vrot.slane %v1975_v10, 4  ;;  %v1995_v60 = vrot.slane %v1976_v27, 3 }
 0xc7d   :  { %v1990_v19 = vsel %vm273_vm2, %v1989_v56, %v1988_v49  ;;  %v1997_v15 = vrot.slane %v1977_v47, 2  ;;  %v1999_v45 = vrot.slane %v1978_v37, 1  ;;  %v5895_v49 = vld [vmem:[%s6127_s12] ss:$0 sm:$0xff] }
 0xc7e   :  { %v1992_v48 = vsel %vm276_vm3, %v1991_v38, %v1990_v19 }
 0xc7f   :  { %v1994_v43 = vsel %vm279_vm4, %v1993_v41, %v1992_v48 }
 0xc80   :  { %v1996_v59 = vsel %vm282_vm5, %v1995_v60, %v1994_v43 }
 0xc81   :  { %v1998_v40 = vsel %vm285_vm6, %v1997_v15, %v1996_v59 }
 0xc82   :  { %v2000_v21 = vsel %vm288_vm7, %v1999_v45, %v1998_v40 }
 0xc83   :  { %v2002_v52 = vsel %vm303_vm8, %v2000_v21, 0.0 }
 0xc84   :  { %2003 = vadd.xlane.f32.xlu0 %v2002_v52 }
 0xd09   :  { %v3471_v55 = vpop.xlane.xlu1 %3470 }
 0xd0a   :  { %v3472_v63 = vmul.f32 0.03125, %v3471_v55 }
 0xd0c   :  { %v3473_v0 = vadd.f32 1e-05, %v3472_v63 }
 0xd0e   :  { %4630 = vrsqrt.f32 %v3473_v0 }
 0xd11   :  { %v2004_v2 = vpop.xlane.xlu0 %2003 }
 0xd12   :  { %v2005_v53 = vmul.f32 0.03125, %v2004_v2 }
 0xd14   :  { %v2006_v3 = vadd.f32 1e-05, %v2005_v53 }
 0xd16   :  { %4632 = vrsqrt.f32 %v2006_v3 }
 0xd18   :  { %v4631_v4 = vpop.eup %4630 }
 0xd19   :  { %v3476_v9 = vrot.slane %v4631_v4, 1  ;;  %v3477_v29 = vrot.slane %v4631_v4, 2  ;;  %v3478_v16 = vrot.slane %v4631_v4, 3  ;;  %v3479_v57 = vrot.slane %v4631_v4, 4 }
 0xd1a   :  { %v3480_v25 = vrot.slane %v4631_v4, 5  ;;  %v3481_v1 = vrot.slane %v4631_v4, 6  ;;  %v3482_v39 = vrot.slane %v4631_v4, 7  ;;  %v3491_v46 = vmul.f32 %v4631_v4, %v5772_v42 }
 0xd1b   :  { %v3492_v18 = vmul.f32 %v3476_v9, %v5774_v44  ;;  %v3493_v34 = vmul.f32 %v3477_v29, %v5776_v51  ;;  %v3494_v54 = vmul.f32 %v3478_v16, %v5778_v8  ;;  %v3495_v13 = vmul.f32 %v3479_v57, %v5780_v22  ;;  %v4677_v22 = vld [vmem:[%s6126_s11] ss:$0 sm:$0xff] }
 0xd1c   :  { %v3496_v58 = vmul.f32 %v3480_v25, %v5782_v30  ;;  %v3497_v5 = vmul.f32 %v3481_v1, %v5784_v26  ;;  %v3498_v32 = vmul.f32 %v3482_v39, %v5786_v11  ;;  %v3499_v7 = vmul.f32 %v4676_v62, %v3491_v46 }
 0xd1d   :  { %v3500_v42 = vmul.f32 %v4676_v62, %v3492_v18  ;;  %v3501_v14 = vmul.f32 %v4676_v62, %v3493_v34  ;;  %v3502_v44 = vmul.f32 %v4676_v62, %v3494_v54  ;;  %v3503_v61 = vmul.f32 %v4676_v62, %v3495_v13 }
 0xd1e   :  { %v3504_v51 = vmul.f32 %v4676_v62, %v3496_v58  ;;  %v3505_v35 = vmul.f32 %v4676_v62, %v3497_v5  ;;  %v3506_v8 = vmul.f32 %v4676_v62, %v3498_v32  ;;  %v5874_v30 = vadd.f32 %v4677_v22, %v3499_v7 }
 0xd1f   :  { %v5876_v26 = vadd.f32 %v4677_v22, %v3500_v42  ;;  %v5878_v11 = vadd.f32 %v4677_v22, %v3501_v14  ;;  %v5880_v10 = vadd.f32 %v4677_v22, %v3502_v44  ;;  %v5882_v24 = vadd.f32 %v4677_v22, %v3503_v61 }
 0xd20   :  { %v4633_v27 = vpop.eup %4632  ;;  %v5884_v36 = vadd.f32 %v4677_v22, %v3504_v51  ;;  %v5886_v56 = vadd.f32 %v4677_v22, %v3505_v35  ;;  %v5888_v47 = vadd.f32 %v4677_v22, %v3506_v8  ;;  %v3515_v37 = vpack.c.bf16 %v5874_v30, %v5874_v30 }
 0xd21   :  { %v2009_v38 = vrot.slane %v4633_v27, 1  ;;  %v2010_v19 = vrot.slane %v4633_v27, 2  ;;  %v2011_v41 = vrot.slane %v4633_v27, 3  ;;  %v2012_v48 = vrot.slane %v4633_v27, 4 }
 0xd22   :  { %v2013_v60 = vrot.slane %v4633_v27, 5  ;;  %v2014_v43 = vrot.slane %v4633_v27, 6  ;;  %v2015_v15 = vrot.slane %v4633_v27, 7  ;;  %v2024_v59 = vmul.f32 %v4633_v27, %v5808_v50 }
 0xd23   :  { %v2025_v45 = vmul.f32 %v2009_v38, %v5811_v17  ;;  %v2026_v40 = vmul.f32 %v2010_v19, %v5814_v12  ;;  %v2027_v21 = vmul.f32 %v2011_v41, %v5818_v31  ;;  %v2028_v52 = vmul.f32 %v2012_v48, %v5821_v20  ;;  %v5913_v31 = vld [vmem:[%s6128_s13] ss:$0 sm:$0xff] }
 0xd24   :  { %v2029_v55 = vmul.f32 %v2013_v60, %v5824_v28  ;;  %v2030_v63 = vmul.f32 %v2014_v43, %v5828_v33  ;;  %v2031_v0 = vmul.f32 %v2015_v15, %v5831_v23  ;;  %v2038_v2 = vmul.f32 %v5895_v49, %v2024_v59 }
 0xd25   :  { %v2039_v53 = vmul.f32 %v5895_v49, %v2025_v45  ;;  %v2040_v50 = vmul.f32 %v5895_v49, %v2026_v40  ;;  %v2041_v17 = vmul.f32 %v5895_v49, %v2027_v21  ;;  %v2042_v12 = vmul.f32 %v5895_v49, %v2028_v52 }
 0xd26   :  { %v2043_v20 = vmul.f32 %v5895_v49, %v2029_v55  ;;  %v2044_v28 = vmul.f32 %v5895_v49, %v2030_v63  ;;  %v2045_v33 = vmul.f32 %v5895_v49, %v2031_v0  ;;  %v3516_v23 = vpack.c.bf16 %v5876_v26, %v5876_v26 }
 0xd27   :  { %v5921_v3 = vadd.f32 %v5913_v31, %v2039_v53  ;;  %v5924_v4 = vadd.f32 %v5913_v31, %v2040_v50  ;;  %v5927_v9 = vadd.f32 %v5913_v31, %v2041_v17  ;;  %v5930_v29 = vadd.f32 %v5913_v31, %v2042_v12 }
 0xd28   :  { %v5933_v16 = vadd.f32 %v5913_v31, %v2043_v20  ;;  %v3517_v57 = vpack.c.bf16 %v5878_v11, %v5878_v11  ;;  %v3518_v25 = vpack.c.bf16 %v5880_v10, %v5880_v10  ;;  %v3519_v1 = vpack.c.bf16 %v5882_v24, %v5882_v24 }
 0xd29   :  { %v2052_v39 = vadd.f32 %v5913_v31, %v2038_v2  ;;  %v2058_v46 = vadd.f32 %v5913_v31, %v2044_v28  ;;  %v2068_v18 = vrot.slane %v5921_v3, 7  ;;  %v2070_v34 = vrot.slane %v5924_v4, 6 }
 0xd2a   :  { %v2059_v54 = vadd.f32 %v5913_v31, %v2045_v33  ;;  %v2072_v13 = vrot.slane %v5927_v9, 5  ;;  %v2074_v58 = vrot.slane %v5930_v29, 4  ;;  %v3520_v5 = vpack.c.bf16 %v5884_v36, %v5884_v36 }
 0xd2b   :  { %v2069_v32 = vsel %vm270_vm1, %v2068_v18, %v2052_v39  ;;  %v2076_v62 = vrot.slane %v5933_v16, 3  ;;  %v3521_v7 = vpack.c.bf16 %v5886_v56, %v5886_v56  ;;  %v3532_v42 = vunpack.c.l.b16 %v3516_v23 }
 0xd2c   :  { %v2071_v14 = vsel %vm273_vm2, %v2070_v34, %v2069_v32  ;;  %v3522_v44 = vpack.c.bf16 %v5888_v47, %v5888_v47  ;;  %v3533_v61 = vunpack.c.l.b16 %v3517_v57  ;;  %v3534_v51 = vunpack.c.l.b16 %v3518_v25 }
 0xd2d   :  { %v2073_v35 = vsel %vm276_vm3, %v2072_v13, %v2071_v14  ;;  %v2078_v8 = vrot.slane %v2058_v46, 2  ;;  %v3531_v22 = vunpack.c.l.b16 %v3515_v37  ;;  %v3535_v27 = vunpack.c.l.b16 %v3519_v1 }
 0xd2e   :  { %v2075_v38 = vsel %vm279_vm4, %v2074_v58, %v2073_v35  ;;  %v3536_v19 = vunpack.c.l.b16 %v3520_v5  ;;  %v3539_v41 = vrot.slane %v3532_v42, 7  ;;  %v3541_v48 = vrot.slane %v3533_v61, 6 }
 0xd2f   :  { %v2077_v60 = vsel %vm282_vm5, %v2076_v62, %v2075_v38  ;;  %v2080_v43 = vrot.slane %v2059_v54, 1  ;;  %v3537_v15 = vunpack.c.l.b16 %v3521_v7  ;;  %v3538_v45 = vunpack.c.l.b16 %v3522_v44 }
 0xd30   :  { %v2079_v59 = vsel %vm285_vm6, %v2078_v8, %v2077_v60  ;;  %v3540_v40 = vsel %vm270_vm1, %v3539_v41, %v3531_v22  ;;  %v3543_v21 = vrot.slane %v3534_v51, 5  ;;  %v3545_v55 = vrot.slane %v3535_v27, 4 }
 0xd31   :  { %v2081_v52 = vsel %vm288_vm7, %v2080_v43, %v2079_v59  ;;  %v3542_v37 = vsel %vm273_vm2, %v3541_v48, %v3540_v40  ;;  %v3547_v2 = vrot.slane %v3536_v19, 3  ;;  %v3549_v50 = vrot.slane %v3537_v15, 2 }
 0xd32   :  { %v2083_v63 = vsel %vm303_vm8, %v2081_v52, 0.0  ;;  %v3544_v0 = vsel %vm276_vm3, %v3543_v21, %v3542_v37  ;;  %v3551_v12 = vrot.slane %v3538_v45, 1  ;;  %v4678_v37 = vld [vmem:[%s6122_s7] ss:$0 sm:$0xff] }
 0xd33   :  { %2084 = vadd.xlane.f32.xlu0 %v2083_v63  ;;  %v3546_v53 = vsel %vm279_vm4, %v3545_v55, %v3544_v0 }
 0xd34   :  { %v3548_v17 = vsel %vm282_vm5, %v3547_v2, %v3546_v53 }
 0xd35   :  { %v3550_v20 = vsel %vm285_vm6, %v3549_v50, %v3548_v17 }
 0xd36   :  { %v3552_v28 = vsel %vm288_vm7, %v3551_v12, %v3550_v20 }
 0xd37   :  { %v3553_v33 = vpack.c.b16 %v3552_v28, %v3552_v28 }
 0xd39   :  { %4546 = vmatmul.mubr.msk.bf16.vlgmr.msra.gmra.mrb[100].mxu1 %vm303_vm8, %v3553_v33  ;;  %v5991_v33 = vld [vmem:[%s6129_s14] ss:$0 sm:$0xff]  ;;  %s4705_s14 = smov [#allocation2]  }
 0xdc0   :  { %v2085_v23 = vpop.xlane.xlu0 %2084 }
 0xdc1   :  { %v2086_v57 = vmul.f32 0.03125, %v2085_v23 }
 0xdc3   :  { %v2088_v25 = vrot.slane %v2086_v57, 1  ;;  %v2089_v1 = vrot.slane %v2086_v57, 2  ;;  %v2090_v18 = vrot.slane %v2086_v57, 3  ;;  %v2091_v34 = vrot.slane %v2086_v57, 4 }
 0xdc4   :  { %v2092_v13 = vrot.slane %v2086_v57, 5  ;;  %v2093_v58 = vrot.slane %v2086_v57, 6  ;;  %v2094_v5 = vrot.slane %v2086_v57, 7  ;;  %v2103_v32 = vsub.f32 %v2052_v39, %v2086_v57 }
 0xdc5   :  { %v2104_v62 = vsub.f32 %v5921_v3, %v2088_v25  ;;  %v2105_v7 = vsub.f32 %v5924_v4, %v2089_v1  ;;  %v2106_v42 = vsub.f32 %v5927_v9, %v2090_v18  ;;  %v2107_v14 = vsub.f32 %v5930_v29, %v2091_v34 }
 0xdc6   :  { %v2108_v44 = vsub.f32 %v5933_v16, %v2092_v13  ;;  %v2109_v61 = vsub.f32 %v2058_v46, %v2093_v58  ;;  %v2110_v51 = vsub.f32 %v2059_v54, %v2094_v5  ;;  %v2111_v38 = vmul.f32 %v2103_v32, %v2103_v32  ;;  %v5996_v5 = vld [vmem:[%s6130_s15] ss:$0 sm:$0xff]  ;;  %s3935_s15 = sshll.u32 %s4705_s14, 4  ;;  %s3936_s15 = int_to_ptr.vmem [resolvable:$true] %s3935_s15 }
 0xdc7   :  { %v2112_v35 = vmul.f32 %v2104_v62, %v2104_v62  ;;  %v2113_v8 = vmul.f32 %v2105_v7, %v2105_v7  ;;  %v2114_v22 = vmul.f32 %v2106_v42, %v2106_v42  ;;  %v2115_v27 = vmul.f32 %v2107_v14, %v2107_v14  ;;  %s4679_s25 = scalar_lea.vmem %s3936_s15, 256  ;;  %p4684_p1 = scmp.lt.s32.totalorder %s3936_s15, %s3936_s15 }
 0xdc8   :  { %v2116_v19 = vmul.f32 %v2108_v44, %v2108_v44  ;;  %v2117_v48 = vmul.f32 %v2109_v61, %v2109_v61  ;;  %v2118_v3 = vmul.f32 %v2110_v51, %v2110_v51  ;;  %p4680_p0 = scmp.ne.s32.totalorder %s3936_s15, %s4679_s25  ;;  %p4685_p2 = scmp.lt.s32.totalorder %s4679_s25, %s4679_s25 }
 0xdc9   :  { %v2127_v41 = vrot.slane %v2112_v35, 7  ;;  %v2129_v39 = vrot.slane %v2113_v8, 6  ;;  %v2131_v60 = vrot.slane %v2114_v22, 5  ;;  %v2133_v29 = vrot.slane %v2115_v27, 4 }
 0xdca   :  { %v2135_v46 = vrot.slane %v2116_v19, 3  ;;  %v2137_v43 = vrot.slane %v2117_v48, 2  ;;  %v2139_v59 = vrot.slane %v2118_v3, 1  ;;  %p4686_p3 = por %p4685_p2, %p4684_p1 }
 0xdcb   :  { %v2128_v4 = vsel %vm270_vm1, %v2127_v41, %v2111_v38 }
 0xdcc   :  { %v2130_v9 = vsel %vm273_vm2, %v2129_v39, %v2128_v4  ;;  %p4687_p4 = pnand %p4686_p3, %p4680_p0 }
 0xdcd   :  { %v2132_v16 = vsel %vm276_vm3, %v2131_v60, %v2130_v9 }
 0xdce   :  { %v2134_v54 = vsel %vm279_vm4, %v2133_v29, %v2132_v16 }
 0xdcf   :  { %v2136_v15 = vsel %vm282_vm5, %v2135_v46, %v2134_v54 }
 0xdd0   :  { %v2138_v45 = vsel %vm285_vm6, %v2137_v43, %v2136_v15 }
 0xdd1   :  { %v2140_v40 = vsel %vm288_vm7, %v2139_v59, %v2138_v45 }
 0xdd2   :  { %v2142_v21 = vsel %vm303_vm8, %v2140_v40, 0.0 }
 0xdd3   :  { %2143 = vadd.xlane.f32.xlu0 %v2142_v21 }
 0xe0c   :  { %v3591_v52 = vpop.f32.mrb[100].mxu1 }
 0xe0d   :  { %v3592_v55 = vadd.f32 %v4678_v37, %v3591_v52  ;;  %v4547_v63 = vpop.f32.mrb[101].mxu1 }
 0xe0e   :  { %v3594_v0 = vpop.f32.mrb[102].mxu1 }
 0xe0f   :  { %v3597_v2 = vmax.f32 %v3592_v55, 0.0  ;;  %v4548_v53 = vpop.f32.mrb[103].mxu1 }
 0xe11   :  { %v3598_v50 = vpack.c.bf16 %v3597_v2, %v3597_v2 }
 0xe13   :  { %4558 = vmatmul.mubr.msk.bf16.vlgmr.msra.gmra.mrb[100].mxu0 %vm1852_vm11, %v3598_v50 }
 0xe60   :  { %v2144_v17 = vpop.xlane.xlu0 %2143 }
 0xe61   :  { %v2145_v12 = vmul.f32 0.03125, %v2144_v17 }
 0xe63   :  { %v2146_v20 = vadd.f32 1e-05, %v2145_v12 }
 0xe65   :  { %4634 = vrsqrt.f32 %v2146_v20 }
 0xe6f   :  { %v4635_v28 = vpop.eup %4634 }
 0xe70   :  { %v2149_v23 = vrot.slane %v4635_v28, 1  ;;  %v2150_v57 = vrot.slane %v4635_v28, 2  ;;  %v2151_v25 = vrot.slane %v4635_v28, 3  ;;  %v2152_v1 = vrot.slane %v4635_v28, 4 }
 0xe71   :  { %v2153_v18 = vrot.slane %v4635_v28, 5  ;;  %v2154_v34 = vrot.slane %v4635_v28, 6  ;;  %v2155_v13 = vrot.slane %v4635_v28, 7  ;;  %v2164_v58 = vmul.f32 %v4635_v28, %v2103_v32 }
 0xe72   :  { %v2165_v35 = vmul.f32 %v2149_v23, %v2104_v62  ;;  %v2166_v8 = vmul.f32 %v2150_v57, %v2105_v7  ;;  %v2167_v22 = vmul.f32 %v2151_v25, %v2106_v42  ;;  %v2168_v27 = vmul.f32 %v2152_v1, %v2107_v14 }
 0xe73   :  { %v2169_v38 = vmul.f32 %v2153_v18, %v2108_v44  ;;  %v2170_v19 = vmul.f32 %v2154_v34, %v2109_v61  ;;  %v2171_v41 = vmul.f32 %v2155_v13, %v2110_v51  ;;  %v2178_v39 = vmul.f32 %v5991_v33, %v2164_v58 }
 0xe74   :  { %v2179_v48 = vmul.f32 %v5991_v33, %v2165_v35  ;;  %v2180_v3 = vmul.f32 %v5991_v33, %v2166_v8  ;;  %v2181_v32 = vmul.f32 %v5991_v33, %v2167_v22  ;;  %v2182_v4 = vmul.f32 %v5991_v33, %v2168_v27 }
 0xe75   :  { %v2183_v60 = vmul.f32 %v5991_v33, %v2169_v38  ;;  %v2184_v62 = vmul.f32 %v5991_v33, %v2170_v19  ;;  %v2185_v7 = vmul.f32 %v5991_v33, %v2171_v41  ;;  %v2192_v42 = vadd.f32 %v5996_v5, %v2178_v39 }
 0xe76   :  { %v2193_v14 = vadd.f32 %v5996_v5, %v2179_v48  ;;  %v2194_v44 = vadd.f32 %v5996_v5, %v2180_v3  ;;  %v2195_v61 = vadd.f32 %v5996_v5, %v2181_v32  ;;  %v2196_v51 = vadd.f32 %v5996_v5, %v2182_v4 }
 0xe77   :  { %v2197_v9 = vadd.f32 %v5996_v5, %v2183_v60  ;;  %v2198_v29 = vadd.f32 %v5996_v5, %v2184_v62  ;;  %v2199_v16 = vadd.f32 %v5996_v5, %v2185_v7  ;;  %2201 = vst.msk [vmem:[#allocation2] sm:$0x1] %vm2200_vm12, %v2192_v42 }
 0xe78   :  { %2202 = vst.msk [vmem:[#allocation2 + $0x2] sm:$0x1] %vm2200_vm12, %v2193_v14  ;;  %2203 = vst.msk [vmem:[#allocation2 + $0x4] sm:$0x1] %vm2200_vm12, %v2194_v44 }
 0xe79   :  { %2204 = vst.msk [vmem:[#allocation2 + $0x6] sm:$0x1] %vm2200_vm12, %v2195_v61  ;;  %2205 = vst.msk [vmem:[#allocation2 + $0x8] sm:$0x1] %vm2200_vm12, %v2196_v51 }
 0xe7a   :  { %2206 = vst.msk [vmem:[#allocation2 + $0xa] sm:$0x1] %vm2200_vm12, %v2197_v9  ;;  %2207 = vst.msk [vmem:[#allocation2 + $0xc] sm:$0x1] %vm2200_vm12, %v2198_v29 }
 0xe7b   :  { %2208 = vst.msk [vmem:[#allocation2 + $0xe] sm:$0x1] %vm2200_vm12, %v2199_v16 }
 0xee6   :  { %v3636_v46 = vpop.f32.mrb[100].mxu0 }
 0xee7   :  { %v3637_v54 = vadd.f32 %v5695_v6, %v3636_v46  ;;  %v4559_v43 = vpop.f32.mrb[101].mxu0 }
 0xee8   :  { %v3639_v15 = vpop.f32.mrb[102].mxu0 }
 0xee9   :  { %v4560_v59 = vpop.f32.mrb[103].mxu0  ;;  %v3643_v45 = vrot.slane %v3637_v54, 1  ;;  %v3644_v40 = vrot.slane %v3637_v54, 2  ;;  %v3645_v21 = vrot.slane %v3637_v54, 3  ;;  %v3646_v52 = vrot.slane %v3637_v54, 4 }
 0xeea   :  { %v3647_v37 = vrot.slane %v3637_v54, 5  ;;  %v3648_v55 = vrot.slane %v3637_v54, 6  ;;  %v3649_v63 = vrot.slane %v3637_v54, 7  ;;  %v3658_v6 = vadd.f32 %v3637_v54, %v5874_v30 }
 0xeeb   :  { %v3659_v0 = vadd.f32 %v3643_v45, %v5876_v26  ;;  %v3660_v2 = vadd.f32 %v3644_v40, %v5878_v11  ;;  %v3661_v53 = vadd.f32 %v3645_v21, %v5880_v10  ;;  %v3662_v50 = vadd.f32 %v3646_v52, %v5882_v24 }
 0xeec   :  { %v3663_v17 = vadd.f32 %v3647_v37, %v5884_v36  ;;  %v3664_v28 = vadd.f32 %v3648_v55, %v5886_v56  ;;  %v3665_v23 = vadd.f32 %v3649_v63, %v5888_v47 }
 0xeed   :  { %v3674_v12 = vrot.slane %v3659_v0, 7  ;;  %v3676_v20 = vrot.slane %v3660_v2, 6  ;;  %v3678_v25 = vrot.slane %v3661_v53, 5  ;;  %v3680_v11 = vrot.slane %v3662_v50, 4 }
 0xeee   :  { %v3682_v1 = vrot.slane %v3663_v17, 3  ;;  %v3684_v30 = vrot.slane %v3664_v28, 2  ;;  %v3686_v18 = vrot.slane %v3665_v23, 1 }
 0xeef   :  { %v3675_v57 = vsel %vm270_vm1, %v3674_v12, %v3658_v6 }
 0xef0   :  { %v3677_v26 = vsel %vm273_vm2, %v3676_v20, %v3675_v57 }
 0xef1   :  { %v3679_v10 = vsel %vm276_vm3, %v3678_v25, %v3677_v26 }
 0xef2   :  { %v3681_v24 = vsel %vm279_vm4, %v3680_v11, %v3679_v10 }
 0xef3   :  { %v3683_v36 = vsel %vm282_vm5, %v3682_v1, %v3681_v24 }
 0xef4   :  { %v3685_v34 = vsel %vm285_vm6, %v3684_v30, %v3683_v36 }
 0xef5   :  { %v3687_v56 = vsel %vm288_vm7, %v3686_v18, %v3685_v34 }
 0xef6   :  { %v3689_v47 = vsel %vm303_vm8, %v3687_v56, 0.0 }
 0xef7   :  { %3690 = vadd.xlane.f32.xlu1 %v3689_v47 }
 0xf84   :  { %v3691_v13 = vpop.xlane.xlu1 %3690 }
 0xf85   :  { %v3692_v58 = vmul.f32 0.03125, %v3691_v13 }
 0xf87   :  { %v3694_v35 = vrot.slane %v3692_v58, 1  ;;  %v3695_v8 = vrot.slane %v3692_v58, 2  ;;  %v3696_v22 = vrot.slane %v3692_v58, 3  ;;  %v3697_v27 = vrot.slane %v3692_v58, 4 }
 0xf88   :  { %v3698_v38 = vrot.slane %v3692_v58, 5  ;;  %v3699_v19 = vrot.slane %v3692_v58, 6  ;;  %v3700_v41 = vrot.slane %v3692_v58, 7  ;;  %v3709_v39 = vsub.f32 %v3658_v6, %v3692_v58 }
 0xf89   :  { %v3710_v48 = vsub.f32 %v3659_v0, %v3694_v35  ;;  %v3711_v3 = vsub.f32 %v3660_v2, %v3695_v8  ;;  %v3712_v32 = vsub.f32 %v3661_v53, %v3696_v22  ;;  %v3713_v4 = vsub.f32 %v3662_v50, %v3697_v27 }
 0xf8a   :  { %v3714_v60 = vsub.f32 %v3663_v17, %v3698_v38  ;;  %v3715_v62 = vsub.f32 %v3664_v28, %v3699_v19  ;;  %v3716_v7 = vsub.f32 %v3665_v23, %v3700_v41  ;;  %v3717_v51 = vmul.f32 %v3709_v39, %v3709_v39 }
 0xf8b   :  { %v3718_v42 = vmul.f32 %v3710_v48, %v3710_v48  ;;  %v3719_v14 = vmul.f32 %v3711_v3, %v3711_v3  ;;  %v3720_v44 = vmul.f32 %v3712_v32, %v3712_v32  ;;  %v3721_v61 = vmul.f32 %v3713_v4, %v3713_v4 }
 0xf8c   :  { %v3722_v9 = vmul.f32 %v3714_v60, %v3714_v60  ;;  %v3723_v46 = vmul.f32 %v3715_v62, %v3715_v62  ;;  %v3724_v54 = vmul.f32 %v3716_v7, %v3716_v7 }
 0xf8d   :  { %v3733_v29 = vrot.slane %v3718_v42, 7  ;;  %v3735_v16 = vrot.slane %v3719_v14, 6  ;;  %v3737_v15 = vrot.slane %v3720_v44, 5  ;;  %v3739_v45 = vrot.slane %v3721_v61, 4 }
 0xf8e   :  { %v3741_v21 = vrot.slane %v3722_v9, 3  ;;  %v3743_v37 = vrot.slane %v3723_v46, 2  ;;  %v3745_v63 = vrot.slane %v3724_v54, 1 }
 0xf8f   :  { %v3734_v43 = vsel %vm270_vm1, %v3733_v29, %v3717_v51 }
 0xf90   :  { %v3736_v59 = vsel %vm273_vm2, %v3735_v16, %v3734_v43 }
 0xf91   :  { %v3738_v40 = vsel %vm276_vm3, %v3737_v15, %v3736_v59 }
 0xf92   :  { %v3740_v52 = vsel %vm279_vm4, %v3739_v45, %v3738_v40 }
 0xf93   :  { %v3742_v55 = vsel %vm282_vm5, %v3741_v21, %v3740_v52 }
 0xf94   :  { %v3744_v0 = vsel %vm285_vm6, %v3743_v37, %v3742_v55 }
 0xf95   :  { %v3746_v2 = vsel %vm288_vm7, %v3745_v63, %v3744_v0 }
 0xf96   :  { %v3748_v53 = vsel %vm303_vm8, %v3746_v2, 0.0 }
 0xf97   :  { %3749 = vadd.xlane.f32.xlu1 %v3748_v53 }
0x1024   :  { %v3750_v50 = vpop.xlane.xlu1 %3749 }
0x1025   :  { %v3751_v6 = vmul.f32 0.03125, %v3750_v50 }
0x1027   :  { %v3752_v17 = vadd.f32 1e-05, %v3751_v6 }
0x1029   :  { %4636 = vrsqrt.f32 %v3752_v17 }
0x1033   :  { %v4637_v12 = vpop.eup %4636 }
0x1034   :  { %v3755_v20 = vrot.slane %v4637_v12, 1  ;;  %v3756_v28 = vrot.slane %v4637_v12, 2  ;;  %v3757_v23 = vrot.slane %v4637_v12, 3  ;;  %v3758_v57 = vrot.slane %v4637_v12, 4 }
0x1035   :  { %v3759_v25 = vrot.slane %v4637_v12, 5  ;;  %v3760_v26 = vrot.slane %v4637_v12, 6  ;;  %v3761_v11 = vrot.slane %v4637_v12, 7  ;;  %v3770_v10 = vmul.f32 %v4637_v12, %v3709_v39 }
0x1036   :  { %v3771_v1 = vmul.f32 %v3755_v20, %v3710_v48  ;;  %v3772_v24 = vmul.f32 %v3756_v28, %v3711_v3  ;;  %v3773_v30 = vmul.f32 %v3757_v23, %v3712_v32  ;;  %v3774_v36 = vmul.f32 %v3758_v57, %v3713_v4 }
0x1037   :  { %v3775_v18 = vmul.f32 %v3759_v25, %v3714_v60  ;;  %v3776_v34 = vmul.f32 %v3760_v26, %v3715_v62  ;;  %v3777_v56 = vmul.f32 %v3761_v11, %v3716_v7  ;;  %v3778_v47 = vmul.f32 %v5895_v49, %v3770_v10 }
0x1038   :  { %v3779_v13 = vmul.f32 %v5895_v49, %v3771_v1  ;;  %v3780_v58 = vmul.f32 %v5895_v49, %v3772_v24  ;;  %v3781_v35 = vmul.f32 %v5895_v49, %v3773_v30  ;;  %v3782_v8 = vmul.f32 %v5895_v49, %v3774_v36 }
0x1039   :  { %v3783_v22 = vmul.f32 %v5895_v49, %v3775_v18  ;;  %v3784_v27 = vmul.f32 %v5895_v49, %v3776_v34  ;;  %v3785_v38 = vmul.f32 %v5895_v49, %v3777_v56  ;;  %v3786_v3 = vadd.f32 %v5913_v31, %v3778_v47 }
0x103a   :  { %v3787_v19 = vadd.f32 %v5913_v31, %v3779_v13  ;;  %v3788_v41 = vadd.f32 %v5913_v31, %v3780_v58  ;;  %v3789_v39 = vadd.f32 %v5913_v31, %v3781_v35  ;;  %v3790_v48 = vadd.f32 %v5913_v31, %v3782_v8 }
0x103b   :  { %v3791_v32 = vadd.f32 %v5913_v31, %v3783_v22  ;;  %v3792_v62 = vadd.f32 %v5913_v31, %v3784_v27  ;;  %v3793_v7 = vadd.f32 %v5913_v31, %v3785_v38 }
0x103c   :  { %v3802_v4 = vrot.slane %v3787_v19, 7  ;;  %v3804_v60 = vrot.slane %v3788_v41, 6  ;;  %v3806_v42 = vrot.slane %v3789_v39, 5  ;;  %v3808_v44 = vrot.slane %v3790_v48, 4 }
0x103d   :  { %v3810_v51 = vrot.slane %v3791_v32, 3  ;;  %v3812_v29 = vrot.slane %v3792_v62, 2  ;;  %v3814_v46 = vrot.slane %v3793_v7, 1 }
0x103e   :  { %v3803_v49 = vsel %vm270_vm1, %v3802_v4, %v3786_v3 }
0x103f   :  { %v3805_v14 = vsel %vm273_vm2, %v3804_v60, %v3803_v49 }
0x1040   :  { %v3807_v61 = vsel %vm276_vm3, %v3806_v42, %v3805_v14 }
0x1041   :  { %v3809_v9 = vsel %vm279_vm4, %v3808_v44, %v3807_v61 }
0x1042   :  { %v3811_v16 = vsel %vm282_vm5, %v3810_v51, %v3809_v9 }
0x1043   :  { %v3813_v54 = vsel %vm285_vm6, %v3812_v29, %v3811_v16 }
0x1044   :  { %v3815_v43 = vsel %vm288_vm7, %v3814_v46, %v3813_v54 }
0x1045   :  { %v3817_v31 = vsel %vm303_vm8, %v3815_v43, 0.0 }
0x1046   :  { %3818 = vadd.xlane.f32.xlu1 %v3817_v31 }
0x10d3   :  { %v3819_v15 = vpop.xlane.xlu1 %3818 }
0x10d4   :  { %v3820_v59 = vmul.f32 0.03125, %v3819_v15 }
0x10d6   :  { %v3822_v45 = vrot.slane %v3820_v59, 1  ;;  %v3823_v40 = vrot.slane %v3820_v59, 2  ;;  %v3824_v21 = vrot.slane %v3820_v59, 3  ;;  %v3825_v52 = vrot.slane %v3820_v59, 4 }
0x10d7   :  { %v3826_v37 = vrot.slane %v3820_v59, 5  ;;  %v3827_v55 = vrot.slane %v3820_v59, 6  ;;  %v3828_v63 = vrot.slane %v3820_v59, 7  ;;  %v3837_v0 = vsub.f32 %v3786_v3, %v3820_v59 }
0x10d8   :  { %v3838_v2 = vsub.f32 %v3787_v19, %v3822_v45  ;;  %v3839_v53 = vsub.f32 %v3788_v41, %v3823_v40  ;;  %v3840_v50 = vsub.f32 %v3789_v39, %v3824_v21  ;;  %v3841_v6 = vsub.f32 %v3790_v48, %v3825_v52 }
0x10d9   :  { %v3842_v17 = vsub.f32 %v3791_v32, %v3826_v37  ;;  %v3843_v12 = vsub.f32 %v3792_v62, %v3827_v55  ;;  %v3844_v20 = vsub.f32 %v3793_v7, %v3828_v63  ;;  %v3845_v26 = vmul.f32 %v3837_v0, %v3837_v0 }
0x10da   :  { %v3846_v28 = vmul.f32 %v3838_v2, %v3838_v2  ;;  %v3847_v23 = vmul.f32 %v3839_v53, %v3839_v53  ;;  %v3848_v57 = vmul.f32 %v3840_v50, %v3840_v50  ;;  %v3849_v25 = vmul.f32 %v3841_v6, %v3841_v6 }
0x10db   :  { %v3850_v11 = vmul.f32 %v3842_v17, %v3842_v17  ;;  %v3851_v24 = vmul.f32 %v3843_v12, %v3843_v12  ;;  %v3852_v30 = vmul.f32 %v3844_v20, %v3844_v20 }
0x10dc   :  { %v3861_v10 = vrot.slane %v3846_v28, 7  ;;  %v3863_v1 = vrot.slane %v3847_v23, 6  ;;  %v3865_v18 = vrot.slane %v3848_v57, 5  ;;  %v3867_v56 = vrot.slane %v3849_v25, 4 }
0x10dd   :  { %v3869_v13 = vrot.slane %v3850_v11, 3  ;;  %v3871_v35 = vrot.slane %v3851_v24, 2  ;;  %v3873_v22 = vrot.slane %v3852_v30, 1 }
0x10de   :  { %v3862_v36 = vsel %vm270_vm1, %v3861_v10, %v3845_v26 }
0x10df   :  { %v3864_v34 = vsel %vm273_vm2, %v3863_v1, %v3862_v36 }
0x10e0   :  { %v3866_v47 = vsel %vm276_vm3, %v3865_v18, %v3864_v34 }
0x10e1   :  { %v3868_v58 = vsel %vm279_vm4, %v3867_v56, %v3866_v47 }
0x10e2   :  { %v3870_v8 = vsel %vm282_vm5, %v3869_v13, %v3868_v58 }
0x10e3   :  { %v3872_v27 = vsel %vm285_vm6, %v3871_v35, %v3870_v8 }
0x10e4   :  { %v3874_v38 = vsel %vm288_vm7, %v3873_v22, %v3872_v27 }
0x10e5   :  { %v3876_v19 = vsel %vm303_vm8, %v3874_v38, 0.0 }
0x10e6   :  { %3877 = vadd.xlane.f32.xlu1 %v3876_v19 }
0x1173   :  { %v3878_v41 = vpop.xlane.xlu1 %3877 }
0x1174   :  { %v3879_v39 = vmul.f32 0.03125, %v3878_v41 }
0x1176   :  { %v3880_v48 = vadd.f32 1e-05, %v3879_v39 }
0x1178   :  { %4638 = vrsqrt.f32 %v3880_v48 }
0x1182   :  { %v4639_v3 = vpop.eup %4638 }
0x1183   :  { %v3883_v32 = vrot.slane %v4639_v3, 1  ;;  %v3884_v4 = vrot.slane %v4639_v3, 2  ;;  %v3885_v60 = vrot.slane %v4639_v3, 3  ;;  %v3886_v62 = vrot.slane %v4639_v3, 4 }
0x1184   :  { %v3887_v7 = vrot.slane %v4639_v3, 5  ;;  %v3888_v49 = vrot.slane %v4639_v3, 6  ;;  %v3889_v42 = vrot.slane %v4639_v3, 7  ;;  %v3898_v14 = vmul.f32 %v4639_v3, %v3837_v0 }
0x1185   :  { %v3899_v44 = vmul.f32 %v3883_v32, %v3838_v2  ;;  %v3900_v61 = vmul.f32 %v3884_v4, %v3839_v53  ;;  %v3901_v51 = vmul.f32 %v3885_v60, %v3840_v50  ;;  %v3902_v9 = vmul.f32 %v3886_v62, %v3841_v6 }
0x1186   :  { %v3903_v29 = vmul.f32 %v3887_v7, %v3842_v17  ;;  %v3904_v16 = vmul.f32 %v3888_v49, %v3843_v12  ;;  %v3905_v46 = vmul.f32 %v3889_v42, %v3844_v20  ;;  %v3906_v54 = vmul.f32 %v5991_v33, %v3898_v14 }
0x1187   :  { %v3907_v43 = vmul.f32 %v5991_v33, %v3899_v44  ;;  %v3908_v31 = vmul.f32 %v5991_v33, %v3900_v61  ;;  %v3909_v15 = vmul.f32 %v5991_v33, %v3901_v51  ;;  %v3910_v59 = vmul.f32 %v5991_v33, %v3902_v9 }
0x1188   :  { %v3911_v45 = vmul.f32 %v5991_v33, %v3903_v29  ;;  %v3912_v40 = vmul.f32 %v5991_v33, %v3904_v16  ;;  %v3913_v21 = vmul.f32 %v5991_v33, %v3905_v46  ;;  %v3914_v52 = vadd.f32 %v5996_v5, %v3906_v54 }
0x1189   :  { %v3915_v37 = vadd.f32 %v5996_v5, %v3907_v43  ;;  %v3916_v55 = vadd.f32 %v5996_v5, %v3908_v31  ;;  %v3917_v63 = vadd.f32 %v5996_v5, %v3909_v15  ;;  %v3918_v0 = vadd.f32 %v5996_v5, %v3910_v59 }
0x118a   :  { %v3919_v2 = vadd.f32 %v5996_v5, %v3911_v45  ;;  %v3920_v53 = vadd.f32 %v5996_v5, %v3912_v40  ;;  %v3921_v50 = vadd.f32 %v5996_v5, %v3913_v21  ;;  %3922 = vst.msk [vmem:[#allocation2 + $0x1] sm:$0x1] %vm2200_vm12, %v3914_v52 }
0x118b   :  { %3923 = vst.msk [vmem:[#allocation2 + $0x3] sm:$0x1] %vm2200_vm12, %v3915_v37  ;;  %3924 = vst.msk [vmem:[#allocation2 + $0x5] sm:$0x1] %vm2200_vm12, %v3916_v55 }
0x118c   :  { %3925 = vst.msk [vmem:[#allocation2 + $0x7] sm:$0x1] %vm2200_vm12, %v3917_v63  ;;  %3926 = vst.msk [vmem:[#allocation2 + $0x9] sm:$0x1] %vm2200_vm12, %v3918_v0 }
0x118d   :  { %3927 = vst.msk [vmem:[#allocation2 + $0xb] sm:$0x1] %vm2200_vm12, %v3919_v2  ;;  %3928 = vst.msk [vmem:[#allocation2 + $0xd] sm:$0x1] %vm2200_vm12, %v3920_v53 }
0x118e   :  { %3929 = vst.msk [vmem:[#allocation2 + $0xf] sm:$0x1] %vm2200_vm12, %v3921_v50 }
0x118f   :  { %4690 = shalt.err (!%p4687_p4)
}
0x1190   :  { %s4691_s27 = scalar_lea.hbm %s6131_s16, 256 }
0x1191   :  { %p4692_p5 = scmp.ne.s32.totalorder %s6131_s16, %s4691_s27  ;;  %p4695_p6 = scmp.lt.u32.totalorder %s4691_s27, %s6131_s16 }
0x1193   :  { %p4697_p7 = pnand %p4695_p6, %p4692_p5 }
0x1195   :  { %4700 = shalt.err (!%p4697_p7)
}
0x1196   :  { %s4706_s30 = smov 32   ;;  %s4707_s8 = smov 2  }
0x1197   :  { %3941 = dma.vmem_to_hbm [thread:$0]  %s3936_s15, 256, %s6131_s16, [#allocation3], %s4706_s30, %s4706_s30, %s4707_s8  }
0x1198   :  { %4701 = dma.done.wait [#allocation3], 256  }
0x1199   :  { %4702 = vsyncadd [#allocation3], 4294967040 }
0x119a   :  { %3945 = vsyncpa [#allocation3], 1 }

</bundles_post_ra>
